<compile_context>
chip_gen: v7x
topology: tpu7x:2x2x1
jax: 0.10.0
libtpu: 0.0.40
codegen_flags: <defaults>
</compile_context>

<pallas_src>
import math

import jax
import jax.numpy as jnp
import numpy as np
from jax.experimental import pallas as pl
from jax.experimental.pallas import tpu as pltpu

NB_HIDDEN = 100


# ------------------------------- fused kernel --------------------------------

def _netaux2_kernel(x_ref, t1_ref, b1_ref, t2_ref, b2_ref,
                    fc1w_ref, fc1b_ref, fc2w_ref, fc2b_ref,
                    fc3a_ref, fc3b_ref, fc3bias_ref, fc4w_ref, fc4b_ref,
                    out_ref):
    f32 = jnp.float32
    bf16 = jnp.bfloat16
    pb = out_ref.shape[0]            # digit pairs in this grid block
    n2 = 2 * pb                      # images; row = 2*pair + digit (interleaved)

    # --- conv1: one K=196 Toeplitz GEMM over the whole flattened image -------------
    # x_ref: (n2, 196) image pixels (y*14 + x) on lanes.
    # t1 columns: col = ((dy*2+dx)*36 + (py*6+px))*32 + c, output pos (2py+dy, 2px+dx).
    xflat = x_ref[...].astype(bf16)
    r1 = jnp.dot(xflat, t1_ref[...], preferred_element_type=f32)          # (n2, 4608)
    # 2x2/2 maxpool == lane-aligned max of the four (dy,dx) column groups (1152 lanes).
    p1 = jnp.maximum(jnp.maximum(r1[:, 0:1152], r1[:, 1152:2304]),
                     jnp.maximum(r1[:, 2304:3456], r1[:, 3456:4608]))
    # per-channel bias commutes with max, and relu(maxpool) == maxpool(relu)
    a1 = jnp.maximum(p1 + b1_ref[...], 0.0)            # (n2, 1152) lanes=(py,px,c)

    # --- conv2: one K=1152 Toeplitz GEMM ---------------------------------------------
    # t2 columns: col = ((dy*2+dx)*4 + (py*2+px))*64 + c, output pos (2py+dy, 2px+dx).
    r2 = jnp.dot(a1.astype(bf16), t2_ref[...], preferred_element_type=f32)  # (n2, 1024)
    p2 = jnp.maximum(jnp.maximum(r2[:, 0:256], r2[:, 256:512]),
                     jnp.maximum(r2[:, 512:768], r2[:, 768:1024]))
    a2 = jnp.maximum(p2 + b2_ref[...], 0.0)            # (n2, 256) lanes=(h,w,c)

    # --- shared digit head: fc1 -> relu -> fc2.  The NCHW .view(-1,256) permutation
    #     is folded into the packed fc1 weight, so this is a single K=256 GEMM. -------
    h1 = jnp.dot(a2.astype(bf16), fc1w_ref[...], preferred_element_type=f32) + fc1b_ref[...]
    h1 = jnp.maximum(h1, 0.0)                                              # (n2, 100)
    logits = jnp.dot(h1, fc2w_ref[...], preferred_element_type=f32) + fc2b_ref[...]  # (n2,10)

    # split interleaved (pair, digit) rows — tiny (2*pb x 10) relayout
    lg = logits.reshape(pb, 2, 10)
    x1 = lg[:, 0, :]
    x2 = lg[:, 1, :]

    # --- pair head: fc3(concat(x1,x2)) -> relu -> fc4; the concat is folded into a
    #     split fc3 weight so no lane-dim concat of activations is needed. ------------
    h3 = (jnp.dot(x1, fc3a_ref[...], preferred_element_type=f32)
          + jnp.dot(x2, fc3b_ref[...], preferred_element_type=f32)
          + fc3bias_ref[...])
    h3 = jnp.maximum(h3, 0.0)
    xo = jnp.dot(h3, fc4w_ref[...], preferred_element_type=f32) + fc4b_ref[...]   # (pb,1)

    # single merged output block: lanes [0:10]=x1, [10:20]=x2, [20]=out
    out_ref[...] = jnp.concatenate([x1, x2, xo], axis=-1)                  # (pb, 21)


# ----------------------------- pallas_call wrapper ----------------------------

_WEIGHT_ORDER = ("t1", "b1", "t2", "b2",
                 "fc1_w", "fc1_b", "fc2_w", "fc2_b",
                 "fc3a", "fc3b", "fc3_b", "fc4_w", "fc4_b")


def _block_plan(b):
    """Return (pairs_per_block, padded_batch)."""
    if b <= 8:
        return b, b                                   # single tiny step
    if b <= 256:
        pb = (((b + 1) // 2) + 7) // 8 * 8            # two steps -> both v7x TCs busy
        return pb, 2 * pb
    pb = 128                                          # amortize ~0.35us/step overhead
    return pb, ((b + pb - 1) // pb) * pb


def net_aux2_forward(x, params):
    b = x.shape[0]
    pb, bp = _block_plan(b)
    grid = (bp // pb,)

    # free row-major view: row = 2*pair + digit, 196 pixel lanes
    xflat = x.reshape(b * 2, 196)
    if bp != b:
        xflat = jnp.pad(xflat, ((0, 2 * (bp - b)), (0, 0)))

    weights = [params[k] for k in _WEIGHT_ORDER]
    weight_specs = [pl.BlockSpec(w.shape, lambda i: (0, 0)) for w in weights]

    y = pl.pallas_call(
        _netaux2_kernel,
        out_shape=jax.ShapeDtypeStruct((bp, 21), jnp.float32),
        grid_spec=pltpu.PrefetchScalarGridSpec(
            num_scalar_prefetch=0,
            grid=grid,
            in_specs=[pl.BlockSpec((2 * pb, 196), lambda i: (i, 0))] + weight_specs,
            out_specs=pl.BlockSpec((pb, 21), lambda i: (i, 0)),
        ),
        compiler_params=pltpu.CompilerParams(
            dimension_semantics=("parallel",),        # pair blocks are independent
            vmem_limit_bytes=48 * 1024 * 1024),
    )(xflat, *weights)

    return y[:b, 0:10], y[:b, 10:20], y[:b, 20:21]


# --------------------------- parameters & repacking ---------------------------

def init_torch_params(key):
    """PyTorch-layout parameters with PyTorch-default-style uniform init."""
    def u(k, shape, fan_in):
        bound = 1.0 / math.sqrt(fan_in)
        return jax.random.uniform(k, shape, jnp.float32, -bound, bound)

    ks = jax.random.split(key, 12)
    return {
        "conv1_w": u(ks[0], (32, 1, 3, 3), 9),          # (out, in, kh, kw)
        "conv1_b": u(ks[1], (32,), 9),
        "conv2_w": u(ks[2], (64, 32, 3, 3), 32 * 9),
        "conv2_b": u(ks[3], (64,), 32 * 9),
        "fc1_w": u(ks[4], (NB_HIDDEN, 256), 256),       # (out, in)
        "fc1_b": u(ks[5], (NB_HIDDEN,), 256),
        "fc2_w": u(ks[6], (10, NB_HIDDEN), NB_HIDDEN),
        "fc2_b": u(ks[7], (10,), NB_HIDDEN),
        "fc3_w": u(ks[8], (NB_HIDDEN, 20), 20),
        "fc3_b": u(ks[9], (NB_HIDDEN,), 20),
        "fc4_w": u(ks[10], (1, NB_HIDDEN), NB_HIDDEN),
        "fc4_b": u(ks[11], (1,), NB_HIDDEN),
    }


def _toeplitz_conv1(w):
    """conv1 weight (32,1,3,3) -> full-window Toeplitz (196, 4*36*32).

    Row = input pixel y*14 + x.  Column = ((dy*2+dx)*36 + (py*6+px))*32 + c, where the
    conv output position is (2*py+dy, 2*px+dx) — so the 2x2 maxpool is a lane-aligned
    max over the four 1152-lane column groups."""
    w = np.asarray(w, np.float32)
    t = np.zeros((196, 4 * 36 * 32), np.float32)
    for dy in range(2):
        for dx in range(2):
            for py in range(6):
                for px in range(6):
                    yo, xo = 2 * py + dy, 2 * px + dx
                    col = ((dy * 2 + dx) * 36 + (py * 6 + px)) * 32
                    for ky in range(3):
                        for kx in range(3):
                            row = (yo + ky) * 14 + (xo + kx)
                            t[row, col:col + 32] = w[:, 0, ky, kx]
    return jnp.asarray(t, jnp.bfloat16)


def _toeplitz_conv2(w):
    """conv2 weight (64,32,3,3) -> full-window Toeplitz (1152, 4*4*64).

    Row = a1 lane (py1*6+px1)*32 + c1.  Column = ((dy*2+dx)*4 + (py*2+px))*64 + c2 with
    conv output position (2*py+dy, 2*px+dx)."""
    w = np.asarray(w, np.float32)
    t = np.zeros((1152, 4 * 4 * 64), np.float32)
    for dy in range(2):
        for dx in range(2):
            for py in range(2):
                for px in range(2):
                    yo, xo = 2 * py + dy, 2 * px + dx
                    col = ((dy * 2 + dx) * 4 + (py * 2 + px)) * 64
                    for ky in range(3):
                        for kx in range(3):
                            row = ((yo + ky) * 6 + (xo + kx)) * 32
                            t[row:row + 32, col:col + 64] = w[:, :, ky, kx].T
    return jnp.asarray(t, jnp.bfloat16)


def pack_params(tp):
    """Repack PyTorch-layout params into the Toeplitz/GEMM layouts the kernel expects.
    All view permutations, the NCHW flatten and the fc3 concat are folded in here;
    the large GEMM weights are stored bf16 (f32 accumulation in-kernel)."""
    fc1 = np.asarray(tp["fc1_w"], np.float32).reshape(NB_HIDDEN, 64, 2, 2)  # [j, c, h, w]
    fc1 = fc1.transpose(2, 3, 1, 0).reshape(256, NB_HIDDEN)                 # lane=(h*2+w)*64+c
    fc3 = np.asarray(tp["fc3_w"], np.float32)                               # (100, 20)
    return {
        "t1": _toeplitz_conv1(tp["conv1_w"]),
        "b1": jnp.asarray(np.tile(np.asarray(tp["conv1_b"], np.float32), 36).reshape(1, 1152)),
        "t2": _toeplitz_conv2(tp["conv2_w"]),
        "b2": jnp.asarray(np.tile(np.asarray(tp["conv2_b"], np.float32), 4).reshape(1, 256)),
        "fc1_w": jnp.asarray(fc1, jnp.bfloat16),                # (256, 100), NCHW fold
        "fc1_b": jnp.asarray(tp["fc1_b"]).reshape(1, NB_HIDDEN),
        "fc2_w": jnp.asarray(tp["fc2_w"]).T,                    # (100, 10)
        "fc2_b": jnp.asarray(tp["fc2_b"]).reshape(1, 10),
        "fc3a": jnp.asarray(fc3[:, :10].T),                     # digit-0 half of the concat
        "fc3b": jnp.asarray(fc3[:, 10:].T),                     # digit-1 half
        "fc3_b": jnp.asarray(tp["fc3_b"]).reshape(1, NB_HIDDEN),
        "fc4_w": jnp.asarray(tp["fc4_w"]).T,                    # (100, 1)
        "fc4_b": jnp.asarray(tp["fc4_b"]).reshape(1, 1),
    }


# ----------------------- plain-JAX reference (for checking) -------------------

def net_aux2_reference(x, tp):
    """Pure-JAX/XLA reference with the exact PyTorch op order."""
    def conv_pool_relu(img, w, bias):
        y = jax.lax.conv_general_dilated(
            img, w, window_strides=(1, 1), padding="VALID",
            dimension_numbers=("NCHW", "OIHW", "NCHW"))
        y = y + bias[None, :, None, None]
        y = jax.lax.reduce_window(y, -jnp.inf, jax.lax.max,
                                  (1, 1, 2, 2), (1, 1, 2, 2), "VALID")
        return jnp.maximum(y, 0.0)

    b = x.shape[0]
    imgs = x.reshape(b * 2, 1, 14, 14)                     # (pair, digit) interleaved
    a1 = conv_pool_relu(imgs, tp["conv1_w"], tp["conv1_b"])
    a2 = conv_pool_relu(a1, tp["conv2_w"], tp["conv2_b"])
    feat = a2.reshape(b * 2, 256)                          # torch .view(-1, 256) order
    h1 = jnp.maximum(feat @ tp["fc1_w"].T + tp["fc1_b"], 0.0)
    logits = h1 @ tp["fc2_w"].T + tp["fc2_b"]
    x1 = logits[0::2]
    x2 = logits[1::2]
    h3 = jnp.maximum(jnp.concatenate([x1, x2], axis=1) @ tp["fc3_w"].T + tp["fc3_b"], 0.0)
    out = h3 @ tp["fc4_w"].T + tp["fc4_b"]
    return x1, x2, out


if __name__ == "__main__":
    key = jax.random.PRNGKey(0)
    pkey, xkey_a, xkey_b = jax.random.split(key, 3)
    torch_params = init_torch_params(pkey)
    params = pack_params(torch_params)

    fwd = jax.jit(net_aux2_forward)
    ref = jax.jit(net_aux2_reference)

    # batch=2 exercises the single-step path; batch=10 exercises padding + a 2-step
    # "parallel" grid (both TensorCores on v7x).
    for bs, xk in ((2, xkey_a), (10, xkey_b)):
        x = jax.random.normal(xk, (bs, 2, 14, 14), dtype=jnp.float32)
        x1, x2, out = fwd(x, params)
        jax.block_until_ready((x1, x2, out))

        assert x1.shape == (bs, 10) and x2.shape == (bs, 10) and out.shape == (bs, 1)
        assert x1.dtype == jnp.float32 and x2.dtype == jnp.float32 and out.dtype == jnp.float32

        r1, r2, rout = ref(x, torch_params)
        for got, want in ((x1, r1), (x2, r2), (out, rout)):
            err = float(jnp.max(jnp.abs(got - want)))
            assert bool(jnp.allclose(got, want, rtol=2e-2, atol=2e-2)), (
                f"kernel/reference mismatch (batch={bs}): max |diff| = {err}")

    print("KERNEL_OK")
</pallas_src>

<mosaic_0001>
module attributes {stable_mosaic.version = 11 : i64} {
  func.func @_netaux2_kernel(%arg0: i32, %arg1: memref<4x196xf32, #tpu.memory_space<vmem>>, %arg2: memref<196x4608xbf16, #tpu.memory_space<vmem>>, %arg3: memref<1x1152xf32, #tpu.memory_space<vmem>>, %arg4: memref<1152x1024xbf16, #tpu.memory_space<vmem>>, %arg5: memref<1x256xf32, #tpu.memory_space<vmem>>, %arg6: memref<256x100xbf16, #tpu.memory_space<vmem>>, %arg7: memref<1x100xf32, #tpu.memory_space<vmem>>, %arg8: memref<100x10xf32, #tpu.memory_space<vmem>>, %arg9: memref<1x10xf32, #tpu.memory_space<vmem>>, %arg10: memref<10x100xf32, #tpu.memory_space<vmem>>, %arg11: memref<10x100xf32, #tpu.memory_space<vmem>>, %arg12: memref<1x100xf32, #tpu.memory_space<vmem>>, %arg13: memref<100x1xf32, #tpu.memory_space<vmem>>, %arg14: memref<1x1xf32, #tpu.memory_space<vmem>>, %arg15: memref<2x21xf32, #tpu.memory_space<vmem>>) attributes {dimension_semantics = [#tpu.dimension_semantics<parallel>], iteration_bounds = array<i64: 1>, scalar_prefetch = 0 : i64, scratch_operands = 0 : i64, tpu.core_type = #tpu.core_type<tc>, window_params = [{transform_indices = @transform_0, window_bounds = array<i64: 4, 196>}, {pipeline_mode = #tpu.pipeline_mode<synchronous>, transform_indices = @transform_1, window_bounds = array<i64: 196, 4608>}, {pipeline_mode = #tpu.pipeline_mode<synchronous>, transform_indices = @transform_2, window_bounds = array<i64: 1, 1152>}, {pipeline_mode = #tpu.pipeline_mode<synchronous>, transform_indices = @transform_3, window_bounds = array<i64: 1152, 1024>}, {pipeline_mode = #tpu.pipeline_mode<synchronous>, transform_indices = @transform_4, window_bounds = array<i64: 1, 256>}, {pipeline_mode = #tpu.pipeline_mode<synchronous>, transform_indices = @transform_5, window_bounds = array<i64: 256, 100>}, {pipeline_mode = #tpu.pipeline_mode<synchronous>, transform_indices = @transform_6, window_bounds = array<i64: 1, 100>}, {pipeline_mode = #tpu.pipeline_mode<synchronous>, transform_indices = @transform_7, window_bounds = array<i64: 100, 10>}, {pipeline_mode = #tpu.pipeline_mode<synchronous>, transform_indices = @transform_8, window_bounds = array<i64: 1, 10>}, {pipeline_mode = #tpu.pipeline_mode<synchronous>, transform_indices = @transform_9, window_bounds = array<i64: 10, 100>}, {pipeline_mode = #tpu.pipeline_mode<synchronous>, transform_indices = @transform_10, window_bounds = array<i64: 10, 100>}, {pipeline_mode = #tpu.pipeline_mode<synchronous>, transform_indices = @transform_11, window_bounds = array<i64: 1, 100>}, {pipeline_mode = #tpu.pipeline_mode<synchronous>, transform_indices = @transform_12, window_bounds = array<i64: 100, 1>}, {pipeline_mode = #tpu.pipeline_mode<synchronous>, transform_indices = @transform_13, window_bounds = array<i64: 1, 1>}, {transform_indices = @transform_14, window_bounds = array<i64: 2, 21>}]} {
    %c0 = arith.constant 0 : index
    %c0_0 = arith.constant 0 : index
    %0 = vector.load %arg1[%c0, %c0_0] : memref<4x196xf32, #tpu.memory_space<vmem>>, vector<4x196xf32>
    %1 = arith.truncf %0 : vector<4x196xf32> to vector<4x196xbf16>
    %c0_1 = arith.constant 0 : index
    %c0_2 = arith.constant 0 : index
    %2 = vector.load %arg2[%c0_1, %c0_2] : memref<196x4608xbf16, #tpu.memory_space<vmem>>, vector<196x4608xbf16>
    %cst = arith.constant dense<0.000000e+00> : vector<4x4608xf32>
    %3 = tpu.matmul %1, %2, %cst {dimension_numbers = #tpu.dot_dimension_numbers<[1], [0], [0], [1], [0, 0, 1, 1], [], []>} : vector<4x196xbf16>, vector<196x4608xbf16>, vector<4x4608xf32> -> vector<4x4608xf32>
    %4 = vector.extract_strided_slice %3 {offsets = [0, 0], sizes = [4, 1152], strides = [1, 1]} : vector<4x4608xf32> to vector<4x1152xf32>
    %5 = vector.extract_strided_slice %3 {offsets = [0, 1152], sizes = [4, 1152], strides = [1, 1]} : vector<4x4608xf32> to vector<4x1152xf32>
    %6 = arith.maximumf %4, %5 : vector<4x1152xf32>
    %7 = vector.extract_strided_slice %3 {offsets = [0, 2304], sizes = [4, 1152], strides = [1, 1]} : vector<4x4608xf32> to vector<4x1152xf32>
    %8 = vector.extract_strided_slice %3 {offsets = [0, 3456], sizes = [4, 1152], strides = [1, 1]} : vector<4x4608xf32> to vector<4x1152xf32>
    %9 = arith.maximumf %7, %8 : vector<4x1152xf32>
    %10 = arith.maximumf %6, %9 : vector<4x1152xf32>
    %c0_3 = arith.constant 0 : index
    %c0_4 = arith.constant 0 : index
    %11 = vector.load %arg3[%c0_3, %c0_4] : memref<1x1152xf32, #tpu.memory_space<vmem>>, vector<1x1152xf32>
    %12 = vector.broadcast %11 : vector<1x1152xf32> to vector<4x1152xf32>
    %13 = arith.addf %10, %12 : vector<4x1152xf32>
    %cst_5 = arith.constant 0.000000e+00 : f32
    %14 = vector.broadcast %cst_5 : f32 to vector<4x1152xf32>
    %15 = arith.maximumf %13, %14 : vector<4x1152xf32>
    %16 = arith.truncf %15 : vector<4x1152xf32> to vector<4x1152xbf16>
    %c0_6 = arith.constant 0 : index
    %c0_7 = arith.constant 0 : index
    %17 = vector.load %arg4[%c0_6, %c0_7] : memref<1152x1024xbf16, #tpu.memory_space<vmem>>, vector<1152x1024xbf16>
    %cst_8 = arith.constant dense<0.000000e+00> : vector<4x1024xf32>
    %18 = tpu.matmul %16, %17, %cst_8 {dimension_numbers = #tpu.dot_dimension_numbers<[1], [0], [0], [1], [0, 0, 1, 1], [], []>} : vector<4x1152xbf16>, vector<1152x1024xbf16>, vector<4x1024xf32> -> vector<4x1024xf32>
    %19 = vector.extract_strided_slice %18 {offsets = [0, 0], sizes = [4, 256], strides = [1, 1]} : vector<4x1024xf32> to vector<4x256xf32>
    %20 = vector.extract_strided_slice %18 {offsets = [0, 256], sizes = [4, 256], strides = [1, 1]} : vector<4x1024xf32> to vector<4x256xf32>
    %21 = arith.maximumf %19, %20 : vector<4x256xf32>
    %22 = vector.extract_strided_slice %18 {offsets = [0, 512], sizes = [4, 256], strides = [1, 1]} : vector<4x1024xf32> to vector<4x256xf32>
    %23 = vector.extract_strided_slice %18 {offsets = [0, 768], sizes = [4, 256], strides = [1, 1]} : vector<4x1024xf32> to vector<4x256xf32>
    %24 = arith.maximumf %22, %23 : vector<4x256xf32>
    %25 = arith.maximumf %21, %24 : vector<4x256xf32>
    %c0_9 = arith.constant 0 : index
    %c0_10 = arith.constant 0 : index
    %26 = vector.load %arg5[%c0_9, %c0_10] : memref<1x256xf32, #tpu.memory_space<vmem>>, vector<1x256xf32>
    %27 = vector.broadcast %26 : vector<1x256xf32> to vector<4x256xf32>
    %28 = arith.addf %25, %27 : vector<4x256xf32>
    %cst_11 = arith.constant 0.000000e+00 : f32
    %29 = vector.broadcast %cst_11 : f32 to vector<4x256xf32>
    %30 = arith.maximumf %28, %29 : vector<4x256xf32>
    %31 = arith.truncf %30 : vector<4x256xf32> to vector<4x256xbf16>
    %c0_12 = arith.constant 0 : index
    %c0_13 = arith.constant 0 : index
    %32 = vector.load %arg6[%c0_12, %c0_13] : memref<256x100xbf16, #tpu.memory_space<vmem>>, vector<256x100xbf16>
    %cst_14 = arith.constant dense<0.000000e+00> : vector<4x100xf32>
    %33 = tpu.matmul %31, %32, %cst_14 {dimension_numbers = #tpu.dot_dimension_numbers<[1], [0], [0], [1], [0, 0, 1, 1], [], []>} : vector<4x256xbf16>, vector<256x100xbf16>, vector<4x100xf32> -> vector<4x100xf32>
    %c0_15 = arith.constant 0 : index
    %c0_16 = arith.constant 0 : index
    %34 = vector.load %arg7[%c0_15, %c0_16] : memref<1x100xf32, #tpu.memory_space<vmem>>, vector<1x100xf32>
    %35 = vector.broadcast %34 : vector<1x100xf32> to vector<4x100xf32>
    %36 = arith.addf %33, %35 : vector<4x100xf32>
    %cst_17 = arith.constant 0.000000e+00 : f32
    %37 = vector.broadcast %cst_17 : f32 to vector<4x100xf32>
    %38 = arith.maximumf %36, %37 : vector<4x100xf32>
    %c0_18 = arith.constant 0 : index
    %c0_19 = arith.constant 0 : index
    %39 = vector.load %arg8[%c0_18, %c0_19] : memref<100x10xf32, #tpu.memory_space<vmem>>, vector<100x10xf32>
    %cst_20 = arith.constant dense<0.000000e+00> : vector<4x10xf32>
    %40 = tpu.matmul %38, %39, %cst_20 {dimension_numbers = #tpu.dot_dimension_numbers<[1], [0], [0], [1], [0, 0, 1, 1], [], []>} : vector<4x100xf32>, vector<100x10xf32>, vector<4x10xf32> -> vector<4x10xf32>
    %c0_21 = arith.constant 0 : index
    %c0_22 = arith.constant 0 : index
    %41 = vector.load %arg9[%c0_21, %c0_22] : memref<1x10xf32, #tpu.memory_space<vmem>>, vector<1x10xf32>
    %42 = vector.broadcast %41 : vector<1x10xf32> to vector<4x10xf32>
    %43 = arith.addf %40, %42 : vector<4x10xf32>
    %44 = vector.shape_cast %43 : vector<4x10xf32> to vector<2x2x10xf32>
    %45 = vector.extract_strided_slice %44 {offsets = [0, 0, 0], sizes = [2, 1, 10], strides = [1, 1, 1]} : vector<2x2x10xf32> to vector<2x1x10xf32>
    %46 = vector.shape_cast %45 : vector<2x1x10xf32> to vector<2x10xf32>
    %47 = vector.extract_strided_slice %44 {offsets = [0, 1, 0], sizes = [2, 1, 10], strides = [1, 1, 1]} : vector<2x2x10xf32> to vector<2x1x10xf32>
    %48 = vector.shape_cast %47 : vector<2x1x10xf32> to vector<2x10xf32>
    %c0_23 = arith.constant 0 : index
    %c0_24 = arith.constant 0 : index
    %49 = vector.load %arg10[%c0_23, %c0_24] : memref<10x100xf32, #tpu.memory_space<vmem>>, vector<10x100xf32>
    %cst_25 = arith.constant dense<0.000000e+00> : vector<2x100xf32>
    %50 = tpu.matmul %46, %49, %cst_25 {dimension_numbers = #tpu.dot_dimension_numbers<[1], [0], [0], [1], [0, 0, 1, 1], [], []>} : vector<2x10xf32>, vector<10x100xf32>, vector<2x100xf32> -> vector<2x100xf32>
    %c0_26 = arith.constant 0 : index
    %c0_27 = arith.constant 0 : index
    %51 = vector.load %arg11[%c0_26, %c0_27] : memref<10x100xf32, #tpu.memory_space<vmem>>, vector<10x100xf32>
    %cst_28 = arith.constant dense<0.000000e+00> : vector<2x100xf32>
    %52 = tpu.matmul %48, %51, %cst_28 {dimension_numbers = #tpu.dot_dimension_numbers<[1], [0], [0], [1], [0, 0, 1, 1], [], []>} : vector<2x10xf32>, vector<10x100xf32>, vector<2x100xf32> -> vector<2x100xf32>
    %53 = arith.addf %50, %52 : vector<2x100xf32>
    %c0_29 = arith.constant 0 : index
    %c0_30 = arith.constant 0 : index
    %54 = vector.load %arg12[%c0_29, %c0_30] : memref<1x100xf32, #tpu.memory_space<vmem>>, vector<1x100xf32>
    %55 = vector.broadcast %54 : vector<1x100xf32> to vector<2x100xf32>
    %56 = arith.addf %53, %55 : vector<2x100xf32>
    %cst_31 = arith.constant 0.000000e+00 : f32
    %57 = vector.broadcast %cst_31 : f32 to vector<2x100xf32>
    %58 = arith.maximumf %56, %57 : vector<2x100xf32>
    %c0_32 = arith.constant 0 : index
    %c0_33 = arith.constant 0 : index
    %59 = vector.load %arg13[%c0_32, %c0_33] : memref<100x1xf32, #tpu.memory_space<vmem>>, vector<100x1xf32>
    %cst_34 = arith.constant dense<0.000000e+00> : vector<2x1xf32>
    %60 = tpu.matmul %58, %59, %cst_34 {dimension_numbers = #tpu.dot_dimension_numbers<[1], [0], [0], [1], [0, 0, 1, 1], [], []>} : vector<2x100xf32>, vector<100x1xf32>, vector<2x1xf32> -> vector<2x1xf32>
    %c0_35 = arith.constant 0 : index
    %c0_36 = arith.constant 0 : index
    %61 = vector.load %arg14[%c0_35, %c0_36] : memref<1x1xf32, #tpu.memory_space<vmem>>, vector<1x1xf32>
    %62 = vector.broadcast %61 : vector<1x1xf32> to vector<2x1xf32>
    %63 = arith.addf %60, %62 : vector<2x1xf32>
    %64 = tpu.concatenate %46, %48, %63 in 1 : vector<2x10xf32>, vector<2x10xf32>, vector<2x1xf32> -> vector<2x21xf32>
    %c0_37 = arith.constant 0 : index
    %c0_38 = arith.constant 0 : index
    %65 = vector.load %arg15[%c0_37, %c0_38] : memref<2x21xf32, #tpu.memory_space<vmem>>, vector<2x21xf32>
    tpu.vector_store %arg15[%c0_37, %c0_38], %64 {strides = array<i32>} : memref<2x21xf32, #tpu.memory_space<vmem>>, vector<2x21xf32>,
    return
  }
  func.func @transform_0(%arg0: i32) -> (i32, i32) {
    %c0_i32 = arith.constant 0 : i32
    %c0_i32_0 = arith.constant 0 : i32
    return %arg0, %c0_i32 : i32, i32
  }
  func.func @transform_1(%arg0: i32) -> (i32, i32) {
    %c0_i32 = arith.constant 0 : i32
    %c0_i32_0 = arith.constant 0 : i32
    %c0_i32_1 = arith.constant 0 : i32
    return %c0_i32, %c0_i32_0 : i32, i32
  }
  func.func @transform_2(%arg0: i32) -> (i32, i32) {
    %c0_i32 = arith.constant 0 : i32
    %c0_i32_0 = arith.constant 0 : i32
    %c0_i32_1 = arith.constant 0 : i32
    return %c0_i32, %c0_i32_0 : i32, i32
  }
  func.func @transform_3(%arg0: i32) -> (i32, i32) {
    %c0_i32 = arith.constant 0 : i32
    %c0_i32_0 = arith.constant 0 : i32
    %c0_i32_1 = arith.constant 0 : i32
    return %c0_i32, %c0_i32_0 : i32, i32
  }
  func.func @transform_4(%arg0: i32) -> (i32, i32) {
    %c0_i32 = arith.constant 0 : i32
    %c0_i32_0 = arith.constant 0 : i32
    %c0_i32_1 = arith.constant 0 : i32
    return %c0_i32, %c0_i32_0 : i32, i32
  }
  func.func @transform_5(%arg0: i32) -> (i32, i32) {
    %c0_i32 = arith.constant 0 : i32
    %c0_i32_0 = arith.constant 0 : i32
    %c0_i32_1 = arith.constant 0 : i32
    return %c0_i32, %c0_i32_0 : i32, i32
  }
  func.func @transform_6(%arg0: i32) -> (i32, i32) {
    %c0_i32 = arith.constant 0 : i32
    %c0_i32_0 = arith.constant 0 : i32
    %c0_i32_1 = arith.constant 0 : i32
    return %c0_i32, %c0_i32_0 : i32, i32
  }
  func.func @transform_7(%arg0: i32) -> (i32, i32) {
    %c0_i32 = arith.constant 0 : i32
    %c0_i32_0 = arith.constant 0 : i32
    %c0_i32_1 = arith.constant 0 : i32
    return %c0_i32, %c0_i32_0 : i32, i32
  }
  func.func @transform_8(%arg0: i32) -> (i32, i32) {
    %c0_i32 = arith.constant 0 : i32
    %c0_i32_0 = arith.constant 0 : i32
    %c0_i32_1 = arith.constant 0 : i32
    return %c0_i32, %c0_i32_0 : i32, i32
  }
  func.func @transform_9(%arg0: i32) -> (i32, i32) {
    %c0_i32 = arith.constant 0 : i32
    %c0_i32_0 = arith.constant 0 : i32
    %c0_i32_1 = arith.constant 0 : i32
    return %c0_i32, %c0_i32_0 : i32, i32
  }
  func.func @transform_10(%arg0: i32) -> (i32, i32) {
    %c0_i32 = arith.constant 0 : i32
    %c0_i32_0 = arith.constant 0 : i32
    %c0_i32_1 = arith.constant 0 : i32
    return %c0_i32, %c0_i32_0 : i32, i32
  }
  func.func @transform_11(%arg0: i32) -> (i32, i32) {
    %c0_i32 = arith.constant 0 : i32
    %c0_i32_0 = arith.constant 0 : i32
    %c0_i32_1 = arith.constant 0 : i32
    return %c0_i32, %c0_i32_0 : i32, i32
  }
  func.func @transform_12(%arg0: i32) -> (i32, i32) {
    %c0_i32 = arith.constant 0 : i32
    %c0_i32_0 = arith.constant 0 : i32
    %c0_i32_1 = arith.constant 0 : i32
    return %c0_i32, %c0_i32_0 : i32, i32
  }
  func.func @transform_13(%arg0: i32) -> (i32, i32) {
    %c0_i32 = arith.constant 0 : i32
    %c0_i32_0 = arith.constant 0 : i32
    %c0_i32_1 = arith.constant 0 : i32
    return %c0_i32, %c0_i32_0 : i32, i32
  }
  func.func @transform_14(%arg0: i32) -> (i32, i32) {
    %c0_i32 = arith.constant 0 : i32
    %c0_i32_0 = arith.constant 0 : i32
    return %arg0, %c0_i32 : i32, i32
  }
}

</mosaic_0001>

<bundles_post_ra>
// kernel: net_aux2_forward.1
= control target key start
LH: loop header
LB: loop body
LE: loop exit
PB: predicated region body
PF: predicated region fallthrough
CT: control target
= control target key end

     0   :  { %s11718_s0 = inlined_call_operand.vmem [shape: f32[4,196], index: 0, kind: input, shape index: {}]   ;;  %s11719_s1 = inlined_call_operand.hbm [shape: bf16[196,4608], index: 1, kind: input, shape index: {}]   ;;  %s11720_s2 = inlined_call_operand.hbm [shape: f32[1,1152], index: 2, kind: input, shape index: {}]   ;;  %s11721_s3 = inlined_call_operand.hbm [shape: bf16[1152,1024], index: 3, kind: input, shape index: {}]   ;;  %s11722_s4 = inlined_call_operand.hbm [shape: f32[1,256], index: 4, kind: input, shape index: {}]   ;;  %s11723_s5 = inlined_call_operand.vmem [shape: bf16[256,100], index: 5, kind: input, shape index: {}]   ;;  %s11724_s6 = inlined_call_operand.hbm [shape: f32[1,100], index: 6, kind: input, shape index: {}]   ;;  %s11725_s7 = inlined_call_operand.vmem [shape: f32[100,10], index: 7, kind: input, shape index: {}]   ;;  %s11726_s8 = inlined_call_operand.hbm [shape: f32[1,10], index: 8, kind: input, shape index: {}]   ;;  %s11727_s9 = inlined_call_operand.hbm [shape: f32[10,100], index: 9, kind: input, shape index: {}]   ;;  %s11728_s10 = inlined_call_operand.hbm [shape: f32[10,100], index: 10, kind: input, shape index: {}]   ;;  %s11729_s11 = inlined_call_operand.hbm [shape: f32[1,100], index: 11, kind: input, shape index: {}]   ;;  %s11730_s12 = inlined_call_operand.vmem [shape: f32[100,1], index: 12, kind: input, shape index: {}]   ;;  %s11731_s13 = inlined_call_operand.<no memory space> [shape: f32[1,1], index: 13, kind: input, shape index: {}]   ;;  %s11732_s14 = inlined_call_operand.vmem [shape: f32[2,21], index: 14, kind: output, shape index: {}]  }
   0x1   :  { %v19_v0 = vstv %s11731_s13 }
   0x2   :  { %20 = vst [vmem:[#allocation2] sm:$0x1] %v19_v0 }
   0x3   :  { %21 = vsyncpa [#allocation4], 0 }
   0x4   :  { %22 = vsyncpa [#allocation6], 0 }
   0x5   :  { %23 = vsyncpa [#allocation9], 0 }
   0x6   :  { %24 = vsyncpa [#allocation12], 0 }
   0x7   :  { %25 = vsyncpa [#allocation15], 0  ;;  %s10984_s15 = smov [#allocation5]   ;;  %s10985_s17 = smov [#allocation8]  }
   0x8   :  { %s46_s16 = sshll.u32 %s10984_s15, 4  ;;  %s68_s18 = sshll.u32 %s10985_s17, 4  ;;  %s47_s16 = int_to_ptr.vmem [resolvable:$true] %s46_s16  ;;  %s69_s18 = int_to_ptr.vmem [resolvable:$true] %s68_s18 }
   0x9   :  { %s10776_s21 = scalar_lea.hbm %s11720_s2, 144 }
   0xa   :  { %p10777_p0 = scmp.ne.s32.totalorder %s11720_s2, %s10776_s21  ;;  %p10780_p1 = scmp.lt.u32.totalorder %s10776_s21, %s11720_s2 }
   0xc   :  { %p10782_p2 = pnand %p10780_p1, %p10777_p0 }
   0xe   :  { %10785 = shalt.err (!%p10782_p2)
}
   0xf   :  { %s10786_s25 = scalar_lea.vmem %s47_s16, 144  ;;  %s10790_s26 = scalar_lea.vmem %s47_s16, 160 }
  0x10   :  { %p10787_p3 = scmp.ne.s32.totalorder %s47_s16, %s10786_s25  ;;  %p10791_p4 = scmp.lt.s32.totalorder %s47_s16, %s47_s16 }
  0x11   :  { %p10792_p5 = scmp.lt.s32.totalorder %s10790_s26, %s10786_s25 }
  0x13   :  { %p10793_p6 = por %p10792_p5, %p10791_p4 }
  0x15   :  { %p10794_p7 = pnand %p10793_p6, %p10787_p3 }
  0x17   :  { %10797 = shalt.err (!%p10794_p7)
}
  0x18   :  { %49 = dma.hbm_to_vmem [thread:$0]  %s11720_s2, 144, %s47_s16, [#allocation6]  }
  0x19   :  { %s10798_s15 = scalar_lea.hbm %s11722_s4, 32 }
  0x1a   :  { %p10799_p8 = scmp.ne.s32.totalorder %s11722_s4, %s10798_s15  ;;  %p10802_p9 = scmp.lt.u32.totalorder %s10798_s15, %s11722_s4 }
  0x1c   :  { %p10804_p10 = pnand %p10802_p9, %p10799_p8 }
  0x1e   :  { %10807 = shalt.err (!%p10804_p10)
}
  0x1f   :  { %s10808_s22 = scalar_lea.vmem %s69_s18, 32  ;;  %p10813_p12 = scmp.lt.s32.totalorder %s69_s18, %s69_s18 }
  0x20   :  { %p10809_p11 = scmp.ne.s32.totalorder %s69_s18, %s10808_s22  ;;  %p10814_p13 = scmp.lt.s32.totalorder %s10808_s22, %s10808_s22 }
  0x22   :  { %p10815_p0 = por %p10814_p13, %p10813_p12 }
  0x24   :  { %p10816_p1 = pnand %p10815_p0, %p10809_p11 }
  0x26   :  { %10819 = shalt.err (!%p10816_p1)
}
  0x27   :  { %71 = dma.hbm_to_vmem [thread:$0]  %s11722_s4, 32, %s69_s18, [#allocation9]  }
  0x28   :  { %s10986_s23 = smov [#allocation11]   ;;  %s10820_s26 = scalar_lea.hbm %s11726_s8, 16 }
  0x29   :  { %s92_s13 = sshll.u32 %s10986_s23, 4  ;;  %p10821_p2 = scmp.ne.s32.totalorder %s11726_s8, %s10820_s26  ;;  %s93_s13 = int_to_ptr.vmem [resolvable:$true] %s92_s13 }
  0x2a   :  { %p10824_p3 = scmp.lt.u32.totalorder %s10820_s26, %s11726_s8 }
  0x2c   :  { %p10826_p4 = pnand %p10824_p3, %p10821_p2 }
  0x2e   :  { %10829 = shalt.err (!%p10826_p4)
}
  0x2f   :  { %s10830_s15 = scalar_lea.vmem %s93_s13, 16  ;;  %s10834_s4 = scalar_lea.vmem %s93_s13, 32 }
  0x30   :  { %p10831_p5 = scmp.ne.s32.totalorder %s93_s13, %s10830_s15  ;;  %p10835_p6 = scmp.lt.s32.totalorder %s93_s13, %s93_s13 }
  0x31   :  { %p10836_p7 = scmp.lt.s32.totalorder %s10834_s4, %s10830_s15 }
  0x33   :  { %p10837_p8 = por %p10836_p7, %p10835_p6 }
  0x35   :  { %p10838_p9 = pnand %p10837_p8, %p10831_p5 }
  0x37   :  { %10841 = shalt.err (!%p10838_p9)
}
  0x38   :  { %95 = dma.hbm_to_vmem [thread:$0]  %s11726_s8, 16, %s93_s13, [#allocation12]  }
  0x39   :  { %s10987_s19 = smov [#allocation14]   ;;  %s10988_s21 = smov [#allocation3]  }
  0x3a   :  { %s113_s20 = sshll.u32 %s10987_s19, 4  ;;  %s33_s22 = sshll.u32 %s10988_s21, 4  ;;  %s114_s20 = int_to_ptr.vmem [resolvable:$true] %s113_s20  ;;  %s34_s22 = int_to_ptr.vmem [resolvable:$true] %s33_s22 }
  0x3b   :  { %s10842_s23 = scalar_lea.hbm %s11728_s10, 256 }
  0x3c   :  { %p10843_p10 = scmp.ne.s32.totalorder %s11728_s10, %s10842_s23  ;;  %p10846_p11 = scmp.lt.u32.totalorder %s10842_s23, %s11728_s10 }
  0x3e   :  { %p10848_p12 = pnand %p10846_p11, %p10843_p10 }
  0x40   :  { %10851 = shalt.err (!%p10848_p12)
}
  0x41   :  { %s10852_s8 = scalar_lea.vmem %s114_s20, 256  ;;  %p10857_p0 = scmp.lt.s32.totalorder %s114_s20, %s114_s20 }
  0x42   :  { %p10853_p13 = scmp.ne.s32.totalorder %s114_s20, %s10852_s8  ;;  %p10858_p1 = scmp.lt.s32.totalorder %s10852_s8, %s10852_s8 }
  0x44   :  { %p10859_p2 = por %p10858_p1, %p10857_p0 }
  0x46   :  { %p10860_p3 = pnand %p10859_p2, %p10853_p13 }
  0x48   :  { %10863 = shalt.err (!%p10860_p3)
}
  0x49   :  { %s10989_s13 = smov 128   ;;  %s10990_s28 = smov 8  }
  0x4a   :  { %119 = dma.hbm_to_vmem [thread:$0]  %s11728_s10, 256, %s114_s20, [#allocation15], %s10989_s13, %s10989_s13, %s10990_s28  }
  0x4b   :  { %s10864_s18 = scalar_lea.hbm %s11719_s1, 57600 }
  0x4c   :  { %p10865_p4 = scmp.ne.s32.totalorder %s11719_s1, %s10864_s18  ;;  %p10868_p5 = scmp.lt.u32.totalorder %s10864_s18, %s11719_s1 }
  0x4e   :  { %p10870_p6 = pnand %p10868_p5, %p10865_p4 }
  0x50   :  { %10873 = shalt.err (!%p10870_p6)
}
  0x51   :  { %s10874_s16 = scalar_lea.vmem %s34_s22, 57600  ;;  %p10879_p8 = scmp.lt.s32.totalorder %s34_s22, %s34_s22 }
  0x52   :  { %p10875_p7 = scmp.ne.s32.totalorder %s34_s22, %s10874_s16  ;;  %p10880_p9 = scmp.lt.s32.totalorder %s10874_s16, %s10874_s16 }
  0x54   :  { %p10881_p10 = por %p10880_p9, %p10879_p8 }
  0x56   :  { %p10882_p11 = pnand %p10881_p10, %p10875_p7 }
  0x58   :  { %10885 = shalt.err (!%p10882_p11)
}
  0x59   :  { %s10991_s10 = smov 2304   ;;  %s10992_s20 = smov 144  }
  0x5a   :  { %39 = dma.hbm_to_vmem [thread:$0]  %s11719_s1, 57600, %s34_s22, [#allocation4], %s10991_s10, %s10991_s10, %s10992_s20  }
  0x5b   :  { %s10993_s25 = smov [#allocation7]   ;;  %s10886_s29 = scalar_lea.hbm %s11721_s3, 73728 }
  0x5c   :  { %s55_s26 = sshll.u32 %s10993_s25, 4  ;;  %p10887_p12 = scmp.ne.s32.totalorder %s11721_s3, %s10886_s29  ;;  %s56_s26 = int_to_ptr.vmem [resolvable:$true] %s55_s26 }
  0x5d   :  { %p10890_p13 = scmp.lt.u32.totalorder %s10886_s29, %s11721_s3 }
  0x5f   :  { %p10892_p0 = pnand %p10890_p13, %p10887_p12 }
  0x61   :  { %10895 = shalt.err (!%p10892_p0)
}
  0x62   :  { %s10896_s17 = scalar_lea.vmem %s56_s26, 73728  ;;  %p10901_p2 = scmp.lt.s32.totalorder %s56_s26, %s56_s26 }
  0x63   :  { %p10897_p1 = scmp.ne.s32.totalorder %s56_s26, %s10896_s17  ;;  %p10902_p3 = scmp.lt.s32.totalorder %s10896_s17, %s10896_s17 }
  0x65   :  { %p10903_p4 = por %p10902_p3, %p10901_p2 }
  0x67   :  { %p10904_p5 = pnand %p10903_p4, %p10897_p1 }
  0x69   :  { %10907 = shalt.err (!%p10904_p5)
}
  0x6a   :  { %s10994_s1 = smov 512   ;;  %s10995_s22 = smov 32  }
  0x6b   :  { %61 = dma.hbm_to_vmem [thread:$0]  %s11721_s3, 73728, %s56_s26, [#allocation6], %s10994_s1, %s10994_s1, %s10995_s22  }
  0x6c   :  { %s10996_s2 = smov [#allocation10]   ;;  %s10997_s10 = smov [#allocation13]  }
  0x6d   :  { %s80_s16 = sshll.u32 %s10996_s2, 4  ;;  %s101_s20 = sshll.u32 %s10997_s10, 4  ;;  %s81_s16 = int_to_ptr.vmem [resolvable:$true] %s80_s16  ;;  %s11160_s20 = int_to_ptr.vmem [resolvable:$true] %s101_s20 }
  0x6e   :  { %s10908_s25 = scalar_lea.hbm %s11724_s6, 16 }
  0x6f   :  { %p10909_p6 = scmp.ne.s32.totalorder %s11724_s6, %s10908_s25  ;;  %p10912_p7 = scmp.lt.u32.totalorder %s10908_s25, %s11724_s6 }
  0x71   :  { %p10914_p8 = pnand %p10912_p7, %p10909_p6 }
  0x73   :  { %10917 = shalt.err (!%p10914_p8)
}
  0x74   :  { %s10918_s3 = scalar_lea.vmem %s81_s16, 16  ;;  %s10922_s26 = scalar_lea.vmem %s81_s16, 32 }
  0x75   :  { %p10919_p9 = scmp.ne.s32.totalorder %s81_s16, %s10918_s3  ;;  %p10923_p10 = scmp.lt.s32.totalorder %s81_s16, %s81_s16 }
  0x76   :  { %p10924_p11 = scmp.lt.s32.totalorder %s10922_s26, %s10918_s3 }
  0x78   :  { %p10925_p12 = por %p10924_p11, %p10923_p10 }
  0x7a   :  { %p10926_p13 = pnand %p10925_p12, %p10919_p9 }
  0x7c   :  { %10929 = shalt.err (!%p10926_p13)
}
  0x7d   :  { %83 = dma.hbm_to_vmem [thread:$0]  %s11724_s6, 16, %s81_s16, [#allocation9]  }
  0x7e   :  { %s10930_s1 = scalar_lea.hbm %s11727_s9, 256 }
  0x7f   :  { %p10931_p0 = scmp.ne.s32.totalorder %s11727_s9, %s10930_s1  ;;  %p10934_p1 = scmp.lt.u32.totalorder %s10930_s1, %s11727_s9 }
  0x81   :  { %p10936_p2 = pnand %p10934_p1, %p10931_p0 }
  0x83   :  { %10939 = shalt.err (!%p10936_p2)
}
  0x84   :  { %s10940_s10 = scalar_lea.vmem %s11160_s20, 256  ;;  %p10945_p4 = scmp.lt.s32.totalorder %s11160_s20, %s11160_s20 }
  0x85   :  { %p10941_p3 = scmp.ne.s32.totalorder %s11160_s20, %s10940_s10  ;;  %p10946_p5 = scmp.lt.s32.totalorder %s10940_s10, %s10940_s10 }
  0x87   :  { %p10947_p6 = por %p10946_p5, %p10945_p4 }
  0x89   :  { %p10948_p7 = pnand %p10947_p6, %p10941_p3 }
  0x8b   :  { %10951 = shalt.err (!%p10948_p7)
}
  0x8c   :  { %107 = dma.hbm_to_vmem [thread:$0]  %s11727_s9, 256, %s11160_s20, [#allocation12], %s10989_s13, %s10989_s13, %s10990_s28  }
  0x8d   :  { %s10998_s23 = smov [#allocation16]   ;;  %s10952_s8 = scalar_lea.hbm %s11729_s11, 16 }
  0x8e   :  { %s126_s24 = sshll.u32 %s10998_s23, 4  ;;  %p10953_p8 = scmp.ne.s32.totalorder %s11729_s11, %s10952_s8  ;;  %s127_s24 = int_to_ptr.vmem [resolvable:$true] %s126_s24 }
  0x8f   :  { %p10956_p9 = scmp.lt.u32.totalorder %s10952_s8, %s11729_s11 }
  0x91   :  { %p10958_p10 = pnand %p10956_p9, %p10953_p8 }
  0x93   :  { %10961 = shalt.err (!%p10958_p10)
}
  0x94   :  { %s10962_s15 = scalar_lea.vmem %s127_s24, 16  ;;  %s10966_s9 = scalar_lea.vmem %s127_s24, 32 }
  0x95   :  { %p10963_p11 = scmp.ne.s32.totalorder %s127_s24, %s10962_s15  ;;  %p10967_p12 = scmp.lt.s32.totalorder %s127_s24, %s127_s24 }
  0x96   :  { %p10968_p13 = scmp.lt.s32.totalorder %s10966_s9, %s10962_s15 }
  0x98   :  { %p10969_p0 = por %p10968_p13, %p10967_p12 }
  0x9a   :  { %p10970_p1 = pnand %p10969_p0, %p10963_p11 }
  0x9c   :  { %10973 = shalt.err (!%p10970_p1)
}
  0x9d   :  { %129 = dma.hbm_to_vmem [thread:$0]  %s11729_s11, 16, %s127_s24, [#allocation15]  }
  0x9e   :  { %10974 = dma.done.wait [#allocation4], 57600  }
  0x9f   :  { %10975 = vsyncadd [#allocation4], 4294909696 }
  0xa0   :  { %10976 = dma.done.wait [#allocation6], 73872  }
  0xa1   :  { %10977 = vsyncadd [#allocation6], 4294893424 }
  0xa2   :  { %10978 = dma.done.wait [#allocation9], 48  }
  0xa3   :  { %10979 = vsyncadd [#allocation9], 4294967248 }
  0xa4   :  { %10980 = dma.done.wait [#allocation12], 272  }
  0xa5   :  { %10981 = vsyncadd [#allocation12], 4294967024 }
  0xa6   :  { %10982 = dma.done.wait [#allocation15], 272  }
  0xa7   :  { %10983 = vsyncadd [#allocation15], 4294967024  ;;  %v10074_v1 = vld [vmem:[#allocation3 + $0x4] ss:$144 sps:$4 sm:$0xff]   ;;  %v10076_v2 = vld [vmem:[#allocation3 + $0xc] ss:$144 sps:$4 sm:$0xff]  }
  0xa8   :  { %2981 = vmatprep.subr.bf16.mxu0 %v10074_v1  ;;  %v10078_v3 = vld [vmem:[#allocation3] ss:$144 sps:$4 sm:$0xff]   ;;  %v10079_v4 = vld [vmem:[#allocation3 + $0x8] ss:$144 sps:$4 sm:$0xff]   ;;  %3022 = vmatprep.subr.bf16.mxu1 %v10076_v2  ;;  %v10080_v5 = vld [vmem:[#allocation3 + $0x124] ss:$144 sps:$4 sm:$0xff]  }
  0xa9   :  { %2982 = vmatpush1.bf16.msra.mxu0 %v10078_v3  ;;  %3023 = vmatpush1.bf16.msra.mxu1 %v10079_v4  ;;  %v10082_v6 = vld [vmem:[#allocation3 + $0x12c] ss:$144 sps:$4 sm:$0xff]   ;;  %v10084_v7 = vld [vmem:[#allocation3 + $0x120] ss:$144 sps:$4 sm:$0xff]   ;;  %v10085_v8 = vld [vmem:[#allocation3 + $0x128] ss:$144 sps:$4 sm:$0xff]  }
  0xaa   :  { %2983 = vmatprep.subr.bf16.mxu0 %v10080_v5  ;;  %3024 = vmatprep.subr.bf16.mxu1 %v10082_v6  ;;  %v10086_v9 = vld [vmem:[#allocation3 + $0x244] ss:$144 sps:$4 sm:$0xff]   ;;  %v10088_v10 = vld [vmem:[#allocation3 + $0x24c] ss:$144 sps:$4 sm:$0xff]   ;;  %v10090_v11 = vld [vmem:[#allocation3 + $0x240] ss:$144 sps:$4 sm:$0xff]  }
  0xab   :  { %v10091_v12 = vld [vmem:[#allocation3 + $0x248] ss:$144 sps:$4 sm:$0xff]   ;;  %v10092_v13 = vld [vmem:[#allocation3 + $0x364] ss:$144 sps:$4 sm:$0xff]   ;;  %v10094_v14 = vld [vmem:[#allocation3 + $0x36c] ss:$144 sps:$4 sm:$0xff]  }
  0xac   :  { %v10096_v15 = vld [vmem:[#allocation3 + $0x360] ss:$144 sps:$4 sm:$0xff]   ;;  %v10097_v16 = vld [vmem:[#allocation3 + $0x368] ss:$144 sps:$4 sm:$0xff]   ;;  %v10098_v17 = vld [vmem:[#allocation3 + $0x484] ss:$144 sps:$4 sm:$0xff]  }
  0xad   :  { %2984 = vmatpush1.bf16.msra.mxu0 %v10084_v7  ;;  %3025 = vmatpush1.bf16.msra.mxu1 %v10085_v8  ;;  %v10100_v18 = vld [vmem:[#allocation3 + $0x48c] ss:$144 sps:$4 sm:$0xff]   ;;  %v10102_v19 = vld [vmem:[#allocation3 + $0x480] ss:$144 sps:$4 sm:$0xff]   ;;  %v10103_v20 = vld [vmem:[#allocation3 + $0x488] ss:$144 sps:$4 sm:$0xff]  }
  0xae   :  { %2985 = vmatprep.subr.bf16.mxu0 %v10086_v9  ;;  %3026 = vmatprep.subr.bf16.mxu1 %v10088_v10  ;;  %v10104_v21 = vld [vmem:[#allocation3 + $0x5a4] ss:$144 sps:$4 sm:$0xff]   ;;  %v10106_v22 = vld [vmem:[#allocation3 + $0x5ac] ss:$144 sps:$4 sm:$0xff]   ;;  %v10108_v23 = vld [vmem:[#allocation3 + $0x5a0] ss:$144 sps:$4 sm:$0xff]  }
  0xaf   :  { %v10109_v24 = vld [vmem:[#allocation3 + $0x5a8] ss:$144 sps:$4 sm:$0xff]   ;;  %v10110_v25 = vld [vmem:[#allocation3 + $0x6c4] ss:$144 sps:$4 sm:$0xff]   ;;  %v10112_v26 = vld [vmem:[#allocation3 + $0x6cc] ss:$144 sps:$4 sm:$0xff]  }
  0xb0   :  { %v10114_v27 = vld [vmem:[#allocation3 + $0x6c0] ss:$144 sps:$4 sm:$0xff]   ;;  %v10115_v28 = vld [vmem:[#allocation3 + $0x6c8] ss:$144 sps:$4 sm:$0xff]   ;;  %v10116_v29 = vld [vmem:[#allocation3 + $0x7e4] ss:$144 sps:$4 sm:$0xff]  }
  0xb1   :  { %2986 = vmatpush1.bf16.msra.mxu0 %v10090_v11  ;;  %3027 = vmatpush1.bf16.msra.mxu1 %v10091_v12  ;;  %v10118_v30 = vld [vmem:[#allocation3 + $0x7ec] ss:$144 sps:$4 sm:$0xff]   ;;  %v10120_v31 = vld [vmem:[#allocation3 + $0x7e0] ss:$144 sps:$4 sm:$0xff]   ;;  %v10121_v32 = vld [vmem:[#allocation3 + $0x7e8] ss:$144 sps:$4 sm:$0xff]  }
  0xb2   :  { %2987 = vmatprep.subr.bf16.mxu0 %v10092_v13  ;;  %3028 = vmatprep.subr.bf16.mxu1 %v10094_v14  ;;  %v10122_v33 = vld [vmem:[#allocation3 + $0x904] ss:$144 sps:$4 sm:$0xff]   ;;  %v10124_v34 = vld [vmem:[#allocation3 + $0x90c] ss:$144 sps:$4 sm:$0xff]   ;;  %v10126_v35 = vld [vmem:[#allocation3 + $0x900] ss:$144 sps:$4 sm:$0xff]  }
  0xb3   :  { %v10127_v36 = vld [vmem:[#allocation3 + $0x908] ss:$144 sps:$4 sm:$0xff]   ;;  %v10128_v37 = vld [vmem:[#allocation3 + $0xa24] ss:$144 sps:$4 sm:$0xff]   ;;  %v10130_v39 = vld [vmem:[#allocation3 + $0xa2c] ss:$144 sps:$4 sm:$0xff]  }
  0xb4   :  { %v162_v38 = vld [vmem:[%s11718_s0] sm:$0xff]  ;;  %vm2868_vm0 = vcmask 556032   ;;  %v10133_v42 = vld [vmem:[#allocation3 + $0xa28] ss:$144 sps:$4 sm:$0xff]   ;;  %vm2872_vm1 = vcmask 1041408   ;;  %vm8322_vm2 = vcmask 1043456  }
  0xb5   :  { %2988 = vmatpush1.bf16.msra.mxu0 %v10096_v15  ;;  %3029 = vmatpush1.bf16.msra.mxu1 %v10097_v16  ;;  %v164_v40 = vcombine.high %v162_v38, %v162_v38  ;;  %v10132_v41 = vld [vmem:[#allocation3 + $0xa20] ss:$144 sps:$4 sm:$0xff]   ;;  %v10134_v43 = vld [vmem:[#allocation3 + $0xb44] ss:$144 sps:$4 sm:$0xff]   ;;  %v10136_v45 = vld [vmem:[#allocation3 + $0xb4c] ss:$144 sps:$4 sm:$0xff]   ;;  %v11219_v62 = vpack.c.bf16 %v162_v38, %v162_v38 }
  0xb6   :  { %2989 = vmatprep.subr.bf16.mxu0 %v10098_v17  ;;  %3030 = vmatprep.subr.bf16.mxu1 %v10100_v18  ;;  %v10138_v46 = vld [vmem:[#allocation3 + $0xb40] ss:$144 sps:$4 sm:$0xff]   ;;  %v10139_v47 = vld [vmem:[#allocation3 + $0xb48] ss:$144 sps:$4 sm:$0xff]   ;;  %v10140_v48 = vld [vmem:[#allocation3 + $0xc64] ss:$144 sps:$4 sm:$0xff]  }
  0xb7   :  { %v11209_v44 = vpack.c.bf16 %v164_v40, %v164_v40  ;;  %v10142_v49 = vld [vmem:[#allocation3 + $0xc6c] ss:$144 sps:$4 sm:$0xff]   ;;  %v600_v50 = vld [vmem:[#allocation3 + $0xd80] sm:$0x33]  ;;  %v10145_v53 = vld [vmem:[#allocation3 + $0xc68] ss:$144 sps:$4 sm:$0xff]  }
  0xb8   :  { %v601_v51 = vld [vmem:[#allocation3 + $0xd88] sm:$0x33]  ;;  %v10144_v52 = vld [vmem:[#allocation3 + $0xc60] ss:$144 sps:$4 sm:$0xff]   ;;  %v9139_v54 = vcombine.high %v600_v50, %v600_v50  ;;  %v9138_v56 = vcombine.low %v600_v50, %v600_v50  ;;  %v10153_v58 = vld [vmem:[#allocation3 + $0x14] ss:$144 sps:$4 sm:$0xff]  }
  0xb9   :  { %2990 = vmatpush1.bf16.msra.mxu0 %v10102_v19  ;;  %3031 = vmatpush1.bf16.msra.mxu1 %v10103_v20  ;;  %v9141_v55 = vcombine.high %v601_v51, %v601_v51  ;;  %v9140_v57 = vcombine.low %v601_v51, %v601_v51  ;;  %v10156_v61 = vld [vmem:[#allocation3 + $0x1c] ss:$144 sps:$4 sm:$0xff]   ;;  %v10151_v63 = vld [vmem:[#allocation3 + $0x10] ss:$144 sps:$4 sm:$0xff]   ;;  %v10154_v0 = vld [vmem:[#allocation3 + $0x18] ss:$144 sps:$4 sm:$0xff]  }
  0xba   :  { %2991 = vmatprep.subr.bf16.mxu0 %v10104_v21  ;;  %3032 = vmatprep.subr.bf16.mxu1 %v10106_v22  ;;  %v2874_v59 = vsel %vm2872_vm1, %v9138_v56, 0  ;;  %v10159_v1 = vld [vmem:[#allocation3 + $0x134] ss:$144 sps:$4 sm:$0xff]   ;;  %v10162_v2 = vld [vmem:[#allocation3 + $0x13c] ss:$144 sps:$4 sm:$0xff]   ;;  %vm11002_vm3 = vmmov 0  }
  0xbb   :  { %9175 = vmatprep.mubr.msk.bf16.mxu0 %vm2868_vm0, %v11209_v44  ;;  %9177 = vmatprep.mubr.msk.bf16.mxu1 %vm2868_vm0, %v11209_v44  ;;  %v2880_v60 = vsel %vm2872_vm1, %v9140_v57, 0  ;;  %v10157_v3 = vld [vmem:[#allocation3 + $0x130] ss:$144 sps:$4 sm:$0xff]   ;;  %v10160_v4 = vld [vmem:[#allocation3 + $0x138] ss:$144 sps:$4 sm:$0xff]   ;;  %vm8318_vm4 = vcmask 818176  }
  0xbc   :  { %v10165_v5 = vld [vmem:[#allocation3 + $0x254] ss:$144 sps:$4 sm:$0xff]   ;;  %v10168_v6 = vld [vmem:[#allocation3 + $0x25c] ss:$144 sps:$4 sm:$0xff]   ;;  %v10163_v7 = vld [vmem:[#allocation3 + $0x250] ss:$144 sps:$4 sm:$0xff]  }
  0xbd   :  { %2992 = vmatpush1.bf16.msra.mxu0 %v10108_v23  ;;  %3033 = vmatpush1.bf16.msra.mxu1 %v10109_v24  ;;  %v10166_v8 = vld [vmem:[#allocation3 + $0x258] ss:$144 sps:$4 sm:$0xff]   ;;  %v10171_v9 = vld [vmem:[#allocation3 + $0x374] ss:$144 sps:$4 sm:$0xff]   ;;  %v10174_v10 = vld [vmem:[#allocation3 + $0x37c] ss:$144 sps:$4 sm:$0xff]  }
  0xbe   :  { %2993 = vmatprep.subr.bf16.mxu0 %v10110_v25  ;;  %3034 = vmatprep.subr.bf16.mxu1 %v10112_v26  ;;  %v10169_v11 = vld [vmem:[#allocation3 + $0x370] ss:$144 sps:$4 sm:$0xff]   ;;  %v10172_v12 = vld [vmem:[#allocation3 + $0x378] ss:$144 sps:$4 sm:$0xff]   ;;  %v10177_v13 = vld [vmem:[#allocation3 + $0x494] ss:$144 sps:$4 sm:$0xff]  }
  0xbf   :  { %v10180_v14 = vld [vmem:[#allocation3 + $0x49c] ss:$144 sps:$4 sm:$0xff]   ;;  %v10175_v15 = vld [vmem:[#allocation3 + $0x490] ss:$144 sps:$4 sm:$0xff]   ;;  %v10178_v16 = vld [vmem:[#allocation3 + $0x498] ss:$144 sps:$4 sm:$0xff]  }
  0xc0   :  { %v10183_v17 = vld [vmem:[#allocation3 + $0x5b4] ss:$144 sps:$4 sm:$0xff]   ;;  %v10186_v18 = vld [vmem:[#allocation3 + $0x5bc] ss:$144 sps:$4 sm:$0xff]   ;;  %v10181_v19 = vld [vmem:[#allocation3 + $0x5b0] ss:$144 sps:$4 sm:$0xff]  }
  0xc1   :  { %2994 = vmatpush1.bf16.msra.mxu0 %v10114_v27  ;;  %3035 = vmatpush1.bf16.msra.mxu1 %v10115_v28  ;;  %v10184_v20 = vld [vmem:[#allocation3 + $0x5b8] ss:$144 sps:$4 sm:$0xff]   ;;  %v10189_v21 = vld [vmem:[#allocation3 + $0x6d4] ss:$144 sps:$4 sm:$0xff]   ;;  %v10192_v22 = vld [vmem:[#allocation3 + $0x6dc] ss:$144 sps:$4 sm:$0xff]  }
  0xc2   :  { %2995 = vmatprep.subr.bf16.mxu0 %v10116_v29  ;;  %3036 = vmatprep.subr.bf16.mxu1 %v10118_v30  ;;  %v10187_v23 = vld [vmem:[#allocation3 + $0x6d0] ss:$144 sps:$4 sm:$0xff]   ;;  %v10190_v24 = vld [vmem:[#allocation3 + $0x6d8] ss:$144 sps:$4 sm:$0xff]   ;;  %v10195_v25 = vld [vmem:[#allocation3 + $0x7f4] ss:$144 sps:$4 sm:$0xff]  }
  0xc3   :  { %v10198_v26 = vld [vmem:[#allocation3 + $0x7fc] ss:$144 sps:$4 sm:$0xff]   ;;  %v10193_v27 = vld [vmem:[#allocation3 + $0x7f0] ss:$144 sps:$4 sm:$0xff]   ;;  %v10196_v28 = vld [vmem:[#allocation3 + $0x7f8] ss:$144 sps:$4 sm:$0xff]  }
  0xc4   :  { %v10201_v29 = vld [vmem:[#allocation3 + $0x914] ss:$144 sps:$4 sm:$0xff]   ;;  %v10204_v30 = vld [vmem:[#allocation3 + $0x91c] ss:$144 sps:$4 sm:$0xff]   ;;  %v10214_v40 = vld [vmem:[#allocation3 + $0xb58] ss:$144 sps:$4 sm:$0xff]  }
  0xc5   :  { %2996 = vmatpush1.bf16.msra.mxu0 %v10120_v31  ;;  %3037 = vmatpush1.bf16.msra.mxu1 %v10121_v32  ;;  %v10199_v31 = vld [vmem:[#allocation3 + $0x910] ss:$144 sps:$4 sm:$0xff]   ;;  %v10202_v32 = vld [vmem:[#allocation3 + $0x918] ss:$144 sps:$4 sm:$0xff]   ;;  %v10216_v38 = vld [vmem:[#allocation3 + $0xb5c] ss:$144 sps:$4 sm:$0xff]  }
  0xc6   :  { %2997 = vmatprep.subr.bf16.mxu0 %v10122_v33  ;;  %3038 = vmatprep.subr.bf16.mxu1 %v10124_v34  ;;  %v10207_v33 = vld [vmem:[#allocation3 + $0xa34] ss:$144 sps:$4 sm:$0xff]   ;;  %v10210_v34 = vld [vmem:[#allocation3 + $0xa3c] ss:$144 sps:$4 sm:$0xff]   ;;  %v10227_v56 = vld [vmem:[#allocation3 + $0x20] ss:$144 sps:$4 sm:$0xff]  }
  0xc7   :  { %v10230_v57 = vld [vmem:[#allocation3 + $0x28] ss:$144 sps:$4 sm:$0xff]   ;;  %vm11003_vm5 = vmmov 1   ;;  %vm8417_vm7 = vcmask 1041409   ;;  %vm8419_vm8 = vcmask 80896   ;;  %s11005_s29 = smov 10  }
  0xc8   :  { %vm11647_vm6 = vmpackc.low %vm2872_vm1, %vm11003_vm5  ;;  %s11006_s4 = smov 20   ;;  %vm8693_vm9 = vcmask 162816   ;;  %vm8695_vm10 = vcmask 164864  }
  0xc9   :  { %2998 = vmatpush1.bf16.msra.mxu0 %v10126_v35  ;;  %3039 = vmatpush1.bf16.msra.mxu1 %v10127_v36  ;;  %v10205_v35 = vld [vmem:[#allocation3 + $0xa30] ss:$144 sps:$4 sm:$0xff]   ;;  %v10208_v36 = vld [vmem:[#allocation3 + $0xa38] ss:$144 sps:$4 sm:$0xff]  }
  0xca   :  { %2999 = vmatprep.subr.bf16.mxu0 %v10128_v37  ;;  %3040 = vmatprep.subr.bf16.mxu1 %v10130_v39  ;;  %v10213_v37 = vld [vmem:[#allocation3 + $0xb54] ss:$144 sps:$4 sm:$0xff]   ;;  %v10211_v39 = vld [vmem:[#allocation3 + $0xb50] ss:$144 sps:$4 sm:$0xff]  }
  0xcd   :  { %3000 = vmatpush1.bf16.msra.mxu0 %v10132_v41  ;;  %3041 = vmatpush1.bf16.msra.mxu1 %v10133_v42  ;;  %v10219_v41 = vld [vmem:[#allocation3 + $0xc74] ss:$144 sps:$4 sm:$0xff]   ;;  %v10222_v42 = vld [vmem:[#allocation3 + $0xc7c] ss:$144 sps:$4 sm:$0xff]  }
  0xce   :  { %3001 = vmatprep.subr.bf16.mxu0 %v10134_v43  ;;  %3042 = vmatprep.subr.bf16.mxu1 %v10136_v45  ;;  %v602_v43 = vld [vmem:[#allocation3 + $0xd90] sm:$0x33]  ;;  %v603_v45 = vld [vmem:[#allocation3 + $0xd98] sm:$0x33] }
  0xcf   :  { %v9142_v50 = vcombine.low %v602_v43, %v602_v43  ;;  %v9144_v51 = vcombine.low %v603_v45, %v603_v45 }
  0xd1   :  { %3002 = vmatpush1.bf16.msra.mxu0 %v10138_v46  ;;  %3043 = vmatpush1.bf16.msra.mxu1 %v10139_v47  ;;  %v10217_v46 = vld [vmem:[#allocation3 + $0xc70] ss:$144 sps:$4 sm:$0xff]   ;;  %v10220_v47 = vld [vmem:[#allocation3 + $0xc78] ss:$144 sps:$4 sm:$0xff]  }
  0xd2   :  { %3003 = vmatprep.subr.bf16.mxu0 %v10140_v48  ;;  %3044 = vmatprep.subr.bf16.mxu1 %v10142_v49  ;;  %v9143_v48 = vcombine.high %v602_v43, %v602_v43  ;;  %v9145_v49 = vcombine.high %v603_v45, %v603_v45 }
  0xd5   :  { %3004 = vmatpush1.bf16.msra.mxu0 %v10144_v52  ;;  %3045 = vmatpush1.bf16.msra.mxu1 %v10145_v53  ;;  %v10229_v52 = vld [vmem:[#allocation3 + $0x24] ss:$144 sps:$4 sm:$0xff]   ;;  %v2886_v53 = vsel %vm2872_vm1, %v9142_v50, 0  ;;  %v10303_v50 = vld [vmem:[#allocation3 + $0x30] ss:$144 sps:$4 sm:$0xff]  }
  0xd6   :  { %9174 = vmatprep.subr.msk.bf16.mxu0 %vm2872_vm1, %v9139_v54  ;;  %9176 = vmatprep.subr.msk.bf16.mxu1 %vm2872_vm1, %v9141_v55  ;;  %v2892_v54 = vsel %vm2872_vm1, %v9144_v51, 0  ;;  %v10232_v55 = vld [vmem:[#allocation3 + $0x2c] ss:$144 sps:$4 sm:$0xff]   ;;  %v10306_v51 = vld [vmem:[#allocation3 + $0x38] ss:$144 sps:$4 sm:$0xff]  }
  0xd9   :  { %3006 = vmatpush1.bf16.msra.mxu0 %v2874_v59  ;;  %3047 = vmatpush1.bf16.msra.mxu1 %v2880_v60  ;;  %v10238_v59 = vld [vmem:[#allocation3 + $0x14c] ss:$144 sps:$4 sm:$0xff]   ;;  %v10233_v60 = vld [vmem:[#allocation3 + $0x140] ss:$144 sps:$4 sm:$0xff]  }
  0xda   :  { %3063 = vmatprep.subr.bf16.mxu0 %v10153_v58  ;;  %3104 = vmatprep.subr.bf16.mxu1 %v10156_v61  ;;  %v10235_v58 = vld [vmem:[#allocation3 + $0x144] ss:$144 sps:$4 sm:$0xff]   ;;  %v10236_v61 = vld [vmem:[#allocation3 + $0x148] ss:$144 sps:$4 sm:$0xff]  }
  0xdc   :  { %3014 = vmatmul.mubr.bf16.vlgmr.msra.gmra.mrb[0].mxu0 %v11219_v62  ;;  %3055 = vmatmul.mubr.bf16.vlgmr.msra.gmra.mrb[0].mxu1 %v11219_v62 }
  0xdd   :  { %3064 = vmatpush1.bf16.msra.mxu0 %v10151_v63  ;;  %3105 = vmatpush1.bf16.msra.mxu1 %v10154_v0  ;;  %v10241_v63 = vld [vmem:[#allocation3 + $0x264] ss:$144 sps:$4 sm:$0xff]   ;;  %v10244_v0 = vld [vmem:[#allocation3 + $0x26c] ss:$144 sps:$4 sm:$0xff]  }
  0xde   :  { %3065 = vmatprep.subr.bf16.mxu0 %v10159_v1  ;;  %3106 = vmatprep.subr.bf16.mxu1 %v10162_v2  ;;  %v10239_v1 = vld [vmem:[#allocation3 + $0x260] ss:$144 sps:$4 sm:$0xff]   ;;  %v10242_v2 = vld [vmem:[#allocation3 + $0x268] ss:$144 sps:$4 sm:$0xff]  }
  0xdf   :  { %9179 = vmatprep.mubr.msk.bf16.mxu0 %vm2868_vm0, %v11209_v44  ;;  %9181 = vmatprep.mubr.msk.bf16.mxu1 %vm2868_vm0, %v11209_v44 }
  0xe1   :  { %3066 = vmatpush1.bf16.msra.mxu0 %v10157_v3  ;;  %3107 = vmatpush1.bf16.msra.mxu1 %v10160_v4  ;;  %v10247_v3 = vld [vmem:[#allocation3 + $0x384] ss:$144 sps:$4 sm:$0xff]   ;;  %v10250_v4 = vld [vmem:[#allocation3 + $0x38c] ss:$144 sps:$4 sm:$0xff]  }
  0xe2   :  { %3067 = vmatprep.subr.bf16.mxu0 %v10165_v5  ;;  %3108 = vmatprep.subr.bf16.mxu1 %v10168_v6  ;;  %v10245_v5 = vld [vmem:[#allocation3 + $0x380] ss:$144 sps:$4 sm:$0xff]   ;;  %v10248_v6 = vld [vmem:[#allocation3 + $0x388] ss:$144 sps:$4 sm:$0xff]  }
  0xe5   :  { %3068 = vmatpush1.bf16.msra.mxu0 %v10163_v7  ;;  %3109 = vmatpush1.bf16.msra.mxu1 %v10166_v8  ;;  %v10253_v7 = vld [vmem:[#allocation3 + $0x4a4] ss:$144 sps:$4 sm:$0xff]   ;;  %v10256_v8 = vld [vmem:[#allocation3 + $0x4ac] ss:$144 sps:$4 sm:$0xff]  }
  0xe6   :  { %3069 = vmatprep.subr.bf16.mxu0 %v10171_v9  ;;  %3110 = vmatprep.subr.bf16.mxu1 %v10174_v10  ;;  %v10251_v9 = vld [vmem:[#allocation3 + $0x4a0] ss:$144 sps:$4 sm:$0xff]   ;;  %v10254_v10 = vld [vmem:[#allocation3 + $0x4a8] ss:$144 sps:$4 sm:$0xff]  }
  0xe9   :  { %3070 = vmatpush1.bf16.msra.mxu0 %v10169_v11  ;;  %3111 = vmatpush1.bf16.msra.mxu1 %v10172_v12  ;;  %v10259_v11 = vld [vmem:[#allocation3 + $0x5c4] ss:$144 sps:$4 sm:$0xff]   ;;  %v10262_v12 = vld [vmem:[#allocation3 + $0x5cc] ss:$144 sps:$4 sm:$0xff]  }
  0xea   :  { %3071 = vmatprep.subr.bf16.mxu0 %v10177_v13  ;;  %3112 = vmatprep.subr.bf16.mxu1 %v10180_v14  ;;  %v10257_v13 = vld [vmem:[#allocation3 + $0x5c0] ss:$144 sps:$4 sm:$0xff]   ;;  %v10260_v14 = vld [vmem:[#allocation3 + $0x5c8] ss:$144 sps:$4 sm:$0xff]  }
  0xed   :  { %3072 = vmatpush1.bf16.msra.mxu0 %v10175_v15  ;;  %3113 = vmatpush1.bf16.msra.mxu1 %v10178_v16  ;;  %v10265_v15 = vld [vmem:[#allocation3 + $0x6e4] ss:$144 sps:$4 sm:$0xff]   ;;  %v10268_v16 = vld [vmem:[#allocation3 + $0x6ec] ss:$144 sps:$4 sm:$0xff]  }
  0xee   :  { %3073 = vmatprep.subr.bf16.mxu0 %v10183_v17  ;;  %3114 = vmatprep.subr.bf16.mxu1 %v10186_v18  ;;  %v10263_v17 = vld [vmem:[#allocation3 + $0x6e0] ss:$144 sps:$4 sm:$0xff]   ;;  %v10266_v18 = vld [vmem:[#allocation3 + $0x6e8] ss:$144 sps:$4 sm:$0xff]  }
  0xf1   :  { %3074 = vmatpush1.bf16.msra.mxu0 %v10181_v19  ;;  %3115 = vmatpush1.bf16.msra.mxu1 %v10184_v20  ;;  %v10271_v19 = vld [vmem:[#allocation3 + $0x804] ss:$144 sps:$4 sm:$0xff]   ;;  %v10274_v20 = vld [vmem:[#allocation3 + $0x80c] ss:$144 sps:$4 sm:$0xff]  }
  0xf2   :  { %3075 = vmatprep.subr.bf16.mxu0 %v10189_v21  ;;  %3116 = vmatprep.subr.bf16.mxu1 %v10192_v22  ;;  %v10269_v21 = vld [vmem:[#allocation3 + $0x800] ss:$144 sps:$4 sm:$0xff]   ;;  %v10272_v22 = vld [vmem:[#allocation3 + $0x808] ss:$144 sps:$4 sm:$0xff]  }
  0xf5   :  { %3076 = vmatpush1.bf16.msra.mxu0 %v10187_v23  ;;  %3117 = vmatpush1.bf16.msra.mxu1 %v10190_v24  ;;  %v10277_v23 = vld [vmem:[#allocation3 + $0x924] ss:$144 sps:$4 sm:$0xff]   ;;  %v10280_v24 = vld [vmem:[#allocation3 + $0x92c] ss:$144 sps:$4 sm:$0xff]  }
  0xf6   :  { %3077 = vmatprep.subr.bf16.mxu0 %v10195_v25  ;;  %3118 = vmatprep.subr.bf16.mxu1 %v10198_v26  ;;  %v10275_v25 = vld [vmem:[#allocation3 + $0x920] ss:$144 sps:$4 sm:$0xff]   ;;  %v10278_v26 = vld [vmem:[#allocation3 + $0x928] ss:$144 sps:$4 sm:$0xff]  }
  0xf9   :  { %3078 = vmatpush1.bf16.msra.mxu0 %v10193_v27  ;;  %3119 = vmatpush1.bf16.msra.mxu1 %v10196_v28  ;;  %v10283_v27 = vld [vmem:[#allocation3 + $0xa44] ss:$144 sps:$4 sm:$0xff]   ;;  %v10286_v28 = vld [vmem:[#allocation3 + $0xa4c] ss:$144 sps:$4 sm:$0xff]  }
  0xfa   :  { %3079 = vmatprep.subr.bf16.mxu0 %v10201_v29  ;;  %3120 = vmatprep.subr.bf16.mxu1 %v10204_v30  ;;  %v10281_v29 = vld [vmem:[#allocation3 + $0xa40] ss:$144 sps:$4 sm:$0xff]   ;;  %v10284_v30 = vld [vmem:[#allocation3 + $0xa48] ss:$144 sps:$4 sm:$0xff]  }
  0xfd   :  { %3080 = vmatpush1.bf16.msra.mxu0 %v10199_v31  ;;  %3121 = vmatpush1.bf16.msra.mxu1 %v10202_v32  ;;  %v10289_v31 = vld [vmem:[#allocation3 + $0xb64] ss:$144 sps:$4 sm:$0xff]   ;;  %v10292_v32 = vld [vmem:[#allocation3 + $0xb6c] ss:$144 sps:$4 sm:$0xff]  }
  0xfe   :  { %3081 = vmatprep.subr.bf16.mxu0 %v10207_v33  ;;  %3122 = vmatprep.subr.bf16.mxu1 %v10210_v34  ;;  %v10287_v33 = vld [vmem:[#allocation3 + $0xb60] ss:$144 sps:$4 sm:$0xff]   ;;  %v10290_v34 = vld [vmem:[#allocation3 + $0xb68] ss:$144 sps:$4 sm:$0xff]  }
 0x101   :  { %3082 = vmatpush1.bf16.msra.mxu0 %v10205_v35  ;;  %3123 = vmatpush1.bf16.msra.mxu1 %v10208_v36  ;;  %v10295_v35 = vld [vmem:[#allocation3 + $0xc84] ss:$144 sps:$4 sm:$0xff]   ;;  %v10298_v36 = vld [vmem:[#allocation3 + $0xc8c] ss:$144 sps:$4 sm:$0xff]  }
 0x102   :  { %3083 = vmatprep.subr.bf16.mxu0 %v10213_v37  ;;  %3124 = vmatprep.subr.bf16.mxu1 %v10216_v38  ;;  %v604_v37 = vld [vmem:[#allocation3 + $0xda0] sm:$0x33]  ;;  %v605_v38 = vld [vmem:[#allocation3 + $0xda8] sm:$0x33] }
 0x103   :  { %v9146_v43 = vcombine.low %v604_v37, %v604_v37  ;;  %v9148_v45 = vcombine.low %v605_v38, %v605_v38 }
 0x105   :  { %3084 = vmatpush1.bf16.msra.mxu0 %v10211_v39  ;;  %3125 = vmatpush1.bf16.msra.mxu1 %v10214_v40  ;;  %v10293_v39 = vld [vmem:[#allocation3 + $0xc80] ss:$144 sps:$4 sm:$0xff]   ;;  %v10296_v40 = vld [vmem:[#allocation3 + $0xc88] ss:$144 sps:$4 sm:$0xff]  }
 0x106   :  { %3085 = vmatprep.subr.bf16.mxu0 %v10219_v41  ;;  %3126 = vmatprep.subr.bf16.mxu1 %v10222_v42  ;;  %v9147_v41 = vcombine.high %v604_v37, %v604_v37  ;;  %v9149_v42 = vcombine.high %v605_v38, %v605_v38 }
 0x109   :  { %3086 = vmatpush1.bf16.msra.mxu0 %v10217_v46  ;;  %3127 = vmatpush1.bf16.msra.mxu1 %v10220_v47  ;;  %v10305_v46 = vld [vmem:[#allocation3 + $0x34] ss:$144 sps:$4 sm:$0xff]   ;;  %v2898_v47 = vsel %vm2872_vm1, %v9146_v43, 0  ;;  %v10379_v43 = vld [vmem:[#allocation3 + $0x40] ss:$144 sps:$4 sm:$0xff]  }
 0x10a   :  { %9178 = vmatprep.subr.msk.bf16.mxu0 %vm2872_vm1, %v9143_v48  ;;  %9180 = vmatprep.subr.msk.bf16.mxu1 %vm2872_vm1, %v9145_v49  ;;  %v2904_v48 = vsel %vm2872_vm1, %v9148_v45, 0  ;;  %v10308_v49 = vld [vmem:[#allocation3 + $0x3c] ss:$144 sps:$4 sm:$0xff]   ;;  %v10382_v45 = vld [vmem:[#allocation3 + $0x48] ss:$144 sps:$4 sm:$0xff]  }
 0x10d   :  { %3088 = vmatpush1.bf16.msra.mxu0 %v2886_v53  ;;  %3129 = vmatpush1.bf16.msra.mxu1 %v2892_v54  ;;  %v10314_v53 = vld [vmem:[#allocation3 + $0x15c] ss:$144 sps:$4 sm:$0xff]   ;;  %v10309_v54 = vld [vmem:[#allocation3 + $0x150] ss:$144 sps:$4 sm:$0xff]  }
 0x10e   :  { %3145 = vmatprep.subr.bf16.mxu0 %v10229_v52  ;;  %3186 = vmatprep.subr.bf16.mxu1 %v10232_v55  ;;  %v10311_v52 = vld [vmem:[#allocation3 + $0x154] ss:$144 sps:$4 sm:$0xff]   ;;  %v10312_v55 = vld [vmem:[#allocation3 + $0x158] ss:$144 sps:$4 sm:$0xff]  }
 0x110   :  { %3096 = vmatmul.mubr.bf16.vlgmr.msra.gmra.mrb[4].mxu0 %v11219_v62  ;;  %3137 = vmatmul.mubr.bf16.vlgmr.msra.gmra.mrb[4].mxu1 %v11219_v62 }
 0x111   :  { %3146 = vmatpush1.bf16.msra.mxu0 %v10227_v56  ;;  %3187 = vmatpush1.bf16.msra.mxu1 %v10230_v57  ;;  %v10317_v56 = vld [vmem:[#allocation3 + $0x274] ss:$144 sps:$4 sm:$0xff]   ;;  %v10320_v57 = vld [vmem:[#allocation3 + $0x27c] ss:$144 sps:$4 sm:$0xff]  }
 0x112   :  { %3147 = vmatprep.subr.bf16.mxu0 %v10235_v58  ;;  %3188 = vmatprep.subr.bf16.mxu1 %v10238_v59  ;;  %v10315_v58 = vld [vmem:[#allocation3 + $0x270] ss:$144 sps:$4 sm:$0xff]   ;;  %v10318_v59 = vld [vmem:[#allocation3 + $0x278] ss:$144 sps:$4 sm:$0xff]  }
 0x113   :  { %9183 = vmatprep.mubr.msk.bf16.mxu0 %vm2868_vm0, %v11209_v44  ;;  %9185 = vmatprep.mubr.msk.bf16.mxu1 %vm2868_vm0, %v11209_v44 }
 0x115   :  { %3148 = vmatpush1.bf16.msra.mxu0 %v10233_v60  ;;  %3189 = vmatpush1.bf16.msra.mxu1 %v10236_v61  ;;  %v10323_v60 = vld [vmem:[#allocation3 + $0x394] ss:$144 sps:$4 sm:$0xff]   ;;  %v10326_v61 = vld [vmem:[#allocation3 + $0x39c] ss:$144 sps:$4 sm:$0xff]  }
 0x116   :  { %3149 = vmatprep.subr.bf16.mxu0 %v10241_v63  ;;  %3190 = vmatprep.subr.bf16.mxu1 %v10244_v0  ;;  %v10321_v63 = vld [vmem:[#allocation3 + $0x390] ss:$144 sps:$4 sm:$0xff]   ;;  %v10324_v0 = vld [vmem:[#allocation3 + $0x398] ss:$144 sps:$4 sm:$0xff]  }
 0x119   :  { %3150 = vmatpush1.bf16.msra.mxu0 %v10239_v1  ;;  %3191 = vmatpush1.bf16.msra.mxu1 %v10242_v2  ;;  %v10329_v1 = vld [vmem:[#allocation3 + $0x4b4] ss:$144 sps:$4 sm:$0xff]   ;;  %v10332_v2 = vld [vmem:[#allocation3 + $0x4bc] ss:$144 sps:$4 sm:$0xff]  }
 0x11a   :  { %3151 = vmatprep.subr.bf16.mxu0 %v10247_v3  ;;  %3192 = vmatprep.subr.bf16.mxu1 %v10250_v4  ;;  %v10327_v3 = vld [vmem:[#allocation3 + $0x4b0] ss:$144 sps:$4 sm:$0xff]   ;;  %v10330_v4 = vld [vmem:[#allocation3 + $0x4b8] ss:$144 sps:$4 sm:$0xff]  }
 0x11d   :  { %3152 = vmatpush1.bf16.msra.mxu0 %v10245_v5  ;;  %3193 = vmatpush1.bf16.msra.mxu1 %v10248_v6  ;;  %v10335_v5 = vld [vmem:[#allocation3 + $0x5d4] ss:$144 sps:$4 sm:$0xff]   ;;  %v10338_v6 = vld [vmem:[#allocation3 + $0x5dc] ss:$144 sps:$4 sm:$0xff]  }
 0x11e   :  { %3153 = vmatprep.subr.bf16.mxu0 %v10253_v7  ;;  %3194 = vmatprep.subr.bf16.mxu1 %v10256_v8  ;;  %v10333_v7 = vld [vmem:[#allocation3 + $0x5d0] ss:$144 sps:$4 sm:$0xff]   ;;  %v10336_v8 = vld [vmem:[#allocation3 + $0x5d8] ss:$144 sps:$4 sm:$0xff]  }
 0x121   :  { %3154 = vmatpush1.bf16.msra.mxu0 %v10251_v9  ;;  %3195 = vmatpush1.bf16.msra.mxu1 %v10254_v10  ;;  %v10341_v9 = vld [vmem:[#allocation3 + $0x6f4] ss:$144 sps:$4 sm:$0xff]   ;;  %v10344_v10 = vld [vmem:[#allocation3 + $0x6fc] ss:$144 sps:$4 sm:$0xff]  }
 0x122   :  { %3155 = vmatprep.subr.bf16.mxu0 %v10259_v11  ;;  %3196 = vmatprep.subr.bf16.mxu1 %v10262_v12  ;;  %v10339_v11 = vld [vmem:[#allocation3 + $0x6f0] ss:$144 sps:$4 sm:$0xff]   ;;  %v10342_v12 = vld [vmem:[#allocation3 + $0x6f8] ss:$144 sps:$4 sm:$0xff]  }
 0x125   :  { %3156 = vmatpush1.bf16.msra.mxu0 %v10257_v13  ;;  %3197 = vmatpush1.bf16.msra.mxu1 %v10260_v14  ;;  %v10347_v13 = vld [vmem:[#allocation3 + $0x814] ss:$144 sps:$4 sm:$0xff]   ;;  %v10350_v14 = vld [vmem:[#allocation3 + $0x81c] ss:$144 sps:$4 sm:$0xff]  }
 0x126   :  { %3157 = vmatprep.subr.bf16.mxu0 %v10265_v15  ;;  %3198 = vmatprep.subr.bf16.mxu1 %v10268_v16  ;;  %v10345_v15 = vld [vmem:[#allocation3 + $0x810] ss:$144 sps:$4 sm:$0xff]   ;;  %v10348_v16 = vld [vmem:[#allocation3 + $0x818] ss:$144 sps:$4 sm:$0xff]  }
 0x129   :  { %3158 = vmatpush1.bf16.msra.mxu0 %v10263_v17  ;;  %3199 = vmatpush1.bf16.msra.mxu1 %v10266_v18  ;;  %v10353_v17 = vld [vmem:[#allocation3 + $0x934] ss:$144 sps:$4 sm:$0xff]   ;;  %v10356_v18 = vld [vmem:[#allocation3 + $0x93c] ss:$144 sps:$4 sm:$0xff]  }
 0x12a   :  { %3159 = vmatprep.subr.bf16.mxu0 %v10271_v19  ;;  %3200 = vmatprep.subr.bf16.mxu1 %v10274_v20  ;;  %v10351_v19 = vld [vmem:[#allocation3 + $0x930] ss:$144 sps:$4 sm:$0xff]   ;;  %v10354_v20 = vld [vmem:[#allocation3 + $0x938] ss:$144 sps:$4 sm:$0xff]  }
 0x12d   :  { %3160 = vmatpush1.bf16.msra.mxu0 %v10269_v21  ;;  %3201 = vmatpush1.bf16.msra.mxu1 %v10272_v22  ;;  %v10359_v21 = vld [vmem:[#allocation3 + $0xa54] ss:$144 sps:$4 sm:$0xff]   ;;  %v10362_v22 = vld [vmem:[#allocation3 + $0xa5c] ss:$144 sps:$4 sm:$0xff]  }
 0x12e   :  { %3161 = vmatprep.subr.bf16.mxu0 %v10277_v23  ;;  %3202 = vmatprep.subr.bf16.mxu1 %v10280_v24  ;;  %v10357_v23 = vld [vmem:[#allocation3 + $0xa50] ss:$144 sps:$4 sm:$0xff]   ;;  %v10360_v24 = vld [vmem:[#allocation3 + $0xa58] ss:$144 sps:$4 sm:$0xff]  }
 0x131   :  { %3162 = vmatpush1.bf16.msra.mxu0 %v10275_v25  ;;  %3203 = vmatpush1.bf16.msra.mxu1 %v10278_v26  ;;  %v10365_v25 = vld [vmem:[#allocation3 + $0xb74] ss:$144 sps:$4 sm:$0xff]   ;;  %v10368_v26 = vld [vmem:[#allocation3 + $0xb7c] ss:$144 sps:$4 sm:$0xff]  }
 0x132   :  { %3163 = vmatprep.subr.bf16.mxu0 %v10283_v27  ;;  %3204 = vmatprep.subr.bf16.mxu1 %v10286_v28  ;;  %v10363_v27 = vld [vmem:[#allocation3 + $0xb70] ss:$144 sps:$4 sm:$0xff]   ;;  %v10366_v28 = vld [vmem:[#allocation3 + $0xb78] ss:$144 sps:$4 sm:$0xff]  }
 0x135   :  { %3164 = vmatpush1.bf16.msra.mxu0 %v10281_v29  ;;  %3205 = vmatpush1.bf16.msra.mxu1 %v10284_v30  ;;  %v10371_v29 = vld [vmem:[#allocation3 + $0xc94] ss:$144 sps:$4 sm:$0xff]   ;;  %v10374_v30 = vld [vmem:[#allocation3 + $0xc9c] ss:$144 sps:$4 sm:$0xff]  }
 0x136   :  { %3165 = vmatprep.subr.bf16.mxu0 %v10289_v31  ;;  %3206 = vmatprep.subr.bf16.mxu1 %v10292_v32  ;;  %v606_v31 = vld [vmem:[#allocation3 + $0xdb0] sm:$0x33]  ;;  %v607_v32 = vld [vmem:[#allocation3 + $0xdb8] sm:$0x33] }
 0x137   :  { %v9150_v37 = vcombine.low %v606_v31, %v606_v31  ;;  %v9152_v38 = vcombine.low %v607_v32, %v607_v32 }
 0x139   :  { %3166 = vmatpush1.bf16.msra.mxu0 %v10287_v33  ;;  %3207 = vmatpush1.bf16.msra.mxu1 %v10290_v34  ;;  %v10369_v33 = vld [vmem:[#allocation3 + $0xc90] ss:$144 sps:$4 sm:$0xff]   ;;  %v10372_v34 = vld [vmem:[#allocation3 + $0xc98] ss:$144 sps:$4 sm:$0xff]  }
 0x13a   :  { %3167 = vmatprep.subr.bf16.mxu0 %v10295_v35  ;;  %3208 = vmatprep.subr.bf16.mxu1 %v10298_v36  ;;  %v9151_v35 = vcombine.high %v606_v31, %v606_v31  ;;  %v9153_v36 = vcombine.high %v607_v32, %v607_v32 }
 0x13d   :  { %3168 = vmatpush1.bf16.msra.mxu0 %v10293_v39  ;;  %3209 = vmatpush1.bf16.msra.mxu1 %v10296_v40  ;;  %v10381_v39 = vld [vmem:[#allocation3 + $0x44] ss:$144 sps:$4 sm:$0xff]   ;;  %v2910_v40 = vsel %vm2872_vm1, %v9150_v37, 0  ;;  %v10455_v37 = vld [vmem:[#allocation3 + $0x50] ss:$144 sps:$4 sm:$0xff]  }
 0x13e   :  { %9182 = vmatprep.subr.msk.bf16.mxu0 %vm2872_vm1, %v9147_v41  ;;  %9184 = vmatprep.subr.msk.bf16.mxu1 %vm2872_vm1, %v9149_v42  ;;  %v2916_v41 = vsel %vm2872_vm1, %v9152_v38, 0  ;;  %v10384_v42 = vld [vmem:[#allocation3 + $0x4c] ss:$144 sps:$4 sm:$0xff]   ;;  %v10458_v38 = vld [vmem:[#allocation3 + $0x58] ss:$144 sps:$4 sm:$0xff]  }
 0x141   :  { %3170 = vmatpush1.bf16.msra.mxu0 %v2898_v47  ;;  %3211 = vmatpush1.bf16.msra.mxu1 %v2904_v48  ;;  %v10390_v47 = vld [vmem:[#allocation3 + $0x16c] ss:$144 sps:$4 sm:$0xff]   ;;  %v10385_v48 = vld [vmem:[#allocation3 + $0x160] ss:$144 sps:$4 sm:$0xff]  }
 0x142   :  { %3227 = vmatprep.subr.bf16.mxu0 %v10305_v46  ;;  %3268 = vmatprep.subr.bf16.mxu1 %v10308_v49  ;;  %v10387_v46 = vld [vmem:[#allocation3 + $0x164] ss:$144 sps:$4 sm:$0xff]   ;;  %v10388_v49 = vld [vmem:[#allocation3 + $0x168] ss:$144 sps:$4 sm:$0xff]  }
 0x144   :  { %3178 = vmatmul.mubr.bf16.vlgmr.msra.gmra.mrb[8].mxu0 %v11219_v62  ;;  %3219 = vmatmul.mubr.bf16.vlgmr.msra.gmra.mrb[8].mxu1 %v11219_v62 }
 0x145   :  { %3228 = vmatpush1.bf16.msra.mxu0 %v10303_v50  ;;  %3269 = vmatpush1.bf16.msra.mxu1 %v10306_v51  ;;  %v10393_v50 = vld [vmem:[#allocation3 + $0x284] ss:$144 sps:$4 sm:$0xff]   ;;  %v10396_v51 = vld [vmem:[#allocation3 + $0x28c] ss:$144 sps:$4 sm:$0xff]  }
 0x146   :  { %3229 = vmatprep.subr.bf16.mxu0 %v10311_v52  ;;  %3270 = vmatprep.subr.bf16.mxu1 %v10314_v53  ;;  %v10391_v52 = vld [vmem:[#allocation3 + $0x280] ss:$144 sps:$4 sm:$0xff]   ;;  %v10394_v53 = vld [vmem:[#allocation3 + $0x288] ss:$144 sps:$4 sm:$0xff]  }
 0x147   :  { %9187 = vmatprep.mubr.msk.bf16.mxu0 %vm2868_vm0, %v11209_v44  ;;  %9189 = vmatprep.mubr.msk.bf16.mxu1 %vm2868_vm0, %v11209_v44 }
 0x149   :  { %3230 = vmatpush1.bf16.msra.mxu0 %v10309_v54  ;;  %3271 = vmatpush1.bf16.msra.mxu1 %v10312_v55  ;;  %v10399_v54 = vld [vmem:[#allocation3 + $0x3a4] ss:$144 sps:$4 sm:$0xff]   ;;  %v10402_v55 = vld [vmem:[#allocation3 + $0x3ac] ss:$144 sps:$4 sm:$0xff]  }
 0x14a   :  { %3231 = vmatprep.subr.bf16.mxu0 %v10317_v56  ;;  %3272 = vmatprep.subr.bf16.mxu1 %v10320_v57  ;;  %v10397_v56 = vld [vmem:[#allocation3 + $0x3a0] ss:$144 sps:$4 sm:$0xff]   ;;  %v10400_v57 = vld [vmem:[#allocation3 + $0x3a8] ss:$144 sps:$4 sm:$0xff]  }
 0x14d   :  { %3232 = vmatpush1.bf16.msra.mxu0 %v10315_v58  ;;  %3273 = vmatpush1.bf16.msra.mxu1 %v10318_v59  ;;  %v10405_v58 = vld [vmem:[#allocation3 + $0x4c4] ss:$144 sps:$4 sm:$0xff]   ;;  %v10408_v59 = vld [vmem:[#allocation3 + $0x4cc] ss:$144 sps:$4 sm:$0xff]  }
 0x14e   :  { %3233 = vmatprep.subr.bf16.mxu0 %v10323_v60  ;;  %3274 = vmatprep.subr.bf16.mxu1 %v10326_v61  ;;  %v10403_v60 = vld [vmem:[#allocation3 + $0x4c0] ss:$144 sps:$4 sm:$0xff]   ;;  %v10406_v61 = vld [vmem:[#allocation3 + $0x4c8] ss:$144 sps:$4 sm:$0xff]  }
 0x151   :  { %3234 = vmatpush1.bf16.msra.mxu0 %v10321_v63  ;;  %3275 = vmatpush1.bf16.msra.mxu1 %v10324_v0  ;;  %v10411_v63 = vld [vmem:[#allocation3 + $0x5e4] ss:$144 sps:$4 sm:$0xff]   ;;  %v10414_v0 = vld [vmem:[#allocation3 + $0x5ec] ss:$144 sps:$4 sm:$0xff]  }
 0x152   :  { %3235 = vmatprep.subr.bf16.mxu0 %v10329_v1  ;;  %3276 = vmatprep.subr.bf16.mxu1 %v10332_v2  ;;  %v10409_v1 = vld [vmem:[#allocation3 + $0x5e0] ss:$144 sps:$4 sm:$0xff]   ;;  %v10412_v2 = vld [vmem:[#allocation3 + $0x5e8] ss:$144 sps:$4 sm:$0xff]  }
 0x155   :  { %3236 = vmatpush1.bf16.msra.mxu0 %v10327_v3  ;;  %3277 = vmatpush1.bf16.msra.mxu1 %v10330_v4  ;;  %v10417_v3 = vld [vmem:[#allocation3 + $0x704] ss:$144 sps:$4 sm:$0xff]   ;;  %v10420_v4 = vld [vmem:[#allocation3 + $0x70c] ss:$144 sps:$4 sm:$0xff]  }
 0x156   :  { %3237 = vmatprep.subr.bf16.mxu0 %v10335_v5  ;;  %3278 = vmatprep.subr.bf16.mxu1 %v10338_v6  ;;  %v10415_v5 = vld [vmem:[#allocation3 + $0x700] ss:$144 sps:$4 sm:$0xff]   ;;  %v10418_v6 = vld [vmem:[#allocation3 + $0x708] ss:$144 sps:$4 sm:$0xff]  }
 0x159   :  { %3238 = vmatpush1.bf16.msra.mxu0 %v10333_v7  ;;  %3279 = vmatpush1.bf16.msra.mxu1 %v10336_v8  ;;  %v10423_v7 = vld [vmem:[#allocation3 + $0x824] ss:$144 sps:$4 sm:$0xff]   ;;  %v10426_v8 = vld [vmem:[#allocation3 + $0x82c] ss:$144 sps:$4 sm:$0xff]  }
 0x15a   :  { %3239 = vmatprep.subr.bf16.mxu0 %v10341_v9  ;;  %3280 = vmatprep.subr.bf16.mxu1 %v10344_v10  ;;  %v10421_v9 = vld [vmem:[#allocation3 + $0x820] ss:$144 sps:$4 sm:$0xff]   ;;  %v10424_v10 = vld [vmem:[#allocation3 + $0x828] ss:$144 sps:$4 sm:$0xff]  }
 0x15d   :  { %3240 = vmatpush1.bf16.msra.mxu0 %v10339_v11  ;;  %3281 = vmatpush1.bf16.msra.mxu1 %v10342_v12  ;;  %v10429_v11 = vld [vmem:[#allocation3 + $0x944] ss:$144 sps:$4 sm:$0xff]   ;;  %v10432_v12 = vld [vmem:[#allocation3 + $0x94c] ss:$144 sps:$4 sm:$0xff]  }
 0x15e   :  { %3241 = vmatprep.subr.bf16.mxu0 %v10347_v13  ;;  %3282 = vmatprep.subr.bf16.mxu1 %v10350_v14  ;;  %v10427_v13 = vld [vmem:[#allocation3 + $0x940] ss:$144 sps:$4 sm:$0xff]   ;;  %v10430_v14 = vld [vmem:[#allocation3 + $0x948] ss:$144 sps:$4 sm:$0xff]  }
 0x161   :  { %3242 = vmatpush1.bf16.msra.mxu0 %v10345_v15  ;;  %3283 = vmatpush1.bf16.msra.mxu1 %v10348_v16  ;;  %v10435_v15 = vld [vmem:[#allocation3 + $0xa64] ss:$144 sps:$4 sm:$0xff]   ;;  %v10438_v16 = vld [vmem:[#allocation3 + $0xa6c] ss:$144 sps:$4 sm:$0xff]  }
 0x162   :  { %3243 = vmatprep.subr.bf16.mxu0 %v10353_v17  ;;  %3284 = vmatprep.subr.bf16.mxu1 %v10356_v18  ;;  %v10433_v17 = vld [vmem:[#allocation3 + $0xa60] ss:$144 sps:$4 sm:$0xff]   ;;  %v10436_v18 = vld [vmem:[#allocation3 + $0xa68] ss:$144 sps:$4 sm:$0xff]  }
 0x165   :  { %3244 = vmatpush1.bf16.msra.mxu0 %v10351_v19  ;;  %3285 = vmatpush1.bf16.msra.mxu1 %v10354_v20  ;;  %v10441_v19 = vld [vmem:[#allocation3 + $0xb84] ss:$144 sps:$4 sm:$0xff]   ;;  %v10444_v20 = vld [vmem:[#allocation3 + $0xb8c] ss:$144 sps:$4 sm:$0xff]  }
 0x166   :  { %3245 = vmatprep.subr.bf16.mxu0 %v10359_v21  ;;  %3286 = vmatprep.subr.bf16.mxu1 %v10362_v22  ;;  %v10439_v21 = vld [vmem:[#allocation3 + $0xb80] ss:$144 sps:$4 sm:$0xff]   ;;  %v10442_v22 = vld [vmem:[#allocation3 + $0xb88] ss:$144 sps:$4 sm:$0xff]  }
 0x169   :  { %3246 = vmatpush1.bf16.msra.mxu0 %v10357_v23  ;;  %3287 = vmatpush1.bf16.msra.mxu1 %v10360_v24  ;;  %v10447_v23 = vld [vmem:[#allocation3 + $0xca4] ss:$144 sps:$4 sm:$0xff]   ;;  %v10450_v24 = vld [vmem:[#allocation3 + $0xcac] ss:$144 sps:$4 sm:$0xff]  }
 0x16a   :  { %3247 = vmatprep.subr.bf16.mxu0 %v10365_v25  ;;  %3288 = vmatprep.subr.bf16.mxu1 %v10368_v26  ;;  %v608_v25 = vld [vmem:[#allocation3 + $0xdc0] sm:$0x33]  ;;  %v609_v26 = vld [vmem:[#allocation3 + $0xdc8] sm:$0x33] }
 0x16b   :  { %v9154_v31 = vcombine.low %v608_v25, %v608_v25  ;;  %v9156_v32 = vcombine.low %v609_v26, %v609_v26 }
 0x16d   :  { %3248 = vmatpush1.bf16.msra.mxu0 %v10363_v27  ;;  %3289 = vmatpush1.bf16.msra.mxu1 %v10366_v28  ;;  %v10445_v27 = vld [vmem:[#allocation3 + $0xca0] ss:$144 sps:$4 sm:$0xff]   ;;  %v10448_v28 = vld [vmem:[#allocation3 + $0xca8] ss:$144 sps:$4 sm:$0xff]  }
 0x16e   :  { %3249 = vmatprep.subr.bf16.mxu0 %v10371_v29  ;;  %3290 = vmatprep.subr.bf16.mxu1 %v10374_v30  ;;  %v9155_v29 = vcombine.high %v608_v25, %v608_v25  ;;  %v9157_v30 = vcombine.high %v609_v26, %v609_v26  ;;  %v10523_v25 = vld [vmem:[#allocation3 + $0xcb4] ss:$144 sps:$4 sm:$0xff]   ;;  %v10526_v26 = vld [vmem:[#allocation3 + $0xcbc] ss:$144 sps:$4 sm:$0xff]  }
 0x171   :  { %3250 = vmatpush1.bf16.msra.mxu0 %v10369_v33  ;;  %3291 = vmatpush1.bf16.msra.mxu1 %v10372_v34  ;;  %v10457_v33 = vld [vmem:[#allocation3 + $0x54] ss:$144 sps:$4 sm:$0xff]   ;;  %v2922_v34 = vsel %vm2872_vm1, %v9154_v31, 0 }
 0x172   :  { %9186 = vmatprep.subr.msk.bf16.mxu0 %vm2872_vm1, %v9151_v35  ;;  %9188 = vmatprep.subr.msk.bf16.mxu1 %vm2872_vm1, %v9153_v36  ;;  %v2928_v35 = vsel %vm2872_vm1, %v9156_v32, 0  ;;  %v10460_v36 = vld [vmem:[#allocation3 + $0x5c] ss:$144 sps:$4 sm:$0xff]  }
 0x175   :  { %3252 = vmatpush1.bf16.msra.mxu0 %v2910_v40  ;;  %3293 = vmatpush1.bf16.msra.mxu1 %v2916_v41  ;;  %v10466_v40 = vld [vmem:[#allocation3 + $0x17c] ss:$144 sps:$4 sm:$0xff]   ;;  %v10461_v41 = vld [vmem:[#allocation3 + $0x170] ss:$144 sps:$4 sm:$0xff]  }
 0x176   :  { %3309 = vmatprep.subr.bf16.mxu0 %v10381_v39  ;;  %3350 = vmatprep.subr.bf16.mxu1 %v10384_v42  ;;  %v10463_v39 = vld [vmem:[#allocation3 + $0x174] ss:$144 sps:$4 sm:$0xff]   ;;  %v10464_v42 = vld [vmem:[#allocation3 + $0x178] ss:$144 sps:$4 sm:$0xff]  }
 0x178   :  { %3260 = vmatmul.mubr.bf16.vlgmr.msra.gmra.mrb[12].mxu0 %v11219_v62  ;;  %3301 = vmatmul.mubr.bf16.vlgmr.msra.gmra.mrb[12].mxu1 %v11219_v62 }
 0x179   :  { %3310 = vmatpush1.bf16.msra.mxu0 %v10379_v43  ;;  %3351 = vmatpush1.bf16.msra.mxu1 %v10382_v45  ;;  %v10469_v43 = vld [vmem:[#allocation3 + $0x294] ss:$144 sps:$4 sm:$0xff]   ;;  %v10472_v45 = vld [vmem:[#allocation3 + $0x29c] ss:$144 sps:$4 sm:$0xff]  }
 0x17a   :  { %3311 = vmatprep.subr.bf16.mxu0 %v10387_v46  ;;  %3352 = vmatprep.subr.bf16.mxu1 %v10390_v47 }
 0x17b   :  { %9191 = vmatprep.mubr.msk.bf16.mxu0 %vm2868_vm0, %v11209_v44  ;;  %9193 = vmatprep.mubr.msk.bf16.mxu1 %vm2868_vm0, %v11209_v44 }
 0x17d   :  { %3312 = vmatpush1.bf16.msra.mxu0 %v10385_v48  ;;  %3353 = vmatpush1.bf16.msra.mxu1 %v10388_v49 }
 0x17e   :  { %3313 = vmatprep.subr.bf16.mxu0 %v10393_v50  ;;  %3354 = vmatprep.subr.bf16.mxu1 %v10396_v51  ;;  %v10467_v51 = vld [vmem:[#allocation3 + $0x290] ss:$144 sps:$4 sm:$0xff]  }
 0x181   :  { %3314 = vmatpush1.bf16.msra.mxu0 %v10391_v52  ;;  %3355 = vmatpush1.bf16.msra.mxu1 %v10394_v53  ;;  %v10470_v52 = vld [vmem:[#allocation3 + $0x298] ss:$144 sps:$4 sm:$0xff]  }
 0x182   :  { %3315 = vmatprep.subr.bf16.mxu0 %v10399_v54  ;;  %3356 = vmatprep.subr.bf16.mxu1 %v10402_v55  ;;  %v10475_v55 = vld [vmem:[#allocation3 + $0x3b4] ss:$144 sps:$4 sm:$0xff]  }
 0x185   :  { %3316 = vmatpush1.bf16.msra.mxu0 %v10397_v56  ;;  %3357 = vmatpush1.bf16.msra.mxu1 %v10400_v57  ;;  %v10478_v56 = vld [vmem:[#allocation3 + $0x3bc] ss:$144 sps:$4 sm:$0xff]  }
 0x186   :  { %3317 = vmatprep.subr.bf16.mxu0 %v10405_v58  ;;  %3358 = vmatprep.subr.bf16.mxu1 %v10408_v59  ;;  %v10473_v58 = vld [vmem:[#allocation3 + $0x3b0] ss:$144 sps:$4 sm:$0xff]   ;;  %v10476_v59 = vld [vmem:[#allocation3 + $0x3b8] ss:$144 sps:$4 sm:$0xff]  }
 0x189   :  { %3318 = vmatpush1.bf16.msra.mxu0 %v10403_v60  ;;  %3359 = vmatpush1.bf16.msra.mxu1 %v10406_v61  ;;  %v10481_v60 = vld [vmem:[#allocation3 + $0x4d4] ss:$144 sps:$4 sm:$0xff]   ;;  %v10484_v61 = vld [vmem:[#allocation3 + $0x4dc] ss:$144 sps:$4 sm:$0xff]  }
 0x18a   :  { %3319 = vmatprep.subr.bf16.mxu0 %v10411_v63  ;;  %3360 = vmatprep.subr.bf16.mxu1 %v10414_v0  ;;  %v10479_v63 = vld [vmem:[#allocation3 + $0x4d0] ss:$144 sps:$4 sm:$0xff]   ;;  %v10482_v0 = vld [vmem:[#allocation3 + $0x4d8] ss:$144 sps:$4 sm:$0xff]  }
 0x18d   :  { %3320 = vmatpush1.bf16.msra.mxu0 %v10409_v1  ;;  %3361 = vmatpush1.bf16.msra.mxu1 %v10412_v2  ;;  %v10487_v1 = vld [vmem:[#allocation3 + $0x5f4] ss:$144 sps:$4 sm:$0xff]   ;;  %v10490_v2 = vld [vmem:[#allocation3 + $0x5fc] ss:$144 sps:$4 sm:$0xff]  }
 0x18e   :  { %3321 = vmatprep.subr.bf16.mxu0 %v10417_v3  ;;  %3362 = vmatprep.subr.bf16.mxu1 %v10420_v4  ;;  %v10485_v3 = vld [vmem:[#allocation3 + $0x5f0] ss:$144 sps:$4 sm:$0xff]   ;;  %v10488_v4 = vld [vmem:[#allocation3 + $0x5f8] ss:$144 sps:$4 sm:$0xff]  }
 0x191   :  { %3322 = vmatpush1.bf16.msra.mxu0 %v10415_v5  ;;  %3363 = vmatpush1.bf16.msra.mxu1 %v10418_v6  ;;  %v10493_v5 = vld [vmem:[#allocation3 + $0x714] ss:$144 sps:$4 sm:$0xff]   ;;  %v10496_v6 = vld [vmem:[#allocation3 + $0x71c] ss:$144 sps:$4 sm:$0xff]  }
 0x192   :  { %3323 = vmatprep.subr.bf16.mxu0 %v10423_v7  ;;  %3364 = vmatprep.subr.bf16.mxu1 %v10426_v8  ;;  %v10491_v7 = vld [vmem:[#allocation3 + $0x710] ss:$144 sps:$4 sm:$0xff]   ;;  %v10494_v8 = vld [vmem:[#allocation3 + $0x718] ss:$144 sps:$4 sm:$0xff]  }
 0x195   :  { %3324 = vmatpush1.bf16.msra.mxu0 %v10421_v9  ;;  %3365 = vmatpush1.bf16.msra.mxu1 %v10424_v10  ;;  %v10499_v9 = vld [vmem:[#allocation3 + $0x834] ss:$144 sps:$4 sm:$0xff]   ;;  %v10502_v10 = vld [vmem:[#allocation3 + $0x83c] ss:$144 sps:$4 sm:$0xff]  }
 0x196   :  { %3325 = vmatprep.subr.bf16.mxu0 %v10429_v11  ;;  %3366 = vmatprep.subr.bf16.mxu1 %v10432_v12  ;;  %v10497_v11 = vld [vmem:[#allocation3 + $0x830] ss:$144 sps:$4 sm:$0xff]   ;;  %v10500_v12 = vld [vmem:[#allocation3 + $0x838] ss:$144 sps:$4 sm:$0xff]  }
 0x199   :  { %3326 = vmatpush1.bf16.msra.mxu0 %v10427_v13  ;;  %3367 = vmatpush1.bf16.msra.mxu1 %v10430_v14  ;;  %v10505_v13 = vld [vmem:[#allocation3 + $0x954] ss:$144 sps:$4 sm:$0xff]   ;;  %v10508_v14 = vld [vmem:[#allocation3 + $0x95c] ss:$144 sps:$4 sm:$0xff]  }
 0x19a   :  { %3327 = vmatprep.subr.bf16.mxu0 %v10435_v15  ;;  %3368 = vmatprep.subr.bf16.mxu1 %v10438_v16  ;;  %v10503_v15 = vld [vmem:[#allocation3 + $0x950] ss:$144 sps:$4 sm:$0xff]   ;;  %v10506_v16 = vld [vmem:[#allocation3 + $0x958] ss:$144 sps:$4 sm:$0xff]  }
 0x19d   :  { %3328 = vmatpush1.bf16.msra.mxu0 %v10433_v17  ;;  %3369 = vmatpush1.bf16.msra.mxu1 %v10436_v18  ;;  %v10511_v17 = vld [vmem:[#allocation3 + $0xa74] ss:$144 sps:$4 sm:$0xff]   ;;  %v10514_v18 = vld [vmem:[#allocation3 + $0xa7c] ss:$144 sps:$4 sm:$0xff]  }
 0x19e   :  { %3329 = vmatprep.subr.bf16.mxu0 %v10441_v19  ;;  %3370 = vmatprep.subr.bf16.mxu1 %v10444_v20  ;;  %v10509_v19 = vld [vmem:[#allocation3 + $0xa70] ss:$144 sps:$4 sm:$0xff]   ;;  %v10512_v20 = vld [vmem:[#allocation3 + $0xa78] ss:$144 sps:$4 sm:$0xff]  }
 0x1a1   :  { %3330 = vmatpush1.bf16.msra.mxu0 %v10439_v21  ;;  %3371 = vmatpush1.bf16.msra.mxu1 %v10442_v22  ;;  %v10517_v21 = vld [vmem:[#allocation3 + $0xb94] ss:$144 sps:$4 sm:$0xff]   ;;  %v10520_v22 = vld [vmem:[#allocation3 + $0xb9c] ss:$144 sps:$4 sm:$0xff]  }
 0x1a2   :  { %3331 = vmatprep.subr.bf16.mxu0 %v10447_v23  ;;  %3372 = vmatprep.subr.bf16.mxu1 %v10450_v24  ;;  %v10515_v23 = vld [vmem:[#allocation3 + $0xb90] ss:$144 sps:$4 sm:$0xff]   ;;  %v10518_v24 = vld [vmem:[#allocation3 + $0xb98] ss:$144 sps:$4 sm:$0xff]  }
 0x1a5   :  { %3332 = vmatpush1.bf16.msra.mxu0 %v10445_v27  ;;  %3373 = vmatpush1.bf16.msra.mxu1 %v10448_v28  ;;  %v610_v27 = vld [vmem:[#allocation3 + $0xdd0] sm:$0x33]  ;;  %v611_v28 = vld [vmem:[#allocation3 + $0xdd8] sm:$0x33] }
 0x1a6   :  { %9190 = vmatprep.subr.msk.bf16.mxu0 %vm2872_vm1, %v9155_v29  ;;  %9192 = vmatprep.subr.msk.bf16.mxu1 %vm2872_vm1, %v9157_v30  ;;  %v10521_v29 = vld [vmem:[#allocation3 + $0xcb0] ss:$144 sps:$4 sm:$0xff]   ;;  %v10524_v30 = vld [vmem:[#allocation3 + $0xcb8] ss:$144 sps:$4 sm:$0xff]   ;;  %v9159_v31 = vcombine.high %v610_v27, %v610_v27  ;;  %v9161_v32 = vcombine.high %v611_v28, %v611_v28 }
 0x1a9   :  { %3334 = vmatpush1.bf16.msra.mxu0 %v2922_v34  ;;  %3375 = vmatpush1.bf16.msra.mxu1 %v2928_v35  ;;  %v9160_v34 = vcombine.low %v611_v28, %v611_v28  ;;  %v10596_v28 = vld [vmem:[#allocation3 + $0xbac] ss:$144 sps:$4 sm:$0xff]  }
 0x1aa   :  { %3391 = vmatprep.subr.bf16.mxu0 %v10457_v33  ;;  %3432 = vmatprep.subr.bf16.mxu1 %v10460_v36  ;;  %v9158_v33 = vcombine.low %v610_v27, %v610_v27  ;;  %v10593_v27 = vld [vmem:[#allocation3 + $0xba4] ss:$144 sps:$4 sm:$0xff]  }
 0x1ab   :  { %v2940_v36 = vsel %vm2872_vm1, %v9160_v34, 0  ;;  %v613_v34 = vld [vmem:[#allocation3 + $0xde8] sm:$0x33] }
 0x1ac   :  { %3342 = vmatmul.mubr.bf16.vlgmr.msra.gmra.mrb[16].mxu0 %v11219_v62  ;;  %3383 = vmatmul.mubr.bf16.vlgmr.msra.gmra.mrb[16].mxu1 %v11219_v62  ;;  %v2934_v35 = vsel %vm2872_vm1, %v9158_v33, 0  ;;  %v612_v33 = vld [vmem:[#allocation3 + $0xde0] sm:$0x33] }
 0x1ad   :  { %3392 = vmatpush1.bf16.msra.mxu0 %v10455_v37  ;;  %3433 = vmatpush1.bf16.msra.mxu1 %v10458_v38  ;;  %v10533_v37 = vld [vmem:[#allocation3 + $0x64] ss:$144 sps:$4 sm:$0xff]   ;;  %v10536_v38 = vld [vmem:[#allocation3 + $0x6c] ss:$144 sps:$4 sm:$0xff]  }
 0x1ae   :  { %3393 = vmatprep.subr.bf16.mxu0 %v10463_v39  ;;  %3434 = vmatprep.subr.bf16.mxu1 %v10466_v40  ;;  %v10531_v39 = vld [vmem:[#allocation3 + $0x60] ss:$144 sps:$4 sm:$0xff]   ;;  %v10534_v40 = vld [vmem:[#allocation3 + $0x68] ss:$144 sps:$4 sm:$0xff]  }
 0x1af   :  { %v11263_v46 = vpop.f32.mrb[0].mxu0  ;;  %9195 = vmatprep.mubr.msk.bf16.mxu0 %vm2868_vm0, %v11209_v44  ;;  %9197 = vmatprep.mubr.msk.bf16.mxu1 %vm2868_vm0, %v11209_v44  ;;  %v11269_v47 = vpop.f32.mrb[0].mxu1 }
 0x1b0   :  { %v11271_v48 = vpop.f32.mrb[1].mxu0  ;;  %v11273_v49 = vpop.f32.mrb[1].mxu1 }
 0x1b1   :  { %v3019_v50 = vpop.f32.mrb[2].mxu0  ;;  %3394 = vmatpush1.bf16.msra.mxu0 %v10461_v41  ;;  %3435 = vmatpush1.bf16.msra.mxu1 %v10464_v42  ;;  %v3060_v53 = vpop.f32.mrb[2].mxu1  ;;  %v10539_v41 = vld [vmem:[#allocation3 + $0x184] ss:$144 sps:$4 sm:$0xff]   ;;  %v10542_v42 = vld [vmem:[#allocation3 + $0x18c] ss:$144 sps:$4 sm:$0xff]  }
 0x1b2   :  { %v3020_v54 = vpop.f32.mrb[3].mxu0  ;;  %3395 = vmatprep.subr.bf16.mxu0 %v10469_v43  ;;  %3436 = vmatprep.subr.bf16.mxu1 %v10472_v45  ;;  %v3061_v57 = vpop.f32.mrb[3].mxu1  ;;  %v10537_v43 = vld [vmem:[#allocation3 + $0x180] ss:$144 sps:$4 sm:$0xff]   ;;  %v10540_v45 = vld [vmem:[#allocation3 + $0x188] ss:$144 sps:$4 sm:$0xff]  }
 0x1b3   :  { %v10545_v50 = vld [vmem:[#allocation3 + $0x2a4] ss:$144 sps:$4 sm:$0xff]   ;;  %v10543_v57 = vld [vmem:[#allocation3 + $0x2a0] ss:$144 sps:$4 sm:$0xff]  }
 0x1b5   :  { %3396 = vmatpush1.bf16.msra.mxu0 %v10467_v51  ;;  %3437 = vmatpush1.bf16.msra.mxu1 %v10470_v52  ;;  %v10548_v51 = vld [vmem:[#allocation3 + $0x2ac] ss:$144 sps:$4 sm:$0xff]  }
 0x1b6   :  { %3397 = vmatprep.subr.bf16.mxu0 %v10475_v55  ;;  %3438 = vmatprep.subr.bf16.mxu1 %v10478_v56 }
 0x1b9   :  { %3398 = vmatpush1.bf16.msra.mxu0 %v10473_v58  ;;  %3439 = vmatpush1.bf16.msra.mxu1 %v10476_v59  ;;  %v10546_v58 = vld [vmem:[#allocation3 + $0x2a8] ss:$144 sps:$4 sm:$0xff]  }
 0x1ba   :  { %3399 = vmatprep.subr.bf16.mxu0 %v10481_v60  ;;  %3440 = vmatprep.subr.bf16.mxu1 %v10484_v61  ;;  %v10551_v61 = vld [vmem:[#allocation3 + $0x3c4] ss:$144 sps:$4 sm:$0xff]  }
 0x1bd   :  { %3400 = vmatpush1.bf16.msra.mxu0 %v10479_v63  ;;  %3441 = vmatpush1.bf16.msra.mxu1 %v10482_v0  ;;  %v10554_v63 = vld [vmem:[#allocation3 + $0x3cc] ss:$144 sps:$4 sm:$0xff]  }
 0x1be   :  { %3401 = vmatprep.subr.bf16.mxu0 %v10487_v1  ;;  %3442 = vmatprep.subr.bf16.mxu1 %v10490_v2  ;;  %v10549_v1 = vld [vmem:[#allocation3 + $0x3c0] ss:$144 sps:$4 sm:$0xff]   ;;  %v10552_v2 = vld [vmem:[#allocation3 + $0x3c8] ss:$144 sps:$4 sm:$0xff]  }
 0x1c1   :  { %3402 = vmatpush1.bf16.msra.mxu0 %v10485_v3  ;;  %3443 = vmatpush1.bf16.msra.mxu1 %v10488_v4  ;;  %v10557_v3 = vld [vmem:[#allocation3 + $0x4e4] ss:$144 sps:$4 sm:$0xff]   ;;  %v10560_v4 = vld [vmem:[#allocation3 + $0x4ec] ss:$144 sps:$4 sm:$0xff]  }
 0x1c2   :  { %3403 = vmatprep.subr.bf16.mxu0 %v10493_v5  ;;  %3444 = vmatprep.subr.bf16.mxu1 %v10496_v6  ;;  %v10555_v5 = vld [vmem:[#allocation3 + $0x4e0] ss:$144 sps:$4 sm:$0xff]   ;;  %v10558_v6 = vld [vmem:[#allocation3 + $0x4e8] ss:$144 sps:$4 sm:$0xff]  }
 0x1c5   :  { %3404 = vmatpush1.bf16.msra.mxu0 %v10491_v7  ;;  %3445 = vmatpush1.bf16.msra.mxu1 %v10494_v8  ;;  %v10563_v7 = vld [vmem:[#allocation3 + $0x604] ss:$144 sps:$4 sm:$0xff]   ;;  %v10566_v8 = vld [vmem:[#allocation3 + $0x60c] ss:$144 sps:$4 sm:$0xff]  }
 0x1c6   :  { %3405 = vmatprep.subr.bf16.mxu0 %v10499_v9  ;;  %3446 = vmatprep.subr.bf16.mxu1 %v10502_v10  ;;  %v10561_v9 = vld [vmem:[#allocation3 + $0x600] ss:$144 sps:$4 sm:$0xff]   ;;  %v10564_v10 = vld [vmem:[#allocation3 + $0x608] ss:$144 sps:$4 sm:$0xff]  }
 0x1c9   :  { %3406 = vmatpush1.bf16.msra.mxu0 %v10497_v11  ;;  %3447 = vmatpush1.bf16.msra.mxu1 %v10500_v12  ;;  %v10569_v11 = vld [vmem:[#allocation3 + $0x724] ss:$144 sps:$4 sm:$0xff]   ;;  %v10572_v12 = vld [vmem:[#allocation3 + $0x72c] ss:$144 sps:$4 sm:$0xff]  }
 0x1ca   :  { %3407 = vmatprep.subr.bf16.mxu0 %v10505_v13  ;;  %3448 = vmatprep.subr.bf16.mxu1 %v10508_v14  ;;  %v10567_v13 = vld [vmem:[#allocation3 + $0x720] ss:$144 sps:$4 sm:$0xff]   ;;  %v10570_v14 = vld [vmem:[#allocation3 + $0x728] ss:$144 sps:$4 sm:$0xff]  }
 0x1cd   :  { %3408 = vmatpush1.bf16.msra.mxu0 %v10503_v15  ;;  %3449 = vmatpush1.bf16.msra.mxu1 %v10506_v16  ;;  %v10575_v15 = vld [vmem:[#allocation3 + $0x844] ss:$144 sps:$4 sm:$0xff]   ;;  %v10578_v16 = vld [vmem:[#allocation3 + $0x84c] ss:$144 sps:$4 sm:$0xff]  }
 0x1ce   :  { %3409 = vmatprep.subr.bf16.mxu0 %v10511_v17  ;;  %3450 = vmatprep.subr.bf16.mxu1 %v10514_v18  ;;  %v10573_v17 = vld [vmem:[#allocation3 + $0x840] ss:$144 sps:$4 sm:$0xff]   ;;  %v10576_v18 = vld [vmem:[#allocation3 + $0x848] ss:$144 sps:$4 sm:$0xff]  }
 0x1d1   :  { %3410 = vmatpush1.bf16.msra.mxu0 %v10509_v19  ;;  %3451 = vmatpush1.bf16.msra.mxu1 %v10512_v20  ;;  %v10581_v19 = vld [vmem:[#allocation3 + $0x964] ss:$144 sps:$4 sm:$0xff]   ;;  %v10584_v20 = vld [vmem:[#allocation3 + $0x96c] ss:$144 sps:$4 sm:$0xff]  }
 0x1d2   :  { %3411 = vmatprep.subr.bf16.mxu0 %v10517_v21  ;;  %3452 = vmatprep.subr.bf16.mxu1 %v10520_v22  ;;  %v10579_v21 = vld [vmem:[#allocation3 + $0x960] ss:$144 sps:$4 sm:$0xff]   ;;  %v10582_v22 = vld [vmem:[#allocation3 + $0x968] ss:$144 sps:$4 sm:$0xff]  }
 0x1d5   :  { %3412 = vmatpush1.bf16.msra.mxu0 %v10515_v23  ;;  %3453 = vmatpush1.bf16.msra.mxu1 %v10518_v24  ;;  %v10587_v23 = vld [vmem:[#allocation3 + $0xa84] ss:$144 sps:$4 sm:$0xff]   ;;  %v10590_v24 = vld [vmem:[#allocation3 + $0xa8c] ss:$144 sps:$4 sm:$0xff]  }
 0x1d6   :  { %3413 = vmatprep.subr.bf16.mxu0 %v10523_v25  ;;  %3454 = vmatprep.subr.bf16.mxu1 %v10526_v26  ;;  %v10585_v25 = vld [vmem:[#allocation3 + $0xa80] ss:$144 sps:$4 sm:$0xff]   ;;  %v10588_v26 = vld [vmem:[#allocation3 + $0xa88] ss:$144 sps:$4 sm:$0xff]  }
 0x1d9   :  { %3414 = vmatpush1.bf16.msra.mxu0 %v10521_v29  ;;  %3455 = vmatpush1.bf16.msra.mxu1 %v10524_v30  ;;  %v10591_v29 = vld [vmem:[#allocation3 + $0xba0] ss:$144 sps:$4 sm:$0xff]   ;;  %v10594_v30 = vld [vmem:[#allocation3 + $0xba8] ss:$144 sps:$4 sm:$0xff]  }
 0x1da   :  { %9194 = vmatprep.subr.msk.bf16.mxu0 %vm2872_vm1, %v9159_v31  ;;  %9196 = vmatprep.subr.msk.bf16.mxu1 %vm2872_vm1, %v9161_v32  ;;  %v10599_v31 = vld [vmem:[#allocation3 + $0xcc4] ss:$144 sps:$4 sm:$0xff]   ;;  %v10602_v32 = vld [vmem:[#allocation3 + $0xccc] ss:$144 sps:$4 sm:$0xff]  }
 0x1dd   :  { %3416 = vmatpush1.bf16.msra.mxu0 %v2934_v35  ;;  %3457 = vmatpush1.bf16.msra.mxu1 %v2940_v36  ;;  %v10597_v35 = vld [vmem:[#allocation3 + $0xcc0] ss:$144 sps:$4 sm:$0xff]   ;;  %v10600_v36 = vld [vmem:[#allocation3 + $0xcc8] ss:$144 sps:$4 sm:$0xff]  }
 0x1de   :  { %3473 = vmatprep.subr.bf16.mxu0 %v10533_v37  ;;  %3514 = vmatprep.subr.bf16.mxu1 %v10536_v38  ;;  %v9163_v37 = vcombine.high %v612_v33, %v612_v33  ;;  %v9165_v38 = vcombine.high %v613_v34, %v613_v34 }
 0x1e0   :  { %3424 = vmatmul.mubr.bf16.vlgmr.msra.gmra.mrb[20].mxu0 %v11219_v62  ;;  %3465 = vmatmul.mubr.bf16.vlgmr.msra.gmra.mrb[20].mxu1 %v11219_v62 }
 0x1e1   :  { %3474 = vmatpush1.bf16.msra.mxu0 %v10531_v39  ;;  %3515 = vmatpush1.bf16.msra.mxu1 %v10534_v40  ;;  %v9162_v39 = vcombine.low %v612_v33, %v612_v33  ;;  %v9164_v40 = vcombine.low %v613_v34, %v613_v34  ;;  %v10660_v33 = vld [vmem:[#allocation3 + $0x97c] ss:$144 sps:$4 sm:$0xff]   ;;  %v10655_v34 = vld [vmem:[#allocation3 + $0x970] ss:$144 sps:$4 sm:$0xff]  }
 0x1e2   :  { %3475 = vmatprep.subr.bf16.mxu0 %v10539_v41  ;;  %3516 = vmatprep.subr.bf16.mxu1 %v10542_v42 }
 0x1e3   :  { %v11281_v52 = vpop.f32.mrb[4].mxu0  ;;  %v11283_v53 = vpop.f32.mrb[4].mxu1  ;;  %9199 = vmatprep.mubr.msk.bf16.mxu0 %vm2868_vm0, %v11209_v44  ;;  %9201 = vmatprep.mubr.msk.bf16.mxu1 %vm2868_vm0, %v11209_v44  ;;  %v2946_v41 = vsel %vm2872_vm1, %v9162_v39, 0  ;;  %v2952_v42 = vsel %vm2872_vm1, %v9164_v40, 0  ;;  %v10664_v39 = vld [vmem:[#allocation3 + $0xa98] ss:$144 sps:$4 sm:$0xff]  }
 0x1e4   :  { %v11289_v54 = vpop.f32.mrb[5].mxu0  ;;  %v11291_v55 = vpop.f32.mrb[5].mxu1  ;;  %v10669_v40 = vld [vmem:[#allocation3 + $0xbb4] ss:$144 sps:$4 sm:$0xff]  }
 0x1e5   :  { %v3101_v56 = vpop.f32.mrb[6].mxu0  ;;  %3476 = vmatpush1.bf16.msra.mxu0 %v10537_v43  ;;  %3517 = vmatpush1.bf16.msra.mxu1 %v10540_v45  ;;  %v3142_v59 = vpop.f32.mrb[6].mxu1  ;;  %v10609_v43 = vld [vmem:[#allocation3 + $0x74] ss:$144 sps:$4 sm:$0xff]   ;;  %v10612_v45 = vld [vmem:[#allocation3 + $0x7c] ss:$144 sps:$4 sm:$0xff]  }
 0x1e6   :  { %v3102_v60 = vpop.f32.mrb[7].mxu0  ;;  %3477 = vmatprep.subr.bf16.mxu0 %v10545_v50  ;;  %3518 = vmatprep.subr.bf16.mxu1 %v10548_v51  ;;  %v3143_v0 = vpop.f32.mrb[7].mxu1  ;;  %v10607_v50 = vld [vmem:[#allocation3 + $0x70] ss:$144 sps:$4 sm:$0xff]   ;;  %v10610_v51 = vld [vmem:[#allocation3 + $0x78] ss:$144 sps:$4 sm:$0xff]  }
 0x1e7   :  { %v10615_v56 = vld [vmem:[#allocation3 + $0x194] ss:$144 sps:$4 sm:$0xff]   ;;  %v10616_v59 = vld [vmem:[#allocation3 + $0x198] ss:$144 sps:$4 sm:$0xff]  }
 0x1e8   :  { %v10621_v60 = vld [vmem:[#allocation3 + $0x2b4] ss:$144 sps:$4 sm:$0xff]  }
 0x1e9   :  { %3478 = vmatpush1.bf16.msra.mxu0 %v10543_v57  ;;  %3519 = vmatpush1.bf16.msra.mxu1 %v10546_v58  ;;  %v10618_v57 = vld [vmem:[#allocation3 + $0x19c] ss:$144 sps:$4 sm:$0xff]   ;;  %v10613_v58 = vld [vmem:[#allocation3 + $0x190] ss:$144 sps:$4 sm:$0xff]  }
 0x1ea   :  { %3479 = vmatprep.subr.bf16.mxu0 %v10551_v61  ;;  %3520 = vmatprep.subr.bf16.mxu1 %v10554_v63  ;;  %v10624_v61 = vld [vmem:[#allocation3 + $0x2bc] ss:$144 sps:$4 sm:$0xff]  }
 0x1ed   :  { %3480 = vmatpush1.bf16.msra.mxu0 %v10549_v1  ;;  %3521 = vmatpush1.bf16.msra.mxu1 %v10552_v2 }
 0x1ee   :  { %3481 = vmatprep.subr.bf16.mxu0 %v10557_v3  ;;  %3522 = vmatprep.subr.bf16.mxu1 %v10560_v4 }
 0x1f1   :  { %3482 = vmatpush1.bf16.msra.mxu0 %v10555_v5  ;;  %3523 = vmatpush1.bf16.msra.mxu1 %v10558_v6 }
 0x1f2   :  { %3483 = vmatprep.subr.bf16.mxu0 %v10563_v7  ;;  %3524 = vmatprep.subr.bf16.mxu1 %v10566_v8  ;;  %v10619_v7 = vld [vmem:[#allocation3 + $0x2b0] ss:$144 sps:$4 sm:$0xff]   ;;  %v10622_v8 = vld [vmem:[#allocation3 + $0x2b8] ss:$144 sps:$4 sm:$0xff]  }
 0x1f5   :  { %3484 = vmatpush1.bf16.msra.mxu0 %v10561_v9  ;;  %3525 = vmatpush1.bf16.msra.mxu1 %v10564_v10 }
 0x1f6   :  { %3485 = vmatprep.subr.bf16.mxu0 %v10569_v11  ;;  %3526 = vmatprep.subr.bf16.mxu1 %v10572_v12  ;;  %v10627_v11 = vld [vmem:[#allocation3 + $0x3d4] ss:$144 sps:$4 sm:$0xff]   ;;  %v10630_v12 = vld [vmem:[#allocation3 + $0x3dc] ss:$144 sps:$4 sm:$0xff]  }
 0x1f9   :  { %3486 = vmatpush1.bf16.msra.mxu0 %v10567_v13  ;;  %3527 = vmatpush1.bf16.msra.mxu1 %v10570_v14  ;;  %v10625_v14 = vld [vmem:[#allocation3 + $0x3d0] ss:$144 sps:$4 sm:$0xff]  }
 0x1fa   :  { %3487 = vmatprep.subr.bf16.mxu0 %v10575_v15  ;;  %3528 = vmatprep.subr.bf16.mxu1 %v10578_v16  ;;  %v10628_v15 = vld [vmem:[#allocation3 + $0x3d8] ss:$144 sps:$4 sm:$0xff]   ;;  %v10633_v16 = vld [vmem:[#allocation3 + $0x4f4] ss:$144 sps:$4 sm:$0xff]  }
 0x1fd   :  { %3488 = vmatpush1.bf16.msra.mxu0 %v10573_v17  ;;  %3529 = vmatpush1.bf16.msra.mxu1 %v10576_v18  ;;  %v10636_v17 = vld [vmem:[#allocation3 + $0x4fc] ss:$144 sps:$4 sm:$0xff]   ;;  %v10631_v18 = vld [vmem:[#allocation3 + $0x4f0] ss:$144 sps:$4 sm:$0xff]  }
 0x1fe   :  { %3489 = vmatprep.subr.bf16.mxu0 %v10581_v19  ;;  %3530 = vmatprep.subr.bf16.mxu1 %v10584_v20  ;;  %v10634_v19 = vld [vmem:[#allocation3 + $0x4f8] ss:$144 sps:$4 sm:$0xff]   ;;  %v10639_v20 = vld [vmem:[#allocation3 + $0x614] ss:$144 sps:$4 sm:$0xff]  }
 0x201   :  { %3490 = vmatpush1.bf16.msra.mxu0 %v10579_v21  ;;  %3531 = vmatpush1.bf16.msra.mxu1 %v10582_v22  ;;  %v10642_v21 = vld [vmem:[#allocation3 + $0x61c] ss:$144 sps:$4 sm:$0xff]   ;;  %v10637_v22 = vld [vmem:[#allocation3 + $0x610] ss:$144 sps:$4 sm:$0xff]  }
 0x202   :  { %3491 = vmatprep.subr.bf16.mxu0 %v10587_v23  ;;  %3532 = vmatprep.subr.bf16.mxu1 %v10590_v24  ;;  %v10640_v23 = vld [vmem:[#allocation3 + $0x618] ss:$144 sps:$4 sm:$0xff]   ;;  %v10645_v24 = vld [vmem:[#allocation3 + $0x734] ss:$144 sps:$4 sm:$0xff]  }
 0x205   :  { %3492 = vmatpush1.bf16.msra.mxu0 %v10585_v25  ;;  %3533 = vmatpush1.bf16.msra.mxu1 %v10588_v26  ;;  %v10648_v25 = vld [vmem:[#allocation3 + $0x73c] ss:$144 sps:$4 sm:$0xff]   ;;  %v10643_v26 = vld [vmem:[#allocation3 + $0x730] ss:$144 sps:$4 sm:$0xff]  }
 0x206   :  { %3493 = vmatprep.subr.bf16.mxu0 %v10593_v27  ;;  %3534 = vmatprep.subr.bf16.mxu1 %v10596_v28  ;;  %v10646_v27 = vld [vmem:[#allocation3 + $0x738] ss:$144 sps:$4 sm:$0xff]   ;;  %v10651_v28 = vld [vmem:[#allocation3 + $0x854] ss:$144 sps:$4 sm:$0xff]  }
 0x209   :  { %3494 = vmatpush1.bf16.msra.mxu0 %v10591_v29  ;;  %3535 = vmatpush1.bf16.msra.mxu1 %v10594_v30  ;;  %v10654_v29 = vld [vmem:[#allocation3 + $0x85c] ss:$144 sps:$4 sm:$0xff]   ;;  %v10649_v30 = vld [vmem:[#allocation3 + $0x850] ss:$144 sps:$4 sm:$0xff]  }
 0x20a   :  { %3495 = vmatprep.subr.bf16.mxu0 %v10599_v31  ;;  %3536 = vmatprep.subr.bf16.mxu1 %v10602_v32  ;;  %v10652_v31 = vld [vmem:[#allocation3 + $0x858] ss:$144 sps:$4 sm:$0xff]   ;;  %v10657_v32 = vld [vmem:[#allocation3 + $0x974] ss:$144 sps:$4 sm:$0xff]  }
 0x20d   :  { %3496 = vmatpush1.bf16.msra.mxu0 %v10597_v35  ;;  %3537 = vmatpush1.bf16.msra.mxu1 %v10600_v36  ;;  %v10658_v35 = vld [vmem:[#allocation3 + $0x978] ss:$144 sps:$4 sm:$0xff]   ;;  %v10663_v36 = vld [vmem:[#allocation3 + $0xa94] ss:$144 sps:$4 sm:$0xff]  }
 0x20e   :  { %9198 = vmatprep.subr.msk.bf16.mxu0 %vm2872_vm1, %v9163_v37  ;;  %9200 = vmatprep.subr.msk.bf16.mxu1 %vm2872_vm1, %v9165_v38  ;;  %v10666_v37 = vld [vmem:[#allocation3 + $0xa9c] ss:$144 sps:$4 sm:$0xff]   ;;  %v10661_v38 = vld [vmem:[#allocation3 + $0xa90] ss:$144 sps:$4 sm:$0xff]  }
 0x211   :  { %3498 = vmatpush1.bf16.msra.mxu0 %v2946_v41  ;;  %3539 = vmatpush1.bf16.msra.mxu1 %v2952_v42  ;;  %v10672_v41 = vld [vmem:[#allocation3 + $0xbbc] ss:$144 sps:$4 sm:$0xff]   ;;  %v10667_v42 = vld [vmem:[#allocation3 + $0xbb0] ss:$144 sps:$4 sm:$0xff]  }
 0x212   :  { %3555 = vmatprep.subr.bf16.mxu0 %v10609_v43  ;;  %3596 = vmatprep.subr.bf16.mxu1 %v10612_v45  ;;  %v10670_v43 = vld [vmem:[#allocation3 + $0xbb8] ss:$144 sps:$4 sm:$0xff]   ;;  %v10675_v45 = vld [vmem:[#allocation3 + $0xcd4] ss:$144 sps:$4 sm:$0xff]  }
 0x214   :  { %3506 = vmatmul.mubr.bf16.vlgmr.msra.gmra.mrb[24].mxu0 %v11219_v62  ;;  %3547 = vmatmul.mubr.bf16.vlgmr.msra.gmra.mrb[24].mxu1 %v11219_v62 }
 0x215   :  { %3556 = vmatpush1.bf16.msra.mxu0 %v10607_v50  ;;  %3597 = vmatpush1.bf16.msra.mxu1 %v10610_v51  ;;  %v10678_v50 = vld [vmem:[#allocation3 + $0xcdc] ss:$144 sps:$4 sm:$0xff]   ;;  %v614_v51 = vld [vmem:[#allocation3 + $0xdf0] sm:$0x33] }
 0x216   :  { %3557 = vmatprep.subr.bf16.mxu0 %v10615_v56  ;;  %3598 = vmatprep.subr.bf16.mxu1 %v10618_v57  ;;  %v615_v56 = vld [vmem:[#allocation3 + $0xdf8] sm:$0x33]  ;;  %v10673_v57 = vld [vmem:[#allocation3 + $0xcd0] ss:$144 sps:$4 sm:$0xff]  }
 0x217   :  { %v11299_v63 = vpop.f32.mrb[8].mxu0  ;;  %v11301_v0 = vpop.f32.mrb[8].mxu1  ;;  %9203 = vmatprep.mubr.msk.bf16.mxu0 %vm2868_vm0, %v11209_v44  ;;  %9205 = vmatprep.mubr.msk.bf16.mxu1 %vm2868_vm0, %v11209_v44 }
 0x218   :  { %v3720_v1 = vmax.f32 %v11271_v48, %v11301_v0  ;;  %v11309_v2 = vpop.f32.mrb[9].mxu0  ;;  %v11311_v3 = vpop.f32.mrb[9].mxu1 }
 0x219   :  { %v3719_v4 = vmax.f32 %v11263_v46, %v11309_v2  ;;  %v3721_v5 = vmax.f32 %v11269_v47, %v11311_v3  ;;  %v3183_v6 = vpop.f32.mrb[10].mxu0  ;;  %3558 = vmatpush1.bf16.msra.mxu0 %v10613_v58  ;;  %3599 = vmatpush1.bf16.msra.mxu1 %v10616_v59  ;;  %v3224_v9 = vpop.f32.mrb[10].mxu1  ;;  %v10676_v58 = vld [vmem:[#allocation3 + $0xcd8] ss:$144 sps:$4 sm:$0xff]   ;;  %v9167_v59 = vcombine.high %v614_v51, %v614_v51 }
 0x21a   :  { %v3184_v10 = vpop.f32.mrb[11].mxu0  ;;  %3559 = vmatprep.subr.bf16.mxu0 %v10621_v60  ;;  %3600 = vmatprep.subr.bf16.mxu1 %v10624_v61  ;;  %v3225_v13 = vpop.f32.mrb[11].mxu1  ;;  %v9169_v60 = vcombine.high %v615_v56, %v615_v56  ;;  %v9166_v61 = vcombine.low %v614_v51, %v614_v51  ;;  %v9168_v6 = vcombine.low %v615_v56, %v615_v56  ;;  %v10685_v9 = vld [vmem:[#allocation3 + $0x84] ss:$144 sps:$4 sm:$0xff]   ;;  %v10719_v51 = vld [vmem:[#allocation3 + $0x740] ss:$144 sps:$4 sm:$0xff]  }
 0x21b   :  { %v10688_v10 = vld [vmem:[#allocation3 + $0x8c] ss:$144 sps:$4 sm:$0xff]   ;;  %v10691_v13 = vld [vmem:[#allocation3 + $0x1a4] ss:$144 sps:$4 sm:$0xff]   ;;  %v10722_v56 = vld [vmem:[#allocation3 + $0x748] ss:$144 sps:$4 sm:$0xff]  }
 0x21c   :  { %v3966_v47 = vld [vmem:[#allocation7 + $0x480] sm:$0xff] }
 0x21d   :  { %3560 = vmatpush1.bf16.msra.mxu0 %v10619_v7  ;;  %3601 = vmatpush1.bf16.msra.mxu1 %v10622_v8  ;;  %v2958_v7 = vsel %vm2872_vm1, %v9166_v61, 0  ;;  %v2964_v8 = vsel %vm2872_vm1, %v9168_v6, 0  ;;  %v10733_v61 = vld [vmem:[#allocation3 + $0x984] ss:$144 sps:$4 sm:$0xff]   ;;  %v10736_v6 = vld [vmem:[#allocation3 + $0x98c] ss:$144 sps:$4 sm:$0xff]  }
 0x21e   :  { %3561 = vmatprep.subr.bf16.mxu0 %v10627_v11  ;;  %3602 = vmatprep.subr.bf16.mxu1 %v10630_v12  ;;  %v10683_v11 = vld [vmem:[#allocation3 + $0x80] ss:$144 sps:$4 sm:$0xff]   ;;  %v10686_v12 = vld [vmem:[#allocation3 + $0x88] ss:$144 sps:$4 sm:$0xff]  }
 0x221   :  { %3562 = vmatpush1.bf16.msra.mxu0 %v10625_v14  ;;  %3603 = vmatpush1.bf16.msra.mxu1 %v10628_v15  ;;  %v10694_v14 = vld [vmem:[#allocation3 + $0x1ac] ss:$144 sps:$4 sm:$0xff]   ;;  %v10689_v15 = vld [vmem:[#allocation3 + $0x1a0] ss:$144 sps:$4 sm:$0xff]  }
 0x222   :  { %3563 = vmatprep.subr.bf16.mxu0 %v10633_v16  ;;  %3604 = vmatprep.subr.bf16.mxu1 %v10636_v17  ;;  %v10692_v16 = vld [vmem:[#allocation3 + $0x1a8] ss:$144 sps:$4 sm:$0xff]   ;;  %v10697_v17 = vld [vmem:[#allocation3 + $0x2c4] ss:$144 sps:$4 sm:$0xff]  }
 0x225   :  { %3564 = vmatpush1.bf16.msra.mxu0 %v10631_v18  ;;  %3605 = vmatpush1.bf16.msra.mxu1 %v10634_v19  ;;  %v10700_v18 = vld [vmem:[#allocation3 + $0x2cc] ss:$144 sps:$4 sm:$0xff]  }
 0x226   :  { %3565 = vmatprep.subr.bf16.mxu0 %v10639_v20  ;;  %3606 = vmatprep.subr.bf16.mxu1 %v10642_v21 }
 0x229   :  { %3566 = vmatpush1.bf16.msra.mxu0 %v10637_v22  ;;  %3607 = vmatpush1.bf16.msra.mxu1 %v10640_v23 }
 0x22a   :  { %3567 = vmatprep.subr.bf16.mxu0 %v10645_v24  ;;  %3608 = vmatprep.subr.bf16.mxu1 %v10648_v25 }
 0x22d   :  { %3568 = vmatpush1.bf16.msra.mxu0 %v10643_v26  ;;  %3609 = vmatpush1.bf16.msra.mxu1 %v10646_v27 }
 0x22e   :  { %3569 = vmatprep.subr.bf16.mxu0 %v10651_v28  ;;  %3610 = vmatprep.subr.bf16.mxu1 %v10654_v29  ;;  %v10698_v28 = vld [vmem:[#allocation3 + $0x2c8] ss:$144 sps:$4 sm:$0xff]  }
 0x231   :  { %3570 = vmatpush1.bf16.msra.mxu0 %v10649_v30  ;;  %3611 = vmatpush1.bf16.msra.mxu1 %v10652_v31  ;;  %v10703_v31 = vld [vmem:[#allocation3 + $0x3e4] ss:$144 sps:$4 sm:$0xff]  }
 0x232   :  { %3571 = vmatprep.subr.bf16.mxu0 %v10657_v32  ;;  %3612 = vmatprep.subr.bf16.mxu1 %v10660_v33  ;;  %v10706_v32 = vld [vmem:[#allocation3 + $0x3ec] ss:$144 sps:$4 sm:$0xff]  }
 0x235   :  { %3572 = vmatpush1.bf16.msra.mxu0 %v10655_v34  ;;  %3613 = vmatpush1.bf16.msra.mxu1 %v10658_v35  ;;  %v10701_v34 = vld [vmem:[#allocation3 + $0x3e0] ss:$144 sps:$4 sm:$0xff]   ;;  %v10704_v35 = vld [vmem:[#allocation3 + $0x3e8] ss:$144 sps:$4 sm:$0xff]  }
 0x236   :  { %3573 = vmatprep.subr.bf16.mxu0 %v10663_v36  ;;  %3614 = vmatprep.subr.bf16.mxu1 %v10666_v37  ;;  %v10709_v36 = vld [vmem:[#allocation3 + $0x504] ss:$144 sps:$4 sm:$0xff]   ;;  %v10712_v37 = vld [vmem:[#allocation3 + $0x50c] ss:$144 sps:$4 sm:$0xff]  }
 0x239   :  { %3574 = vmatpush1.bf16.msra.mxu0 %v10661_v38  ;;  %3615 = vmatpush1.bf16.msra.mxu1 %v10664_v39  ;;  %v10707_v38 = vld [vmem:[#allocation3 + $0x500] ss:$144 sps:$4 sm:$0xff]   ;;  %v10710_v39 = vld [vmem:[#allocation3 + $0x508] ss:$144 sps:$4 sm:$0xff]  }
 0x23a   :  { %3575 = vmatprep.subr.bf16.mxu0 %v10669_v40  ;;  %3616 = vmatprep.subr.bf16.mxu1 %v10672_v41  ;;  %v10715_v40 = vld [vmem:[#allocation3 + $0x624] ss:$144 sps:$4 sm:$0xff]   ;;  %v10718_v41 = vld [vmem:[#allocation3 + $0x62c] ss:$144 sps:$4 sm:$0xff]  }
 0x23d   :  { %3576 = vmatpush1.bf16.msra.mxu0 %v10667_v42  ;;  %3617 = vmatpush1.bf16.msra.mxu1 %v10670_v43  ;;  %v10713_v42 = vld [vmem:[#allocation3 + $0x620] ss:$144 sps:$4 sm:$0xff]   ;;  %v10716_v43 = vld [vmem:[#allocation3 + $0x628] ss:$144 sps:$4 sm:$0xff]  }
 0x23e   :  { %3577 = vmatprep.subr.bf16.mxu0 %v10675_v45  ;;  %3618 = vmatprep.subr.bf16.mxu1 %v10678_v50  ;;  %v10721_v45 = vld [vmem:[#allocation3 + $0x744] ss:$144 sps:$4 sm:$0xff]   ;;  %v10724_v50 = vld [vmem:[#allocation3 + $0x74c] ss:$144 sps:$4 sm:$0xff]  }
 0x241   :  { %3578 = vmatpush1.bf16.msra.mxu0 %v10673_v57  ;;  %3619 = vmatpush1.bf16.msra.mxu1 %v10676_v58  ;;  %v10727_v57 = vld [vmem:[#allocation3 + $0x864] ss:$144 sps:$4 sm:$0xff]   ;;  %v10730_v58 = vld [vmem:[#allocation3 + $0x86c] ss:$144 sps:$4 sm:$0xff]  }
 0x242   :  { %9202 = vmatprep.subr.msk.bf16.mxu0 %vm2872_vm1, %v9167_v59  ;;  %9204 = vmatprep.subr.msk.bf16.mxu1 %vm2872_vm1, %v9169_v60  ;;  %v10725_v59 = vld [vmem:[#allocation3 + $0x860] ss:$144 sps:$4 sm:$0xff]   ;;  %v10728_v60 = vld [vmem:[#allocation3 + $0x868] ss:$144 sps:$4 sm:$0xff]  }
 0x245   :  { %3580 = vmatpush1.bf16.msra.mxu0 %v2958_v7  ;;  %3621 = vmatpush1.bf16.msra.mxu1 %v2964_v8  ;;  %v10731_v7 = vld [vmem:[#allocation3 + $0x980] ss:$144 sps:$4 sm:$0xff]   ;;  %v10734_v8 = vld [vmem:[#allocation3 + $0x988] ss:$144 sps:$4 sm:$0xff]  }
 0x246   :  { %3637 = vmatprep.subr.bf16.mxu0 %v10685_v9  ;;  %3678 = vmatprep.subr.bf16.mxu1 %v10688_v10  ;;  %v10739_v9 = vld [vmem:[#allocation3 + $0xaa4] ss:$144 sps:$4 sm:$0xff]   ;;  %v10742_v10 = vld [vmem:[#allocation3 + $0xaac] ss:$144 sps:$4 sm:$0xff]  }
 0x248   :  { %3588 = vmatmul.mubr.bf16.vlgmr.msra.gmra.mrb[28].mxu0 %v11219_v62  ;;  %3629 = vmatmul.mubr.bf16.vlgmr.msra.gmra.mrb[28].mxu1 %v11219_v62 }
 0x249   :  { %3638 = vmatpush1.bf16.msra.mxu0 %v10683_v11  ;;  %3679 = vmatpush1.bf16.msra.mxu1 %v10686_v12  ;;  %v10737_v11 = vld [vmem:[#allocation3 + $0xaa0] ss:$144 sps:$4 sm:$0xff]   ;;  %v10740_v12 = vld [vmem:[#allocation3 + $0xaa8] ss:$144 sps:$4 sm:$0xff]  }
 0x24a   :  { %3639 = vmatprep.subr.bf16.mxu0 %v10691_v13  ;;  %3680 = vmatprep.subr.bf16.mxu1 %v10694_v14  ;;  %v10745_v13 = vld [vmem:[#allocation3 + $0xbc4] ss:$144 sps:$4 sm:$0xff]   ;;  %v10748_v14 = vld [vmem:[#allocation3 + $0xbcc] ss:$144 sps:$4 sm:$0xff]  }
 0x24b   :  { %v11323_v19 = vpop.f32.mrb[12].mxu0  ;;  %v11325_v20 = vpop.f32.mrb[12].mxu1  ;;  %9207 = vmatprep.mubr.msk.bf16.mxu0 %vm2868_vm0, %v11209_v44  ;;  %9209 = vmatprep.mubr.msk.bf16.mxu1 %vm2868_vm0, %v11209_v44  ;;  %v10695_v44 = vld [vmem:[#allocation3 + $0x2c0] ss:$144 sps:$4 sm:$0xff]  }
 0x24c   :  { %v3722_v21 = vmax.f32 %v11273_v49, %v11323_v19  ;;  %v3724_v22 = vmax.f32 %v11289_v54, %v11325_v20  ;;  %v11335_v23 = vpop.f32.mrb[13].mxu0  ;;  %v11337_v24 = vpop.f32.mrb[13].mxu1  ;;  %v3962_v49 = vld [vmem:[#allocation7 + $0x460] sm:$0xff]  ;;  %v3959_v19 = vld [vmem:[#allocation7 + $0x448] sm:$0xff] }
 0x24d   :  { %v3723_v25 = vmax.f32 %v11281_v52, %v11335_v23  ;;  %v3725_v26 = vmax.f32 %v11283_v53, %v11337_v24  ;;  %v3265_v27 = vpop.f32.mrb[14].mxu0  ;;  %3640 = vmatpush1.bf16.msra.mxu0 %v10689_v15  ;;  %3681 = vmatpush1.bf16.msra.mxu1 %v10692_v16  ;;  %v3306_v29 = vpop.f32.mrb[14].mxu1  ;;  %v10743_v15 = vld [vmem:[#allocation3 + $0xbc0] ss:$144 sps:$4 sm:$0xff]   ;;  %v10746_v16 = vld [vmem:[#allocation3 + $0xbc8] ss:$144 sps:$4 sm:$0xff]  }
 0x24e   :  { %v3266_v30 = vpop.f32.mrb[15].mxu0  ;;  %3641 = vmatprep.subr.bf16.mxu0 %v10697_v17  ;;  %3682 = vmatprep.subr.bf16.mxu1 %v10700_v18  ;;  %v3307_v33 = vpop.f32.mrb[15].mxu1  ;;  %v10751_v17 = vld [vmem:[#allocation3 + $0xce4] ss:$144 sps:$4 sm:$0xff]   ;;  %v10754_v18 = vld [vmem:[#allocation3 + $0xcec] ss:$144 sps:$4 sm:$0xff]  }
 0x24f   :  { %v616_v27 = vld [vmem:[#allocation3 + $0xe00] sm:$0x33]  ;;  %v10752_v29 = vld [vmem:[#allocation3 + $0xce8] ss:$144 sps:$4 sm:$0xff]  }
 0x250   :  { %v9171_v30 = vcombine.high %v616_v27, %v616_v27  ;;  %v3967_v23 = vld [vmem:[#allocation7 + $0x488] sm:$0xff]  ;;  %v4066_v24 = vld [vmem:[#allocation7 + $0x7a0] sm:$0xff] }
 0x251   :  { %3642 = vmatpush1.bf16.msra.mxu0 %v10695_v44  ;;  %3683 = vmatpush1.bf16.msra.mxu1 %v10698_v28  ;;  %v617_v44 = vld [vmem:[#allocation3 + $0xe08] sm:$0x33]  ;;  %v10749_v28 = vld [vmem:[#allocation3 + $0xce0] ss:$144 sps:$4 sm:$0xff]  }
 0x252   :  { %3643 = vmatprep.subr.bf16.mxu0 %v10703_v31  ;;  %3684 = vmatprep.subr.bf16.mxu1 %v10706_v32  ;;  %v9173_v31 = vcombine.high %v617_v44, %v617_v44  ;;  %v9170_v32 = vcombine.low %v616_v27, %v616_v27  ;;  %v9172_v33 = vcombine.low %v617_v44, %v617_v44 }
 0x255   :  { %3644 = vmatpush1.bf16.msra.mxu0 %v10701_v34  ;;  %3685 = vmatpush1.bf16.msra.mxu1 %v10704_v35  ;;  %v3822_v34 = vld [vmem:[#allocation7] sm:$0xff] }
 0x256   :  { %3645 = vmatprep.subr.bf16.mxu0 %v10709_v36  ;;  %3686 = vmatprep.subr.bf16.mxu1 %v10712_v37  ;;  %v3826_v35 = vld [vmem:[#allocation7 + $0x20] sm:$0xff]  ;;  %v3823_v36 = vld [vmem:[#allocation7 + $0x8] sm:$0xff] }
 0x257   :  { %v3827_v37 = vld [vmem:[#allocation7 + $0x28] sm:$0xff] }
 0x259   :  { %3646 = vmatpush1.bf16.msra.mxu0 %v10707_v38  ;;  %3687 = vmatpush1.bf16.msra.mxu1 %v10710_v39  ;;  %v2970_v38 = vsel %vm2872_vm1, %v9170_v32, 0  ;;  %v2976_v39 = vsel %vm2872_vm1, %v9172_v33, 0 }
 0x25a   :  { %3647 = vmatprep.subr.bf16.mxu0 %v10715_v40  ;;  %3688 = vmatprep.subr.bf16.mxu1 %v10718_v41  ;;  %v9212_v40 = vcombine.high %v3822_v34, %v3826_v35  ;;  %v9214_v41 = vcombine.high %v3823_v36, %v3827_v37 }
 0x25d   :  { %3648 = vmatpush1.bf16.msra.mxu0 %v10713_v42  ;;  %3689 = vmatpush1.bf16.msra.mxu1 %v10716_v43  ;;  %v3830_v42 = vld [vmem:[#allocation7 + $0x40] sm:$0xff] }
 0x25e   :  { %3649 = vmatprep.subr.bf16.mxu0 %v10721_v45  ;;  %3690 = vmatprep.subr.bf16.mxu1 %v10724_v50  ;;  %v3834_v43 = vld [vmem:[#allocation7 + $0x60] sm:$0xff]  ;;  %v3831_v45 = vld [vmem:[#allocation7 + $0x48] sm:$0xff] }
 0x25f   :  { %v3835_v50 = vld [vmem:[#allocation7 + $0x68] sm:$0xff] }
 0x261   :  { %3650 = vmatpush1.bf16.msra.mxu0 %v10719_v51  ;;  %3691 = vmatpush1.bf16.msra.mxu1 %v10722_v56  ;;  %v9211_v51 = vcombine.low %v3822_v34, %v3826_v35  ;;  %v9213_v56 = vcombine.low %v3823_v36, %v3827_v37  ;;  %v3854_v35 = vld [vmem:[#allocation7 + $0x100] sm:$0xff]  ;;  %v3855_v37 = vld [vmem:[#allocation7 + $0x108] sm:$0xff] }
 0x262   :  { %3651 = vmatprep.subr.bf16.mxu0 %v10727_v57  ;;  %3692 = vmatprep.subr.bf16.mxu1 %v10730_v58  ;;  %v9220_v57 = vcombine.high %v3830_v42, %v3834_v43  ;;  %v9222_v58 = vcombine.high %v3831_v45, %v3835_v50  ;;  %v3858_v36 = vld [vmem:[#allocation7 + $0x120] sm:$0xff] }
 0x265   :  { %3652 = vmatpush1.bf16.msra.mxu0 %v10725_v59  ;;  %3693 = vmatpush1.bf16.msra.mxu1 %v10728_v60  ;;  %v3838_v59 = vld [vmem:[#allocation7 + $0x80] sm:$0xff] }
 0x266   :  { %3653 = vmatprep.subr.bf16.mxu0 %v10733_v61  ;;  %3694 = vmatprep.subr.bf16.mxu1 %v10736_v6  ;;  %v3842_v60 = vld [vmem:[#allocation7 + $0xa0] sm:$0xff]  ;;  %v3839_v61 = vld [vmem:[#allocation7 + $0x88] sm:$0xff] }
 0x267   :  { %v3843_v6 = vld [vmem:[#allocation7 + $0xa8] sm:$0xff] }
 0x269   :  { %3654 = vmatpush1.bf16.msra.mxu0 %v10731_v7  ;;  %3695 = vmatpush1.bf16.msra.mxu1 %v10734_v8  ;;  %v9219_v7 = vcombine.low %v3830_v42, %v3834_v43  ;;  %v9221_v8 = vcombine.low %v3831_v45, %v3835_v50  ;;  %v3862_v43 = vld [vmem:[#allocation7 + $0x140] sm:$0xff]  ;;  %v3863_v50 = vld [vmem:[#allocation7 + $0x148] sm:$0xff] }
 0x26a   :  { %3655 = vmatprep.subr.bf16.mxu0 %v10739_v9  ;;  %3696 = vmatprep.subr.bf16.mxu1 %v10742_v10  ;;  %v9228_v9 = vcombine.high %v3838_v59, %v3842_v60  ;;  %v9230_v10 = vcombine.high %v3839_v61, %v3843_v6  ;;  %v3866_v45 = vld [vmem:[#allocation7 + $0x160] sm:$0xff] }
 0x26d   :  { %3656 = vmatpush1.bf16.msra.mxu0 %v10737_v11  ;;  %3697 = vmatpush1.bf16.msra.mxu1 %v10740_v12  ;;  %v3846_v11 = vld [vmem:[#allocation7 + $0xc0] sm:$0xff] }
 0x26e   :  { %3657 = vmatprep.subr.bf16.mxu0 %v10745_v13  ;;  %3698 = vmatprep.subr.bf16.mxu1 %v10748_v14  ;;  %v3850_v14 = vld [vmem:[#allocation7 + $0xe0] sm:$0xff] }
 0x26f   :  { %v9236_v33 = vcombine.high %v3846_v11, %v3850_v14 }
 0x271   :  { %3658 = vmatpush1.bf16.msra.mxu0 %v10743_v15  ;;  %3699 = vmatpush1.bf16.msra.mxu1 %v10746_v16  ;;  %v3847_v15 = vld [vmem:[#allocation7 + $0xc8] sm:$0xff] }
 0x272   :  { %3659 = vmatprep.subr.bf16.mxu0 %v10751_v17  ;;  %3700 = vmatprep.subr.bf16.mxu1 %v10754_v18  ;;  %v3851_v16 = vld [vmem:[#allocation7 + $0xe8] sm:$0xff] }
 0x273   :  { %v9238_v34 = vcombine.high %v3847_v15, %v3851_v16 }
 0x275   :  { %3660 = vmatpush1.bf16.msra.mxu0 %v10749_v28  ;;  %3701 = vmatpush1.bf16.msra.mxu1 %v10752_v29  ;;  %v9227_v29 = vcombine.low %v3838_v59, %v3842_v60  ;;  %v3870_v60 = vld [vmem:[#allocation7 + $0x180] sm:$0xff] }
 0x276   :  { %9206 = vmatprep.subr.msk.bf16.mxu0 %vm2872_vm1, %v9171_v30  ;;  %9208 = vmatprep.subr.msk.bf16.mxu1 %vm2872_vm1, %v9173_v31  ;;  %v9229_v30 = vcombine.low %v3839_v61, %v3843_v6  ;;  %v3874_v61 = vld [vmem:[#allocation7 + $0x1a0] sm:$0xff]  ;;  %v3871_v6 = vld [vmem:[#allocation7 + $0x188] sm:$0xff] }
 0x279   :  { %3662 = vmatpush1.bf16.msra.mxu0 %v2970_v38  ;;  %3703 = vmatpush1.bf16.msra.mxu1 %v2976_v39  ;;  %v3859_v38 = vld [vmem:[#allocation7 + $0x128] sm:$0xff]  ;;  %v9235_v39 = vcombine.low %v3846_v11, %v3850_v14  ;;  %v3878_v14 = vld [vmem:[#allocation7 + $0x1c0] sm:$0xff] }
 0x27a   :  { %7278 = vmatprep.subr.bf16.mxu0 %v9212_v40  ;;  %7483 = vmatprep.subr.bf16.mxu1 %v9214_v41  ;;  %v9237_v40 = vcombine.low %v3847_v15, %v3851_v16  ;;  %v9244_v41 = vcombine.high %v3854_v35, %v3858_v36  ;;  %v9246_v42 = vcombine.high %v3855_v37, %v3859_v38  ;;  %v3882_v15 = vld [vmem:[#allocation7 + $0x1e0] sm:$0xff]  ;;  %v3879_v16 = vld [vmem:[#allocation7 + $0x1c8] sm:$0xff] }
 0x27c   :  { %3670 = vmatmul.mubr.bf16.vlgmr.msra.gmra.mrb[32].mxu0 %v11219_v62  ;;  %3711 = vmatmul.mubr.bf16.vlgmr.msra.gmra.mrb[32].mxu1 %v11219_v62 }
 0x27d   :  { %7279 = vmatpush1.bf16.msra.mxu0 %v9211_v51  ;;  %7484 = vmatpush1.bf16.msra.mxu1 %v9213_v56  ;;  %v3867_v51 = vld [vmem:[#allocation7 + $0x168] sm:$0xff]  ;;  %v9243_v56 = vcombine.low %v3854_v35, %v3858_v36  ;;  %v9267_v36 = vcombine.low %v3878_v14, %v3882_v15 }
 0x27e   :  { %7280 = vmatprep.subr.bf16.mxu0 %v9220_v57  ;;  %7485 = vmatprep.subr.bf16.mxu1 %v9222_v58  ;;  %v9245_v57 = vcombine.low %v3855_v37, %v3859_v38  ;;  %v9252_v58 = vcombine.high %v3862_v43, %v3866_v45  ;;  %v9254_v59 = vcombine.high %v3863_v50, %v3867_v51  ;;  %v3891_v35 = vld [vmem:[#allocation7 + $0x228] sm:$0xff] }
 0x27f   :  { %v11349_v12 = vpop.f32.mrb[16].mxu0  ;;  %v11351_v13 = vpop.f32.mrb[16].mxu1 }
 0x280   :  { %v3726_v17 = vmax.f32 %v11291_v55, %v11349_v12  ;;  %v11355_v62 = vpop.f32.mrb[17].mxu0  ;;  %v11357_v18 = vpop.f32.mrb[17].mxu1 }
 0x281   :  { %v3727_v27 = vmax.f32 %v11299_v63, %v11355_v62  ;;  %v3347_v44 = vpop.f32.mrb[18].mxu0  ;;  %v3388_v28 = vpop.f32.mrb[18].mxu1  ;;  %7281 = vmatpush1.bf16.msra.mxu0 %v9219_v7  ;;  %7486 = vmatpush1.bf16.msra.mxu1 %v9221_v8  ;;  %v3875_v7 = vld [vmem:[#allocation7 + $0x1a8] sm:$0xff]  ;;  %v9251_v8 = vcombine.low %v3862_v43, %v3866_v45 }
 0x282   :  { %v3348_v31 = vpop.f32.mrb[19].mxu0  ;;  %v3389_v32 = vpop.f32.mrb[19].mxu1  ;;  %7282 = vmatprep.subr.bf16.mxu0 %v9228_v9  ;;  %7487 = vmatprep.subr.bf16.mxu1 %v9230_v10  ;;  %v9253_v9 = vcombine.low %v3863_v50, %v3867_v51  ;;  %v9260_v10 = vcombine.high %v3870_v60, %v3874_v61  ;;  %v9262_v11 = vcombine.high %v3871_v6, %v3875_v7  ;;  %v3883_v44 = vld [vmem:[#allocation7 + $0x1e8] sm:$0xff] }
 0x283   :  { %v9259_v28 = vcombine.low %v3870_v60, %v3874_v61  ;;  %v9270_v31 = vcombine.high %v3879_v16, %v3883_v44  ;;  %v3886_v32 = vld [vmem:[#allocation7 + $0x200] sm:$0xff]  ;;  %v9269_v37 = vcombine.low %v3879_v16, %v3883_v44  ;;  %v3899_v43 = vld [vmem:[#allocation7 + $0x268] sm:$0xff] }
 0x284   :  { %v3907_v60 = vld [vmem:[#allocation7 + $0x2a8] sm:$0xff]  ;;  %v3918_v44 = vld [vmem:[#allocation7 + $0x300] sm:$0xff] }
 0x285   :  { %7283 = vmatpush1.bf16.msra.mxu0 %v9227_v29  ;;  %7488 = vmatpush1.bf16.msra.mxu1 %v9229_v30  ;;  %v9261_v29 = vcombine.low %v3871_v6, %v3875_v7  ;;  %v9268_v30 = vcombine.high %v3878_v14, %v3882_v15  ;;  %v3915_v14 = vld [vmem:[#allocation7 + $0x2e8] sm:$0xff] }
 0x286   :  { %7284 = vmatprep.subr.bf16.mxu0 %v9236_v33  ;;  %7489 = vmatprep.subr.bf16.mxu1 %v9238_v34  ;;  %v3890_v33 = vld [vmem:[#allocation7 + $0x220] sm:$0xff]  ;;  %v3887_v34 = vld [vmem:[#allocation7 + $0x208] sm:$0xff] }
 0x287   :  { %v9276_v38 = vcombine.high %v3886_v32, %v3890_v33  ;;  %v9275_v45 = vcombine.low %v3886_v32, %v3890_v33  ;;  %v9277_v50 = vcombine.low %v3887_v34, %v3891_v35  ;;  %v3923_v32 = vld [vmem:[#allocation7 + $0x328] sm:$0xff]  ;;  %v11361_v33 = vld [vmem:[#allocation7 + $0x400] sm:$0xff] }
 0x289   :  { %7285 = vmatpush1.bf16.msra.mxu0 %v9235_v39  ;;  %7490 = vmatpush1.bf16.msra.mxu1 %v9237_v40  ;;  %v9278_v39 = vcombine.high %v3887_v34, %v3891_v35  ;;  %v3894_v40 = vld [vmem:[#allocation7 + $0x240] sm:$0xff]  ;;  %v11365_v35 = vld [vmem:[#allocation7 + $0x408] sm:$0xff] }
 0x28a   :  { %7286 = vmatprep.subr.bf16.mxu0 %v9244_v41  ;;  %7491 = vmatprep.subr.bf16.mxu1 %v9246_v42  ;;  %v3898_v41 = vld [vmem:[#allocation7 + $0x260] sm:$0xff]  ;;  %v3895_v42 = vld [vmem:[#allocation7 + $0x248] sm:$0xff] }
 0x28b   :  { %v9284_v51 = vcombine.high %v3894_v40, %v3898_v41  ;;  %v9283_v61 = vcombine.low %v3894_v40, %v3898_v41  ;;  %v9285_v6 = vcombine.low %v3895_v42, %v3899_v43  ;;  %v11363_v34 = vld [vmem:[#allocation7 + $0x420] sm:$0xff] }
 0x28d   :  { %7287 = vmatpush1.bf16.msra.mxu0 %v9243_v56  ;;  %7492 = vmatpush1.bf16.msra.mxu1 %v9245_v57  ;;  %v9286_v56 = vcombine.high %v3895_v42, %v3899_v43  ;;  %v3902_v57 = vld [vmem:[#allocation7 + $0x280] sm:$0xff] }
 0x28e   :  { %7288 = vmatprep.subr.bf16.mxu0 %v9252_v58  ;;  %7493 = vmatprep.subr.bf16.mxu1 %v9254_v59  ;;  %v3906_v58 = vld [vmem:[#allocation7 + $0x2a0] sm:$0xff]  ;;  %v3903_v59 = vld [vmem:[#allocation7 + $0x288] sm:$0xff] }
 0x28f   :  { %v9292_v7 = vcombine.high %v3902_v57, %v3906_v58  ;;  %v9291_v15 = vcombine.low %v3902_v57, %v3906_v58  ;;  %v9293_v16 = vcombine.low %v3903_v59, %v3907_v60  ;;  %v3926_v43 = vld [vmem:[#allocation7 + $0x340] sm:$0xff] }
 0x291   :  { %7289 = vmatpush1.bf16.msra.mxu0 %v9251_v8  ;;  %7494 = vmatpush1.bf16.msra.mxu1 %v9253_v9  ;;  %v9294_v8 = vcombine.high %v3903_v59, %v3907_v60  ;;  %v3910_v9 = vld [vmem:[#allocation7 + $0x2c0] sm:$0xff] }
 0x292   :  { %7290 = vmatprep.subr.bf16.mxu0 %v9260_v10  ;;  %7495 = vmatprep.subr.bf16.mxu1 %v9262_v11  ;;  %v3914_v10 = vld [vmem:[#allocation7 + $0x2e0] sm:$0xff]  ;;  %v3911_v11 = vld [vmem:[#allocation7 + $0x2c8] sm:$0xff] }
 0x293   :  { %v3934_v60 = vld [vmem:[#allocation7 + $0x380] sm:$0xff] }
 0x295   :  { %7291 = vmatpush1.bf16.msra.mxu0 %v9259_v28  ;;  %7496 = vmatpush1.bf16.msra.mxu1 %v9261_v29  ;;  %v9300_v28 = vcombine.high %v3910_v9, %v3914_v10  ;;  %v9302_v29 = vcombine.high %v3911_v11, %v3915_v14 }
 0x296   :  { %7292 = vmatprep.subr.bf16.mxu0 %v9268_v30  ;;  %7497 = vmatprep.subr.bf16.mxu1 %v9270_v31  ;;  %v3922_v30 = vld [vmem:[#allocation7 + $0x320] sm:$0xff]  ;;  %v3919_v31 = vld [vmem:[#allocation7 + $0x308] sm:$0xff] }
 0x297   :  { %v9308_v41 = vcombine.high %v3918_v44, %v3922_v30  ;;  %v9310_v42 = vcombine.high %v3919_v31, %v3923_v32  ;;  %v9309_v57 = vcombine.low %v3919_v31, %v3923_v32 }
 0x299   :  { %7293 = vmatpush1.bf16.msra.mxu0 %v9267_v36  ;;  %7498 = vmatpush1.bf16.msra.mxu1 %v9269_v37  ;;  %v9299_v36 = vcombine.low %v3910_v9, %v3914_v10  ;;  %v11367_v37 = vld [vmem:[#allocation7 + $0x428] sm:$0xff] }
 0x29a   :  { %7294 = vmatprep.subr.bf16.mxu0 %v9276_v38  ;;  %7499 = vmatprep.subr.bf16.mxu1 %v9278_v39  ;;  %v9301_v38 = vcombine.low %v3911_v11, %v3915_v14  ;;  %v9339_v39 = vcombine.low %v11361_v33, %v11363_v34  ;;  %v9341_v40 = vcombine.low %v11365_v35, %v11367_v37  ;;  %v3942_v14 = vld [vmem:[#allocation7 + $0x3c0] sm:$0xff] }
 0x29d   :  { %7295 = vmatpush1.bf16.msra.mxu0 %v9275_v45  ;;  %7500 = vmatpush1.bf16.msra.mxu1 %v9277_v50  ;;  %v3930_v45 = vld [vmem:[#allocation7 + $0x360] sm:$0xff]  ;;  %v3927_v50 = vld [vmem:[#allocation7 + $0x348] sm:$0xff] }
 0x29e   :  { %7296 = vmatprep.subr.bf16.mxu0 %v9284_v51  ;;  %7501 = vmatprep.subr.bf16.mxu1 %v9286_v56  ;;  %v3931_v51 = vld [vmem:[#allocation7 + $0x368] sm:$0xff]  ;;  %v9307_v56 = vcombine.low %v3918_v44, %v3922_v30  ;;  %v9316_v58 = vcombine.high %v3926_v43, %v3930_v45 }
 0x29f   :  { %v9318_v59 = vcombine.high %v3927_v50, %v3931_v51  ;;  %v9317_v9 = vcombine.low %v3927_v50, %v3931_v51  ;;  %v3947_v44 = vld [vmem:[#allocation7 + $0x3e8] sm:$0xff] }
 0x2a1   :  { %7297 = vmatpush1.bf16.msra.mxu0 %v9283_v61  ;;  %7502 = vmatpush1.bf16.msra.mxu1 %v9285_v6  ;;  %v3938_v61 = vld [vmem:[#allocation7 + $0x3a0] sm:$0xff]  ;;  %v3935_v6 = vld [vmem:[#allocation7 + $0x388] sm:$0xff] }
 0x2a2   :  { %7298 = vmatprep.subr.bf16.mxu0 %v9292_v7  ;;  %7503 = vmatprep.subr.bf16.mxu1 %v9294_v8  ;;  %v3939_v7 = vld [vmem:[#allocation7 + $0x3a8] sm:$0xff]  ;;  %v9315_v8 = vcombine.low %v3926_v43, %v3930_v45  ;;  %v9324_v10 = vcombine.high %v3934_v60, %v3938_v61 }
 0x2a3   :  { %v9326_v11 = vcombine.high %v3935_v6, %v3939_v7 }
 0x2a5   :  { %7299 = vmatpush1.bf16.msra.mxu0 %v9291_v15  ;;  %7504 = vmatpush1.bf16.msra.mxu1 %v9293_v16  ;;  %v3946_v15 = vld [vmem:[#allocation7 + $0x3e0] sm:$0xff]  ;;  %v3943_v16 = vld [vmem:[#allocation7 + $0x3c8] sm:$0xff] }
 0x2a6   :  { %7300 = vmatprep.subr.bf16.mxu0 %v9300_v28  ;;  %7505 = vmatprep.subr.bf16.mxu1 %v9302_v29  ;;  %v9323_v28 = vcombine.low %v3934_v60, %v3938_v61  ;;  %v9325_v29 = vcombine.low %v3935_v6, %v3939_v7  ;;  %v9332_v30 = vcombine.high %v3942_v14, %v3946_v15 }
 0x2a7   :  { %v9334_v31 = vcombine.high %v3943_v16, %v3947_v44  ;;  %v9331_v45 = vcombine.low %v3942_v14, %v3946_v15  ;;  %v9333_v50 = vcombine.low %v3943_v16, %v3947_v44  ;;  %v3750_v15 = vlaneseq }
 0x2a9   :  { %7301 = vmatpush1.bf16.msra.mxu0 %v9299_v36  ;;  %7506 = vmatpush1.bf16.msra.mxu1 %v9301_v38  ;;  %v11389_v16 = vshrl.u32 %v3750_v15, 7 }
 0x2aa   :  { %7302 = vmatprep.subr.bf16.mxu0 %v9308_v41  ;;  %7507 = vmatprep.subr.bf16.mxu1 %v9310_v42 }
 0x2ab   :  { %v11392_v44 = vsub.s32 0, %v11389_v16  ;;  %v3772_v53 = vsub.s32 5, %v11389_v16 }
 0x2ad   :  { %7303 = vmatpush1.bf16.msra.mxu0 %v9307_v56  ;;  %7508 = vmatpush1.bf16.msra.mxu1 %v9309_v57  ;;  %v9340_v57 = vcombine.high %v11361_v33, %v11363_v34 }
 0x2ae   :  { %7304 = vmatprep.subr.bf16.mxu0 %v9316_v58  ;;  %7509 = vmatprep.subr.bf16.mxu1 %v9318_v59  ;;  %v9342_v58 = vcombine.high %v11365_v35, %v11367_v37 }
 0x2b1   :  { %7305 = vmatpush1.bf16.msra.mxu0 %v9315_v8  ;;  %7510 = vmatpush1.bf16.msra.mxu1 %v9317_v9 }
 0x2b2   :  { %7306 = vmatprep.subr.bf16.mxu0 %v9324_v10  ;;  %7511 = vmatprep.subr.bf16.mxu1 %v9326_v11 }
 0x2b3   :  { %v3425_v32 = vpop.f32.mrb[20].mxu0  ;;  %v3466_v36 = vpop.f32.mrb[20].mxu1 }
 0x2b4   :  { %v3427_v38 = vpop.f32.mrb[21].mxu0  ;;  %v11373_v41 = vpop.f32.mrb[21].mxu1 }
 0x2b5   :  { %v3429_v42 = vpop.f32.mrb[22].mxu0  ;;  %v3470_v43 = vpop.f32.mrb[22].mxu1  ;;  %7307 = vmatpush1.bf16.msra.mxu0 %v9323_v28  ;;  %7512 = vmatpush1.bf16.msra.mxu1 %v9325_v29  ;;  %v11394_v28 = vld [vmem:[#allocation5] sm:$0xff]  ;;  %v11397_v29 = vsub.s32 1, %v11389_v16 }
 0x2b6   :  { %v3430_v51 = vpop.f32.mrb[23].mxu0  ;;  %v3471_v56 = vpop.f32.mrb[23].mxu1  ;;  %7308 = vmatprep.subr.bf16.mxu0 %v9332_v30  ;;  %7513 = vmatprep.subr.bf16.mxu1 %v9334_v31  ;;  %v3753_v30 = vrot.slane %v11394_v28, %v11392_v44 }
 0x2b7   :  { %v3757_v2 = vrot.slane %v11394_v28, %v11397_v29 }
 0x2b9   :  { %7309 = vmatpush1.bf16.msra.mxu0 %v9331_v45  ;;  %7514 = vmatpush1.bf16.msra.mxu1 %v9333_v50 }
 0x2ba   :  { %7319 = vmatprep.subr.bf16.mxu0 %v9340_v57  ;;  %7524 = vmatprep.subr.bf16.mxu1 %v9342_v58 }
 0x2e7   :  { %v11379_v59 = vpop.f32.mrb[24].mxu0  ;;  %v11381_v60 = vpop.f32.mrb[24].mxu1 }
 0x2e8   :  { %v11383_v61 = vpop.f32.mrb[25].mxu0  ;;  %v3550_v6 = vpop.f32.mrb[25].mxu1 }
 0x2e9   :  { %v3728_v7 = vmax.f32 %v11351_v13, %v3550_v6  ;;  %v3511_v8 = vpop.f32.mrb[26].mxu0  ;;  %v3552_v9 = vpop.f32.mrb[26].mxu1  ;;  %v3764_v13 = vsub.s32 3, %v11389_v16 }
 0x2ea   :  { %v3512_v10 = vpop.f32.mrb[27].mxu0  ;;  %v3553_v11 = vpop.f32.mrb[27].mxu1 }
 0x2eb   :  { %v3737_v14 = vmax.f32 %v3719_v4, %v3728_v7  ;;  %v3765_v43 = vrot.slane %v11394_v28, %v3764_v13 }
 0x2ed   :  { %v3795_v51 = vadd.f32 %v3753_v30, %v3737_v14 }
 0x2ef   :  { %v3804_v48 = vmax.f32 %v3795_v51, 0.0  ;;  %v3987_v51 = vld [vmem:[#allocation7 + $0x528] sm:$0xff] }
 0x2f1   :  { %v11424_v15 = vpack.c.bf16 %v3804_v48, %v3804_v48 }
 0x31b   :  { %v3589_v31 = vpop.f32.mrb[28].mxu0  ;;  %v3630_v42 = vpop.f32.mrb[28].mxu1 }
 0x31c   :  { %v3729_v46 = vmax.f32 %v11357_v18, %v3589_v31  ;;  %v3731_v4 = vmax.f32 %v3427_v38, %v3630_v42  ;;  %v3591_v45 = vpop.f32.mrb[29].mxu0  ;;  %v3632_v50 = vpop.f32.mrb[29].mxu1 }
 0x31d   :  { %v3730_v56 = vmax.f32 %v3425_v32, %v3591_v45  ;;  %v3732_v57 = vmax.f32 %v3466_v36, %v3632_v50  ;;  %v3593_v58 = vpop.f32.mrb[30].mxu0  ;;  %v3634_v6 = vpop.f32.mrb[30].mxu1  ;;  %v3979_v45 = vld [vmem:[#allocation7 + $0x4e8] sm:$0xff] }
 0x31e   :  { %v3738_v7 = vmax.f32 %v3720_v1, %v3729_v46  ;;  %v3740_v18 = vmax.f32 %v3722_v21, %v3731_v4  ;;  %v3594_v8 = vpop.f32.mrb[31].mxu0  ;;  %v3635_v9 = vpop.f32.mrb[31].mxu1  ;;  %v3958_v1 = vld [vmem:[#allocation7 + $0x440] sm:$0xff]  ;;  %v3963_v21 = vld [vmem:[#allocation7 + $0x468] sm:$0xff] }
 0x31f   :  { %v11415_v38 = vmax.f32 %v3721_v5, %v3730_v56  ;;  %v11420_v32 = vmax.f32 %v3723_v25, %v3732_v57  ;;  %v9348_v52 = vcombine.high %v3958_v1, %v3962_v49  ;;  %v9350_v3 = vcombine.high %v3959_v19, %v3963_v21  ;;  %v3970_v5 = vld [vmem:[#allocation7 + $0x4a0] sm:$0xff]  ;;  %v3971_v25 = vld [vmem:[#allocation7 + $0x4a8] sm:$0xff] }
 0x320   :  { %v3796_v36 = vadd.f32 %v3757_v2, %v3738_v7  ;;  %v3798_v10 = vadd.f32 %v3765_v43, %v3740_v18  ;;  %v9347_v30 = vcombine.low %v3958_v1, %v3962_v49  ;;  %v9349_v31 = vcombine.low %v3959_v19, %v3963_v21  ;;  %v3974_v2 = vld [vmem:[#allocation7 + $0x4c0] sm:$0xff]  ;;  %v3975_v43 = vld [vmem:[#allocation7 + $0x4c8] sm:$0xff] }
 0x321   :  { %v9356_v42 = vcombine.high %v3966_v47, %v3970_v5  ;;  %v9358_v46 = vcombine.high %v3967_v23, %v3971_v25  ;;  %v3978_v4 = vld [vmem:[#allocation7 + $0x4e0] sm:$0xff]  ;;  %v9355_v33 = vcombine.low %v3966_v47, %v3970_v5  ;;  %v9357_v34 = vcombine.low %v3967_v23, %v3971_v25  ;;  %v3983_v50 = vld [vmem:[#allocation7 + $0x508] sm:$0xff] }
 0x322   :  { %v3805_v0 = vmax.f32 %v3796_v36, 0.0  ;;  %v3807_v11 = vmax.f32 %v3798_v10, 0.0  ;;  %v9364_v35 = vcombine.high %v3974_v2, %v3978_v4  ;;  %v9366_v37 = vcombine.high %v3975_v43, %v3979_v45  ;;  %v3990_v7 = vld [vmem:[#allocation7 + $0x540] sm:$0xff]  ;;  %v3991_v8 = vld [vmem:[#allocation7 + $0x548] sm:$0xff] }
 0x323   :  { %v9363_v56 = vcombine.low %v3974_v2, %v3978_v4  ;;  %v9365_v57 = vcombine.low %v3975_v43, %v3979_v45  ;;  %v9374_v6 = vcombine.high %v3983_v50, %v3987_v51  ;;  %v3994_v18 = vld [vmem:[#allocation7 + $0x560] sm:$0xff]  ;;  %v3995_v9 = vld [vmem:[#allocation7 + $0x568] sm:$0xff]  ;;  %v9373_v10 = vcombine.low %v3983_v50, %v3987_v51 }
 0x324   :  { %v11422_v14 = vpack.c.bf16 %v3805_v0, %v3805_v0  ;;  %v11428_v13 = vpack.c.bf16 %v3807_v11, %v3807_v11  ;;  %v9380_v48 = vcombine.high %v3990_v7, %v3994_v18  ;;  %v9382_v0 = vcombine.high %v3991_v8, %v3995_v9  ;;  %v3998_v1 = vld [vmem:[#allocation7 + $0x580] sm:$0xff]  ;;  %v3999_v49 = vld [vmem:[#allocation7 + $0x588] sm:$0xff] }
 0x325   :  { %v4002_v11 = vld [vmem:[#allocation7 + $0x5a0] sm:$0xff]  ;;  %v4003_v19 = vld [vmem:[#allocation7 + $0x5a8] sm:$0xff]  ;;  %v9379_v21 = vcombine.low %v3990_v7, %v3994_v18  ;;  %v9381_v47 = vcombine.low %v3991_v8, %v3995_v9 }
 0x326   :  { %7310 = vmatprep.mubr.bf16.mxu0 %v11422_v14  ;;  %7515 = vmatprep.mubr.bf16.mxu1 %v11422_v14  ;;  %v4006_v5 = vld [vmem:[#allocation7 + $0x5c0] sm:$0xff]  ;;  %v4007_v25 = vld [vmem:[#allocation7 + $0x5c8] sm:$0xff] }
 0x327   :  { %7311 = vmatmul.mubr.bf16.vlgmr.msra.gmra.mrb[36].mxu0 %v11424_v15  ;;  %7516 = vmatmul.mubr.bf16.vlgmr.msra.gmra.mrb[36].mxu1 %v11424_v15  ;;  %v4010_v23 = vld [vmem:[#allocation7 + $0x5e0] sm:$0xff]  ;;  %v4015_v45 = vld [vmem:[#allocation7 + $0x608] sm:$0xff] }
 0x328   :  { %7320 = vmatpush1.bf16.msra.mxu0 %v9339_v39  ;;  %7525 = vmatpush1.bf16.msra.mxu1 %v9341_v40  ;;  %v3982_v39 = vld [vmem:[#allocation7 + $0x500] sm:$0xff]  ;;  %v4023_v51 = vld [vmem:[#allocation7 + $0x648] sm:$0xff] }
 0x329   :  { %7351 = vmatprep.mubr.bf16.mxu0 %v11428_v13  ;;  %7556 = vmatprep.mubr.bf16.mxu1 %v11428_v13  ;;  %v3986_v40 = vld [vmem:[#allocation7 + $0x520] sm:$0xff]  ;;  %v4031_v9 = vld [vmem:[#allocation7 + $0x688] sm:$0xff] }
 0x32a   :  { %7321 = vmatprep.subr.bf16.mxu0 %v9348_v52  ;;  %7526 = vmatprep.subr.bf16.mxu1 %v9350_v3  ;;  %v9372_v58 = vcombine.high %v3982_v39, %v3986_v40  ;;  %v9371_v36 = vcombine.low %v3982_v39, %v3986_v40  ;;  %v9388_v52 = vcombine.high %v3998_v1, %v4002_v11  ;;  %v4014_v4 = vld [vmem:[#allocation7 + $0x600] sm:$0xff] }
 0x32b   :  { %v9390_v3 = vcombine.high %v3999_v49, %v4003_v19  ;;  %v4018_v43 = vld [vmem:[#allocation7 + $0x620] sm:$0xff] }
 0x32c   :  { %7322 = vmatpush1.bf16.msra.mxu0 %v9347_v30  ;;  %7527 = vmatpush1.bf16.msra.mxu1 %v9349_v31  ;;  %v4011_v30 = vld [vmem:[#allocation7 + $0x5e8] sm:$0xff]  ;;  %v9387_v31 = vcombine.low %v3998_v1, %v4002_v11  ;;  %v4022_v40 = vld [vmem:[#allocation7 + $0x640] sm:$0xff] }
 0x32d   :  { %7323 = vmatprep.subr.bf16.mxu0 %v9356_v42  ;;  %7528 = vmatprep.subr.bf16.mxu1 %v9358_v46  ;;  %v9389_v42 = vcombine.low %v3999_v49, %v4003_v19  ;;  %v9396_v46 = vcombine.high %v4006_v5, %v4010_v23  ;;  %v9398_v2 = vcombine.high %v4007_v25, %v4011_v30  ;;  %v4026_v50 = vld [vmem:[#allocation7 + $0x660] sm:$0xff]  ;;  %v4039_v19 = vld [vmem:[#allocation7 + $0x6c8] sm:$0xff] }
 0x32e   :  { %v4030_v18 = vld [vmem:[#allocation7 + $0x680] sm:$0xff] }
 0x32f   :  { %v4034_v8 = vld [vmem:[#allocation7 + $0x6a0] sm:$0xff] }
 0x330   :  { %7324 = vmatpush1.bf16.msra.mxu0 %v9355_v33  ;;  %7529 = vmatpush1.bf16.msra.mxu1 %v9357_v34  ;;  %v4019_v33 = vld [vmem:[#allocation7 + $0x628] sm:$0xff]  ;;  %v9395_v34 = vcombine.low %v4006_v5, %v4010_v23  ;;  %v4038_v11 = vld [vmem:[#allocation7 + $0x6c0] sm:$0xff] }
 0x331   :  { %7325 = vmatprep.subr.bf16.mxu0 %v9364_v35  ;;  %7530 = vmatprep.subr.bf16.mxu1 %v9366_v37  ;;  %v9397_v35 = vcombine.low %v4007_v25, %v4011_v30  ;;  %v9404_v37 = vcombine.high %v4014_v4, %v4018_v43  ;;  %v9406_v39 = vcombine.high %v4015_v45, %v4019_v33  ;;  %v4042_v49 = vld [vmem:[#allocation7 + $0x6e0] sm:$0xff]  ;;  %v4047_v30 = vld [vmem:[#allocation7 + $0x708] sm:$0xff] }
 0x332   :  { %v4046_v23 = vld [vmem:[#allocation7 + $0x700] sm:$0xff] }
 0x333   :  { %v4050_v25 = vld [vmem:[#allocation7 + $0x720] sm:$0xff] }
 0x334   :  { %7326 = vmatpush1.bf16.msra.mxu0 %v9363_v56  ;;  %7531 = vmatpush1.bf16.msra.mxu1 %v9365_v57  ;;  %v4027_v56 = vld [vmem:[#allocation7 + $0x668] sm:$0xff]  ;;  %v9403_v57 = vcombine.low %v4014_v4, %v4018_v43  ;;  %v9435_v55 = vcombine.low %v4046_v23, %v4050_v25 }
 0x335   :  { %7327 = vmatprep.subr.bf16.mxu0 %v9372_v58  ;;  %7532 = vmatprep.subr.bf16.mxu1 %v9374_v6  ;;  %v9405_v58 = vcombine.low %v4015_v45, %v4019_v33  ;;  %v9412_v6 = vcombine.high %v4022_v40, %v4026_v50  ;;  %v9414_v7 = vcombine.high %v4023_v51, %v4027_v56 }
 0x338   :  { %7328 = vmatpush1.bf16.msra.mxu0 %v9371_v36  ;;  %7533 = vmatpush1.bf16.msra.mxu1 %v9373_v10  ;;  %v4035_v36 = vld [vmem:[#allocation7 + $0x6a8] sm:$0xff]  ;;  %v9411_v10 = vcombine.low %v4022_v40, %v4026_v50  ;;  %v4054_v50 = vld [vmem:[#allocation7 + $0x740] sm:$0xff] }
 0x339   :  { %7329 = vmatprep.subr.bf16.mxu0 %v9380_v48  ;;  %7534 = vmatprep.subr.bf16.mxu1 %v9382_v0  ;;  %v9413_v48 = vcombine.low %v4023_v51, %v4027_v56  ;;  %v9420_v0 = vcombine.high %v4030_v18, %v4034_v8  ;;  %v9422_v1 = vcombine.high %v4031_v9, %v4035_v36 }
 0x33c   :  { %7330 = vmatpush1.bf16.msra.mxu0 %v9379_v21  ;;  %7535 = vmatpush1.bf16.msra.mxu1 %v9381_v47  ;;  %v4043_v21 = vld [vmem:[#allocation7 + $0x6e8] sm:$0xff]  ;;  %v9419_v47 = vcombine.low %v4030_v18, %v4034_v8  ;;  %v4062_v18 = vld [vmem:[#allocation7 + $0x780] sm:$0xff] }
 0x33d   :  { %7331 = vmatprep.subr.bf16.mxu0 %v9388_v52  ;;  %7536 = vmatprep.subr.bf16.mxu1 %v9390_v3  ;;  %v9421_v52 = vcombine.low %v4031_v9, %v4035_v36  ;;  %v9428_v3 = vcombine.high %v4038_v11, %v4042_v49  ;;  %v9430_v5 = vcombine.high %v4039_v19, %v4043_v21  ;;  %v4067_v8 = vld [vmem:[#allocation7 + $0x7a8] sm:$0xff] }
 0x33e   :  { %v9429_v4 = vcombine.low %v4039_v19, %v4043_v21  ;;  %v9452_v9 = vcombine.high %v4062_v18, %v4066_v24 }
 0x340   :  { %7332 = vmatpush1.bf16.msra.mxu0 %v9387_v31  ;;  %7537 = vmatpush1.bf16.msra.mxu1 %v9389_v42  ;;  %v4051_v31 = vld [vmem:[#allocation7 + $0x728] sm:$0xff] }
 0x341   :  { %7333 = vmatprep.subr.bf16.mxu0 %v9396_v46  ;;  %7538 = vmatprep.subr.bf16.mxu1 %v9398_v2  ;;  %v9427_v2 = vcombine.low %v4038_v11, %v4042_v49  ;;  %v9438_v40 = vcombine.high %v4047_v30, %v4051_v31  ;;  %v9437_v20 = vcombine.low %v4047_v30, %v4051_v31  ;;  %v4075_v11 = vld [vmem:[#allocation7 + $0x7e8] sm:$0xff] }
 0x342   :  { %v9451_v49 = vcombine.low %v4062_v18, %v4066_v24  ;;  %v4083_v30 = vld [vmem:[#allocation7 + $0x828] sm:$0xff] }
 0x344   :  { %7334 = vmatpush1.bf16.msra.mxu0 %v9395_v34  ;;  %7539 = vmatpush1.bf16.msra.mxu1 %v9397_v35  ;;  %v9436_v35 = vcombine.high %v4046_v23, %v4050_v25  ;;  %v4082_v23 = vld [vmem:[#allocation7 + $0x820] sm:$0xff]  ;;  %v4079_v25 = vld [vmem:[#allocation7 + $0x808] sm:$0xff] }
 0x345   :  { %7335 = vmatprep.subr.bf16.mxu0 %v9404_v37  ;;  %7540 = vmatprep.subr.bf16.mxu1 %v9406_v39 }
 0x348   :  { %7336 = vmatpush1.bf16.msra.mxu0 %v9403_v57  ;;  %7541 = vmatpush1.bf16.msra.mxu1 %v9405_v58  ;;  %v4058_v57 = vld [vmem:[#allocation7 + $0x760] sm:$0xff]  ;;  %v4055_v58 = vld [vmem:[#allocation7 + $0x748] sm:$0xff] }
 0x349   :  { %7337 = vmatprep.subr.bf16.mxu0 %v9412_v6  ;;  %7542 = vmatprep.subr.bf16.mxu1 %v9414_v7  ;;  %v9444_v12 = vcombine.high %v4054_v50, %v4058_v57  ;;  %v9443_v63 = vcombine.low %v4054_v50, %v4058_v57  ;;  %v4095_v57 = vld [vmem:[#allocation7 + $0x888] sm:$0xff] }
 0x34c   :  { %7338 = vmatpush1.bf16.msra.mxu0 %v9411_v10  ;;  %7543 = vmatpush1.bf16.msra.mxu1 %v9413_v48  ;;  %v4070_v10 = vld [vmem:[#allocation7 + $0x7c0] sm:$0xff]  ;;  %v3773_v48 = vrot.slane %v11394_v28, %v3772_v53 }
 0x34d   :  { %7339 = vmatprep.subr.bf16.mxu0 %v9420_v0  ;;  %7544 = vmatprep.subr.bf16.mxu1 %v9422_v1  ;;  %v4074_v0 = vld [vmem:[#allocation7 + $0x7e0] sm:$0xff]  ;;  %v4071_v1 = vld [vmem:[#allocation7 + $0x7c8] sm:$0xff] }
 0x34e   :  { %v9459_v31 = vcombine.low %v4070_v10, %v4074_v0 }
 0x34f   :  { %v3671_v42 = vpop.f32.mrb[32].mxu0  ;;  %v3712_v46 = vpop.f32.mrb[32].mxu1 }
 0x350   :  { %v3733_v43 = vmax.f32 %v11373_v41, %v3671_v42  ;;  %v3735_v45 = vmax.f32 %v11383_v61, %v3712_v46  ;;  %7340 = vmatpush1.bf16.msra.mxu0 %v9419_v47  ;;  %7545 = vmatpush1.bf16.msra.mxu1 %v9421_v52  ;;  %v3673_v33 = vpop.f32.mrb[33].mxu0  ;;  %v3714_v34 = vpop.f32.mrb[33].mxu1  ;;  %v9460_v47 = vcombine.high %v4070_v10, %v4074_v0  ;;  %v4118_v0 = vld [vmem:[#allocation7 + $0x940] sm:$0xff] }
 0x351   :  { %v3734_v37 = vmax.f32 %v11379_v59, %v3673_v33  ;;  %v3736_v39 = vmax.f32 %v11381_v60, %v3714_v34  ;;  %7341 = vmatprep.subr.bf16.mxu0 %v9428_v3  ;;  %7546 = vmatprep.subr.bf16.mxu1 %v9430_v5  ;;  %v3675_v51 = vpop.f32.mrb[34].mxu0  ;;  %v3716_v56 = vpop.f32.mrb[34].mxu1  ;;  %v4059_v59 = vld [vmem:[#allocation7 + $0x768] sm:$0xff]  ;;  %v9462_v52 = vcombine.high %v4071_v1, %v4075_v11  ;;  %v4078_v3 = vld [vmem:[#allocation7 + $0x800] sm:$0xff] }
 0x352   :  { %v3742_v41 = vmax.f32 %v3724_v22, %v3733_v43  ;;  %v11450_v61 = vmax.f32 %v3726_v17, %v3735_v45  ;;  %v3676_v6 = vpop.f32.mrb[35].mxu0  ;;  %v3717_v60 = vpop.f32.mrb[35].mxu1  ;;  %v3760_v22 = vsub.s32 2, %v11389_v16  ;;  %v9446_v17 = vcombine.high %v4055_v58, %v4059_v59  ;;  %v4090_v45 = vld [vmem:[#allocation7 + $0x860] sm:$0xff]  ;;  %v4087_v33 = vld [vmem:[#allocation7 + $0x848] sm:$0xff] }
 0x353   :  { %v11455_v7 = vmax.f32 %v3725_v26, %v3734_v37  ;;  %v11460_v54 = vmax.f32 %v3727_v27, %v3736_v39  ;;  %v4063_v26 = vld [vmem:[#allocation7 + $0x788] sm:$0xff]  ;;  %v9445_v62 = vcombine.low %v4055_v58, %v4059_v59  ;;  %v9461_v42 = vcombine.low %v4071_v1, %v4075_v11  ;;  %v4094_v56 = vld [vmem:[#allocation7 + $0x880] sm:$0xff] }
 0x354   :  { %7342 = vmatpush1.bf16.msra.mxu0 %v9427_v2  ;;  %7547 = vmatpush1.bf16.msra.mxu1 %v9429_v4  ;;  %v3761_v27 = vrot.slane %v11394_v28, %v3760_v22  ;;  %v9454_v36 = vcombine.high %v4063_v26, %v4067_v8  ;;  %v9453_v19 = vcombine.low %v4063_v26, %v4067_v8  ;;  %v4091_v34 = vld [vmem:[#allocation7 + $0x868] sm:$0xff]  ;;  %v4106_v22 = vld [vmem:[#allocation7 + $0x8e0] sm:$0xff] }
 0x355   :  { %7343 = vmatprep.subr.bf16.mxu0 %v9436_v35  ;;  %7548 = vmatprep.subr.bf16.mxu1 %v9438_v40  ;;  %v3800_v5 = vadd.f32 %v3773_v48, %v3742_v41  ;;  %v9468_v2 = vcombine.high %v4078_v3, %v4082_v23  ;;  %v9470_v4 = vcombine.high %v4079_v25, %v4083_v30  ;;  %v4098_v41 = vld [vmem:[#allocation7 + $0x8a0] sm:$0xff]  ;;  %v4099_v58 = vld [vmem:[#allocation7 + $0x8a8] sm:$0xff] }
 0x356   :  { %v3797_v21 = vadd.f32 %v3761_v27, %v11415_v38  ;;  %v4086_v38 = vld [vmem:[#allocation7 + $0x840] sm:$0xff]  ;;  %v9467_v35 = vcombine.low %v4078_v3, %v4082_v23  ;;  %v9469_v39 = vcombine.low %v4079_v25, %v4083_v30  ;;  %v9478_v51 = vcombine.high %v4087_v33, %v4091_v34  ;;  %v4115_v27 = vld [vmem:[#allocation7 + $0x928] sm:$0xff] }
 0x357   :  { %v3809_v43 = vmax.f32 %v3800_v5, 0.0  ;;  %v9476_v50 = vcombine.high %v4086_v38, %v4090_v45  ;;  %v9475_v59 = vcombine.low %v4086_v38, %v4090_v45  ;;  %v9477_v6 = vcombine.low %v4087_v33, %v4091_v34  ;;  %v4110_v8 = vld [vmem:[#allocation7 + $0x900] sm:$0xff]  ;;  %v4119_v11 = vld [vmem:[#allocation7 + $0x948] sm:$0xff] }
 0x358   :  { %7344 = vmatpush1.bf16.msra.mxu0 %v9435_v55  ;;  %7549 = vmatpush1.bf16.msra.mxu1 %v9437_v20  ;;  %v3806_v46 = vmax.f32 %v3797_v21, 0.0  ;;  %v9484_v60 = vcombine.high %v4094_v56, %v4098_v41  ;;  %v9486_v55 = vcombine.high %v4095_v57, %v4099_v58  ;;  %v4102_v20 = vld [vmem:[#allocation7 + $0x8c0] sm:$0xff]  ;;  %v9483_v18 = vcombine.low %v4094_v56, %v4098_v41  ;;  %v4127_v23 = vld [vmem:[#allocation7 + $0x988] sm:$0xff] }
 0x359   :  { %7345 = vmatprep.subr.bf16.mxu0 %v9444_v12  ;;  %7550 = vmatprep.subr.bf16.mxu1 %v9446_v17  ;;  %v11469_v40 = vpack.c.bf16 %v3809_v43, %v3809_v43  ;;  %v4103_v12 = vld [vmem:[#allocation7 + $0x8c8] sm:$0xff]  ;;  %v9485_v53 = vcombine.low %v4095_v57, %v4099_v58  ;;  %v9492_v24 = vcombine.high %v4102_v20, %v4106_v22  ;;  %v4122_v1 = vld [vmem:[#allocation7 + $0x960] sm:$0xff] }
 0x35a   :  { %v11467_v37 = vpack.c.bf16 %v3806_v46, %v3806_v46  ;;  %v4107_v17 = vld [vmem:[#allocation7 + $0x8e8] sm:$0xff]  ;;  %v4126_v3 = vld [vmem:[#allocation7 + $0x980] sm:$0xff]  ;;  %v9507_v30 = vcombine.low %v4118_v0, %v4122_v1 }
 0x35b   :  { %v9494_v26 = vcombine.high %v4103_v12, %v4107_v17  ;;  %v4130_v5 = vld [vmem:[#allocation7 + $0x9a0] sm:$0xff]  ;;  %v4131_v25 = vld [vmem:[#allocation7 + $0x9a8] sm:$0xff] }
 0x35c   :  { %7346 = vmatpush1.bf16.msra.mxu0 %v9443_v63  ;;  %7551 = vmatpush1.bf16.msra.mxu1 %v9445_v62  ;;  %v4114_v63 = vld [vmem:[#allocation7 + $0x920] sm:$0xff]  ;;  %v4111_v62 = vld [vmem:[#allocation7 + $0x908] sm:$0xff]  ;;  %v9518_v46 = vcombine.high %v4127_v23, %v4131_v25  ;;  %v9515_v45 = vcombine.low %v4126_v3, %v4130_v5  ;;  %v9517_v33 = vcombine.low %v4127_v23, %v4131_v25 }
 0x35d   :  { %7347 = vmatprep.subr.bf16.mxu0 %v9452_v9  ;;  %7552 = vmatprep.subr.bf16.mxu1 %v9454_v36  ;;  %v9491_v9 = vcombine.low %v4102_v20, %v4106_v22  ;;  %v9493_v36 = vcombine.low %v4103_v12, %v4107_v17  ;;  %v9500_v10 = vcombine.high %v4110_v8, %v4114_v63  ;;  %v4135_v43 = vld [vmem:[#allocation7 + $0x9c8] sm:$0xff] }
 0x35e   :  { %v9502_v48 = vcombine.high %v4111_v62, %v4115_v27  ;;  %v9501_v21 = vcombine.low %v4111_v62, %v4115_v27  ;;  %v4139_v38 = vld [vmem:[#allocation7 + $0x9e8] sm:$0xff] }
 0x35f   :  { %v4147_v56 = vld [vmem:[#allocation7 + $0xa28] sm:$0xff]  ;;  %v9525_v57 = vcombine.low %v4135_v43, %v4139_v38 }
 0x360   :  { %7348 = vmatpush1.bf16.msra.mxu0 %v9451_v49  ;;  %7553 = vmatpush1.bf16.msra.mxu1 %v9453_v19  ;;  %v4123_v49 = vld [vmem:[#allocation7 + $0x968] sm:$0xff]  ;;  %v9499_v19 = vcombine.low %v4110_v8, %v4114_v63 }
 0x361   :  { %7349 = vmatprep.subr.bf16.mxu0 %v9460_v47  ;;  %7554 = vmatprep.subr.bf16.mxu1 %v9462_v52  ;;  %v9508_v47 = vcombine.high %v4118_v0, %v4122_v1  ;;  %v9510_v52 = vcombine.high %v4119_v11, %v4123_v49  ;;  %v4155_v20 = vld [vmem:[#allocation7 + $0xa68] sm:$0xff] }
 0x362   :  { %v4163_v8 = vld [vmem:[#allocation7 + $0xaa8] sm:$0xff] }
 0x363   :  { %v4171_v0 = vld [vmem:[#allocation7 + $0xae8] sm:$0xff] }
 0x364   :  { %7350 = vmatpush1.bf16.msra.mxu0 %v9459_v31  ;;  %7555 = vmatpush1.bf16.msra.mxu1 %v9461_v42  ;;  %v9509_v31 = vcombine.low %v4119_v11, %v4123_v49  ;;  %v9516_v42 = vcombine.high %v4126_v3, %v4130_v5  ;;  %v4179_v3 = vld [vmem:[#allocation7 + $0xb28] sm:$0xff] }
 0x365   :  { %7360 = vmatprep.subr.bf16.mxu0 %v9468_v2  ;;  %7565 = vmatprep.subr.bf16.mxu1 %v9470_v4  ;;  %v4134_v2 = vld [vmem:[#allocation7 + $0x9c0] sm:$0xff] }
 0x366   :  { %v4138_v4 = vld [vmem:[#allocation7 + $0x9e0] sm:$0xff] }
 0x367   :  { %7352 = vmatmul.mubr.bf16.vlgmr.msra.gmra.mrb[36].mxu0 %v11467_v37  ;;  %7557 = vmatmul.mubr.bf16.vlgmr.msra.gmra.mrb[36].mxu1 %v11467_v37  ;;  %v9524_v34 = vcombine.high %v4134_v2, %v4138_v4  ;;  %v9523_v41 = vcombine.low %v4134_v2, %v4138_v4  ;;  %v4187_v2 = vld [vmem:[#allocation7 + $0xb68] sm:$0xff] }
 0x368   :  { %7361 = vmatpush1.bf16.msra.mxu0 %v9467_v35  ;;  %7392 = vmatprep.mubr.bf16.mxu0 %v11469_v40  ;;  %v9526_v35 = vcombine.high %v4135_v43, %v4139_v38  ;;  %v3768_v43 = vsub.s32 4, %v11389_v16 }
 0x369   :  { %7566 = vmatpush1.bf16.msra.mxu1 %v9469_v39  ;;  %7597 = vmatprep.mubr.bf16.mxu1 %v11469_v40  ;;  %v4142_v39 = vld [vmem:[#allocation7 + $0xa00] sm:$0xff] }
 0x36a   :  { %7362 = vmatprep.subr.bf16.mxu0 %v9476_v50  ;;  %7567 = vmatprep.subr.bf16.mxu1 %v9478_v51  ;;  %v4146_v50 = vld [vmem:[#allocation7 + $0xa20] sm:$0xff]  ;;  %v4143_v51 = vld [vmem:[#allocation7 + $0xa08] sm:$0xff] }
 0x36b   :  { %v9532_v58 = vcombine.high %v4142_v39, %v4146_v50  ;;  %v9531_v22 = vcombine.low %v4142_v39, %v4146_v50  ;;  %v9533_v12 = vcombine.low %v4143_v51, %v4147_v56  ;;  %v3780_v39 = vsub.s32 7, %v11389_v16  ;;  %v4191_v50 = vld [vmem:[#allocation7 + $0xb88] sm:$0xff] }
 0x36c   :  { %7363 = vmatpush1.bf16.msra.mxu0 %v9475_v59  ;;  %v9534_v59 = vcombine.high %v4143_v51, %v4147_v56  ;;  %v4195_v51 = vld [vmem:[#allocation7 + $0xba8] sm:$0xff] }
 0x36d   :  { %7568 = vmatpush1.bf16.msra.mxu1 %v9477_v6  ;;  %7364 = vmatprep.subr.bf16.mxu0 %v9484_v60  ;;  %v4150_v6 = vld [vmem:[#allocation7 + $0xa40] sm:$0xff] }
 0x36e   :  { %7569 = vmatprep.subr.bf16.mxu1 %v9486_v55  ;;  %v4154_v60 = vld [vmem:[#allocation7 + $0xa60] sm:$0xff]  ;;  %v4151_v55 = vld [vmem:[#allocation7 + $0xa48] sm:$0xff] }
 0x36f   :  { %v9540_v17 = vcombine.high %v4150_v6, %v4154_v60  ;;  %v9539_v63 = vcombine.low %v4150_v6, %v4154_v60  ;;  %v9541_v62 = vcombine.low %v4151_v55, %v4155_v20  ;;  %v4198_v6 = vld [vmem:[#allocation7 + $0xbc0] sm:$0xff] }
 0x370   :  { %7365 = vmatpush1.bf16.msra.mxu0 %v9483_v18  ;;  %v9542_v18 = vcombine.high %v4151_v55, %v4155_v20  ;;  %v4202_v60 = vld [vmem:[#allocation7 + $0xbe0] sm:$0xff]  ;;  %v3781_v55 = vrot.slane %v11394_v28, %v3780_v39  ;;  %v4199_v20 = vld [vmem:[#allocation7 + $0xbc8] sm:$0xff] }
 0x371   :  { %7570 = vmatpush1.bf16.msra.mxu1 %v9485_v53  ;;  %7366 = vmatprep.subr.bf16.mxu0 %v9492_v24  ;;  %v4158_v53 = vld [vmem:[#allocation7 + $0xa80] sm:$0xff] }
 0x372   :  { %7571 = vmatprep.subr.bf16.mxu1 %v9494_v26  ;;  %v4162_v24 = vld [vmem:[#allocation7 + $0xaa0] sm:$0xff]  ;;  %v4159_v26 = vld [vmem:[#allocation7 + $0xa88] sm:$0xff] }
 0x373   :  { %v9548_v27 = vcombine.high %v4158_v53, %v4162_v24  ;;  %v9547_v1 = vcombine.low %v4158_v53, %v4162_v24  ;;  %v9549_v11 = vcombine.low %v4159_v26, %v4163_v8  ;;  %v9588_v53 = vcombine.high %v4198_v6, %v4202_v60 }
 0x374   :  { %7367 = vmatpush1.bf16.msra.mxu0 %v9491_v9  ;;  %v9550_v9 = vcombine.high %v4159_v26, %v4163_v8  ;;  %v4206_v26 = vld [vmem:[#allocation7 + $0xc00] sm:$0xff] }
 0x375   :  { %7572 = vmatpush1.bf16.msra.mxu1 %v9493_v36  ;;  %7368 = vmatprep.subr.bf16.mxu0 %v9500_v10  ;;  %v4166_v36 = vld [vmem:[#allocation7 + $0xac0] sm:$0xff] }
 0x376   :  { %7573 = vmatprep.subr.bf16.mxu1 %v9502_v48  ;;  %v4170_v10 = vld [vmem:[#allocation7 + $0xae0] sm:$0xff]  ;;  %v4167_v48 = vld [vmem:[#allocation7 + $0xac8] sm:$0xff] }
 0x377   :  { %v9556_v49 = vcombine.high %v4166_v36, %v4170_v10  ;;  %v9555_v5 = vcombine.low %v4166_v36, %v4170_v10  ;;  %v9557_v23 = vcombine.low %v4167_v48, %v4171_v0  ;;  %v4210_v8 = vld [vmem:[#allocation7 + $0xc20] sm:$0xff] }
 0x378   :  { %7369 = vmatpush1.bf16.msra.mxu0 %v9499_v19  ;;  %v9558_v19 = vcombine.high %v4167_v48, %v4171_v0  ;;  %v9596_v10 = vcombine.high %v4206_v26, %v4210_v8  ;;  %v4214_v0 = vld [vmem:[#allocation7 + $0xc40] sm:$0xff] }
 0x379   :  { %7574 = vmatpush1.bf16.msra.mxu1 %v9501_v21  ;;  %7370 = vmatprep.subr.bf16.mxu0 %v9508_v47  ;;  %v4174_v21 = vld [vmem:[#allocation7 + $0xb00] sm:$0xff] }
 0x37a   :  { %7575 = vmatprep.subr.bf16.mxu1 %v9510_v52  ;;  %v4178_v47 = vld [vmem:[#allocation7 + $0xb20] sm:$0xff]  ;;  %v4175_v52 = vld [vmem:[#allocation7 + $0xb08] sm:$0xff] }
 0x37b   :  { %v9564_v25 = vcombine.high %v4174_v21, %v4178_v47  ;;  %v9563_v4 = vcombine.low %v4174_v21, %v4178_v47  ;;  %v9565_v38 = vcombine.low %v4175_v52, %v4179_v3 }
 0x37c   :  { %7371 = vmatpush1.bf16.msra.mxu0 %v9507_v30  ;;  %v9566_v30 = vcombine.high %v4175_v52, %v4179_v3  ;;  %v4222_v52 = vld [vmem:[#allocation7 + $0xc80] sm:$0xff] }
 0x37d   :  { %7576 = vmatpush1.bf16.msra.mxu1 %v9509_v31  ;;  %7372 = vmatprep.subr.bf16.mxu0 %v9516_v42  ;;  %v4182_v31 = vld [vmem:[#allocation7 + $0xb40] sm:$0xff] }
 0x37e   :  { %7577 = vmatprep.subr.bf16.mxu1 %v9518_v46  ;;  %v4186_v42 = vld [vmem:[#allocation7 + $0xb60] sm:$0xff]  ;;  %v4183_v46 = vld [vmem:[#allocation7 + $0xb48] sm:$0xff] }
 0x37f   :  { %v9571_v56 = vcombine.low %v4182_v31, %v4186_v42  ;;  %v4226_v3 = vld [vmem:[#allocation7 + $0xca0] sm:$0xff] }
 0x380   :  { %7373 = vmatpush1.bf16.msra.mxu0 %v9515_v45  ;;  %v9572_v45 = vcombine.high %v4182_v31, %v4186_v42 }
 0x381   :  { %7578 = vmatpush1.bf16.msra.mxu1 %v9517_v33  ;;  %7374 = vmatprep.subr.bf16.mxu0 %v9524_v34  ;;  %v9574_v33 = vcombine.high %v4183_v46, %v4187_v2  ;;  %v4190_v34 = vld [vmem:[#allocation7 + $0xb80] sm:$0xff] }
 0x382   :  { %7579 = vmatprep.subr.bf16.mxu1 %v9526_v35  ;;  %v4194_v35 = vld [vmem:[#allocation7 + $0xba0] sm:$0xff] }
 0x384   :  { %7375 = vmatpush1.bf16.msra.mxu0 %v9523_v41  ;;  %v3769_v41 = vrot.slane %v11394_v28, %v3768_v43  ;;  %v9587_v28 = vcombine.low %v4198_v6, %v4202_v60  ;;  %v4234_v43 = vld [vmem:[#allocation7 + $0xce0] sm:$0xff] }
 0x385   :  { %7580 = vmatpush1.bf16.msra.mxu1 %v9525_v57  ;;  %7376 = vmatprep.subr.bf16.mxu0 %v9532_v58  ;;  %v9573_v57 = vcombine.low %v4183_v46, %v4187_v2  ;;  %v9580_v58 = vcombine.high %v4190_v34, %v4194_v35  ;;  %v9612_v46 = vcombine.high %v4222_v52, %v4226_v3  ;;  %v4246_v60 = vld [vmem:[#allocation7 + $0xd40] sm:$0xff] }
 0x386   :  { %7581 = vmatprep.subr.bf16.mxu1 %v9534_v59  ;;  %v9582_v59 = vcombine.high %v4191_v50, %v4195_v51 }
 0x388   :  { %7377 = vmatpush1.bf16.msra.mxu0 %v9531_v22  ;;  %v4203_v22 = vld [vmem:[#allocation7 + $0xbe8] sm:$0xff] }
 0x389   :  { %7582 = vmatpush1.bf16.msra.mxu1 %v9533_v12  ;;  %7378 = vmatprep.subr.bf16.mxu0 %v9540_v17  ;;  %v9579_v12 = vcombine.low %v4190_v34, %v4194_v35  ;;  %v3799_v17 = vadd.f32 %v3769_v41, %v11420_v32  ;;  %v9590_v24 = vcombine.high %v4199_v20, %v4203_v22  ;;  %v4243_v41 = vld [vmem:[#allocation7 + $0xd28] sm:$0xff] }
 0x38a   :  { %7583 = vmatprep.subr.bf16.mxu1 %v9542_v18  ;;  %v9581_v18 = vcombine.low %v4191_v50, %v4195_v51  ;;  %v9589_v36 = vcombine.low %v4199_v20, %v4203_v22  ;;  %v4238_v50 = vld [vmem:[#allocation7 + $0xd00] sm:$0xff]  ;;  %v4247_v20 = vld [vmem:[#allocation7 + $0xd48] sm:$0xff] }
 0x38b   :  { %v4242_v51 = vld [vmem:[#allocation7 + $0xd20] sm:$0xff]  ;;  %v4251_v22 = vld [vmem:[#allocation7 + $0xd68] sm:$0xff] }
 0x38c   :  { %7379 = vmatpush1.bf16.msra.mxu0 %v9539_v63  ;;  %v3802_v63 = vadd.f32 %v3781_v55, %v11450_v61  ;;  %v4250_v55 = vld [vmem:[#allocation7 + $0xd60] sm:$0xff] }
 0x38d   :  { %7584 = vmatpush1.bf16.msra.mxu1 %v9541_v62  ;;  %7380 = vmatprep.subr.bf16.mxu0 %v9548_v27  ;;  %v4207_v62 = vld [vmem:[#allocation7 + $0xc08] sm:$0xff] }
 0x38e   :  { %7585 = vmatprep.subr.bf16.mxu1 %v9550_v9  ;;  %v4211_v27 = vld [vmem:[#allocation7 + $0xc28] sm:$0xff]  ;;  %v3808_v9 = vmax.f32 %v3799_v17, 0.0  ;;  %v3811_v48 = vmax.f32 %v3802_v63, 0.0 }
 0x38f   :  { %v9598_v32 = vcombine.high %v4207_v62, %v4211_v27  ;;  %v9597_v61 = vcombine.low %v4207_v62, %v4211_v27  ;;  %v4259_v63 = vld [vmem:[#allocation7 + $0xda8] sm:$0xff]  ;;  %v9635_v62 = vcombine.low %v4246_v60, %v4250_v55  ;;  %v9637_v27 = vcombine.low %v4247_v20, %v4251_v22 }
 0x390   :  { %7381 = vmatpush1.bf16.msra.mxu0 %v9547_v1  ;;  %v4218_v1 = vld [vmem:[#allocation7 + $0xc60] sm:$0xff]  ;;  %v11481_v21 = vpack.c.bf16 %v3808_v9, %v3808_v9 }
 0x391   :  { %7586 = vmatpush1.bf16.msra.mxu1 %v9549_v11  ;;  %7382 = vmatprep.subr.bf16.mxu0 %v9556_v49  ;;  %v9595_v11 = vcombine.low %v4206_v26, %v4210_v8  ;;  %v4215_v49 = vld [vmem:[#allocation7 + $0xc48] sm:$0xff]  ;;  %v9604_v47 = vcombine.high %v4214_v0, %v4218_v1  ;;  %v9603_v31 = vcombine.low %v4214_v0, %v4218_v1  ;;  %v4258_v26 = vld [vmem:[#allocation7 + $0xda0] sm:$0xff] }
 0x392   :  { %7587 = vmatprep.subr.bf16.mxu1 %v9558_v19  ;;  %v4219_v19 = vld [vmem:[#allocation7 + $0xc68] sm:$0xff] }
 0x393   :  { %v9605_v42 = vcombine.low %v4215_v49, %v4219_v19  ;;  %v4255_v8 = vld [vmem:[#allocation7 + $0xd88] sm:$0xff] }
 0x394   :  { %7383 = vmatpush1.bf16.msra.mxu0 %v9555_v5  ;;  %v11483_v5 = vpack.c.bf16 %v3811_v48, %v3811_v48  ;;  %v9646_v9 = vcombine.high %v4255_v8, %v4259_v63  ;;  %v4267_v48 = vld [vmem:[#allocation7 + $0xde8] sm:$0xff]  ;;  %v9645_v1 = vcombine.low %v4255_v8, %v4259_v63 }
 0x395   :  { %7588 = vmatpush1.bf16.msra.mxu1 %v9557_v23  ;;  %7384 = vmatprep.subr.bf16.mxu0 %v9564_v25  ;;  %v9606_v23 = vcombine.high %v4215_v49, %v4219_v19  ;;  %v4223_v25 = vld [vmem:[#allocation7 + $0xc88] sm:$0xff]  ;;  %v4270_v19 = vld [vmem:[#allocation7 + $0xe00] sm:$0xff] }
 0x396   :  { %7589 = vmatprep.subr.bf16.mxu1 %v9566_v30  ;;  %v4227_v30 = vld [vmem:[#allocation7 + $0xca8] sm:$0xff] }
 0x397   :  { %v9614_v2 = vcombine.high %v4223_v25, %v4227_v30  ;;  %v9613_v34 = vcombine.low %v4223_v25, %v4227_v30 }
 0x398   :  { %7385 = vmatpush1.bf16.msra.mxu0 %v9563_v4  ;;  %v4230_v4 = vld [vmem:[#allocation7 + $0xcc0] sm:$0xff] }
 0x399   :  { %7590 = vmatpush1.bf16.msra.mxu1 %v9565_v38  ;;  %7386 = vmatprep.subr.bf16.mxu0 %v9572_v45  ;;  %v4231_v38 = vld [vmem:[#allocation7 + $0xcc8] sm:$0xff]  ;;  %v9620_v35 = vcombine.high %v4230_v4, %v4234_v43 }
 0x39a   :  { %7591 = vmatprep.subr.bf16.mxu1 %v9574_v33  ;;  %v4235_v45 = vld [vmem:[#allocation7 + $0xce8] sm:$0xff]  ;;  %v9611_v33 = vcombine.low %v4222_v52, %v4226_v3 }
 0x39b   :  { %v9622_v39 = vcombine.high %v4231_v38, %v4235_v45  ;;  %v4275_v52 = vld [vmem:[#allocation7 + $0xe28] sm:$0xff] }
 0x39c   :  { %7387 = vmatpush1.bf16.msra.mxu0 %v9571_v56  ;;  %v4239_v56 = vld [vmem:[#allocation7 + $0xd08] sm:$0xff] }
 0x39d   :  { %7592 = vmatpush1.bf16.msra.mxu1 %v9573_v57  ;;  %7388 = vmatprep.subr.bf16.mxu0 %v9580_v58  ;;  %v9619_v57 = vcombine.low %v4230_v4, %v4234_v43  ;;  %v9621_v58 = vcombine.low %v4231_v38, %v4235_v45  ;;  %v9630_v6 = vcombine.high %v4239_v56, %v4243_v41 }
 0x39e   :  { %7593 = vmatprep.subr.bf16.mxu1 %v9582_v59  ;;  %v9628_v59 = vcombine.high %v4238_v50, %v4242_v51  ;;  %v9629_v17 = vcombine.low %v4239_v56, %v4243_v41 }
 0x3a0   :  { %7389 = vmatpush1.bf16.msra.mxu0 %v9579_v12  ;;  %v9627_v12 = vcombine.low %v4238_v50, %v4242_v51 }
 0x3a1   :  { %7594 = vmatpush1.bf16.msra.mxu1 %v9581_v18  ;;  %7390 = vmatprep.subr.bf16.mxu0 %v9588_v53  ;;  %v9636_v18 = vcombine.high %v4246_v60, %v4250_v55  ;;  %v9638_v53 = vcombine.high %v4247_v20, %v4251_v22 }
 0x3a2   :  { %7595 = vmatprep.subr.bf16.mxu1 %v9590_v24  ;;  %v4254_v24 = vld [vmem:[#allocation7 + $0xd80] sm:$0xff] }
 0x3a3   :  { %v9643_v0 = vcombine.low %v4254_v24, %v4258_v26 }
 0x3a4   :  { %7391 = vmatpush1.bf16.msra.mxu0 %v9587_v28  ;;  %v9644_v28 = vcombine.high %v4254_v24, %v4258_v26 }
 0x3a5   :  { %7596 = vmatpush1.bf16.msra.mxu1 %v9589_v36  ;;  %7401 = vmatprep.subr.bf16.mxu0 %v9596_v10  ;;  %v4262_v36 = vld [vmem:[#allocation7 + $0xdc0] sm:$0xff] }
 0x3a6   :  { %7606 = vmatprep.subr.bf16.mxu1 %v9598_v32  ;;  %v4266_v10 = vld [vmem:[#allocation7 + $0xde0] sm:$0xff]  ;;  %v4263_v32 = vld [vmem:[#allocation7 + $0xdc8] sm:$0xff] }
 0x3a7   :  { %7393 = vmatmul.mubr.bf16.vlgmr.msra.gmra.mrb[36].mxu0 %v11481_v21  ;;  %v9654_v49 = vcombine.high %v4263_v32, %v4267_v48  ;;  %v9651_v3 = vcombine.low %v4262_v36, %v4266_v10 }
 0x3a8   :  { %7598 = vmatmul.mubr.bf16.vlgmr.msra.gmra.mrb[36].mxu1 %v11481_v21  ;;  %7402 = vmatpush1.bf16.msra.mxu0 %v9595_v11  ;;  %v9652_v11 = vcombine.high %v4262_v36, %v4266_v10  ;;  %v3776_v10 = vsub.s32 6, %v11389_v16 }
 0x3a9   :  { %7433 = vmatprep.mubr.bf16.mxu0 %v11483_v5  ;;  %7607 = vmatpush1.bf16.msra.mxu1 %v9597_v61  ;;  %v4274_v61 = vld [vmem:[#allocation7 + $0xe20] sm:$0xff] }
 0x3aa   :  { %7638 = vmatprep.mubr.bf16.mxu1 %v11483_v5  ;;  %7403 = vmatprep.subr.bf16.mxu0 %v9604_v47  ;;  %v4271_v47 = vld [vmem:[#allocation7 + $0xe08] sm:$0xff]  ;;  %v9660_v25 = vcombine.high %v4270_v19, %v4274_v61  ;;  %v9659_v4 = vcombine.low %v4270_v19, %v4274_v61 }
 0x3ab   :  { %7608 = vmatprep.subr.bf16.mxu1 %v9606_v23  ;;  %v9653_v23 = vcombine.low %v4263_v32, %v4267_v48  ;;  %v9662_v30 = vcombine.high %v4271_v47, %v4275_v52  ;;  %v9661_v43 = vcombine.low %v4271_v47, %v4275_v52  ;;  %v4323_v19 = vld [vmem:[#allocation7 + $0xfa8] sm:$0xff]  ;;  %v10775_v47 = vld [vmem:[#allocation5] sm:$0xff] }
 0x3ac   :  { %7404 = vmatpush1.bf16.msra.mxu0 %v9603_v31  ;;  %v4278_v31 = vld [vmem:[#allocation7 + $0xe40] sm:$0xff]  ;;  %v3777_v52 = vrot.slane %v10775_v47, %v3776_v10  ;;  %v4363_v10 = vld [vmem:[#allocation7 + $0x10e8] sm:$0xff] }
 0x3ad   :  { %7609 = vmatpush1.bf16.msra.mxu1 %v9605_v42  ;;  %7405 = vmatprep.subr.bf16.mxu0 %v9612_v46  ;;  %v4282_v42 = vld [vmem:[#allocation7 + $0xe60] sm:$0xff]  ;;  %v4279_v46 = vld [vmem:[#allocation7 + $0xe48] sm:$0xff] }
 0x3ae   :  { %7610 = vmatprep.subr.bf16.mxu1 %v9614_v2  ;;  %v4283_v2 = vld [vmem:[#allocation7 + $0xe68] sm:$0xff]  ;;  %v9668_v38 = vcombine.high %v4278_v31, %v4282_v42  ;;  %v9667_v50 = vcombine.low %v4278_v31, %v4282_v42  ;;  %v4330_v31 = vld [vmem:[#allocation7 + $0xfe0] sm:$0xff] }
 0x3af   :  { %v9670_v45 = vcombine.high %v4279_v46, %v4283_v2  ;;  %v9669_v51 = vcombine.low %v4279_v46, %v4283_v2  ;;  %v4327_v42 = vld [vmem:[#allocation7 + $0xfc8] sm:$0xff] }
 0x3b0   :  { %7406 = vmatpush1.bf16.msra.mxu0 %v9611_v33  ;;  %v4286_v33 = vld [vmem:[#allocation7 + $0xe80] sm:$0xff]  ;;  %v4331_v46 = vld [vmem:[#allocation7 + $0xfe8] sm:$0xff] }
 0x3b1   :  { %7611 = vmatpush1.bf16.msra.mxu1 %v9613_v34  ;;  %7407 = vmatprep.subr.bf16.mxu0 %v9620_v35  ;;  %v4290_v34 = vld [vmem:[#allocation7 + $0xea0] sm:$0xff]  ;;  %v4287_v35 = vld [vmem:[#allocation7 + $0xe88] sm:$0xff] }
 0x3b2   :  { %7612 = vmatprep.subr.bf16.mxu1 %v9622_v39  ;;  %v4291_v39 = vld [vmem:[#allocation7 + $0xea8] sm:$0xff]  ;;  %v9676_v56 = vcombine.high %v4286_v33, %v4290_v34  ;;  %v9675_v60 = vcombine.low %v4286_v33, %v4290_v34  ;;  %v4334_v33 = vld [vmem:[#allocation7 + $0x1000] sm:$0xff] }
 0x3b3   :  { %v9678_v41 = vcombine.high %v4287_v35, %v4291_v39  ;;  %v9677_v55 = vcombine.low %v4287_v35, %v4291_v39  ;;  %v4338_v34 = vld [vmem:[#allocation7 + $0x1020] sm:$0xff]  ;;  %v4335_v35 = vld [vmem:[#allocation7 + $0x1008] sm:$0xff] }
 0x3b4   :  { %7408 = vmatpush1.bf16.msra.mxu0 %v9619_v57  ;;  %v4294_v57 = vld [vmem:[#allocation7 + $0xec0] sm:$0xff]  ;;  %v4339_v39 = vld [vmem:[#allocation7 + $0x1028] sm:$0xff] }
 0x3b5   :  { %7613 = vmatpush1.bf16.msra.mxu1 %v9621_v58  ;;  %7409 = vmatprep.subr.bf16.mxu0 %v9628_v59  ;;  %v4298_v58 = vld [vmem:[#allocation7 + $0xee0] sm:$0xff]  ;;  %v4295_v59 = vld [vmem:[#allocation7 + $0xec8] sm:$0xff] }
 0x3b6   :  { %7614 = vmatprep.subr.bf16.mxu1 %v9630_v6  ;;  %v4299_v6 = vld [vmem:[#allocation7 + $0xee8] sm:$0xff]  ;;  %v9684_v20 = vcombine.high %v4294_v57, %v4298_v58  ;;  %v9683_v24 = vcombine.low %v4294_v57, %v4298_v58  ;;  %v9726_v57 = vcombine.high %v4335_v35, %v4339_v39  ;;  %v4346_v58 = vld [vmem:[#allocation7 + $0x1060] sm:$0xff] }
 0x3b7   :  { %v9686_v22 = vcombine.high %v4295_v59, %v4299_v6  ;;  %v9685_v26 = vcombine.low %v4295_v59, %v4299_v6  ;;  %v4343_v59 = vld [vmem:[#allocation7 + $0x1048] sm:$0xff] }
 0x3b8   :  { %7410 = vmatpush1.bf16.msra.mxu0 %v9627_v12  ;;  %v4302_v12 = vld [vmem:[#allocation7 + $0xf00] sm:$0xff]  ;;  %v4347_v6 = vld [vmem:[#allocation7 + $0x1068] sm:$0xff] }
 0x3b9   :  { %7615 = vmatpush1.bf16.msra.mxu1 %v9629_v17  ;;  %7411 = vmatprep.subr.bf16.mxu0 %v9636_v18  ;;  %v4306_v17 = vld [vmem:[#allocation7 + $0xf20] sm:$0xff]  ;;  %v4303_v18 = vld [vmem:[#allocation7 + $0xf08] sm:$0xff] }
 0x3ba   :  { %7616 = vmatprep.subr.bf16.mxu1 %v9638_v53  ;;  %v4307_v53 = vld [vmem:[#allocation7 + $0xf28] sm:$0xff]  ;;  %v9692_v8 = vcombine.high %v4302_v12, %v4306_v17  ;;  %v9691_v36 = vcombine.low %v4302_v12, %v4306_v17  ;;  %v9734_v12 = vcombine.high %v4343_v59, %v4347_v6  ;;  %v4350_v17 = vld [vmem:[#allocation7 + $0x1080] sm:$0xff] }
 0x3bb   :  { %v9694_v63 = vcombine.high %v4303_v18, %v4307_v53  ;;  %v9693_v32 = vcombine.low %v4303_v18, %v4307_v53  ;;  %v4354_v18 = vld [vmem:[#allocation7 + $0x10a0] sm:$0xff]  ;;  %v4351_v53 = vld [vmem:[#allocation7 + $0x1088] sm:$0xff] }
 0x3bc   :  { %7412 = vmatpush1.bf16.msra.mxu0 %v9635_v62  ;;  %v4310_v62 = vld [vmem:[#allocation7 + $0xf40] sm:$0xff] }
 0x3bd   :  { %7617 = vmatpush1.bf16.msra.mxu1 %v9637_v27  ;;  %7413 = vmatprep.subr.bf16.mxu0 %v9644_v28  ;;  %v4314_v27 = vld [vmem:[#allocation7 + $0xf60] sm:$0xff]  ;;  %v4311_v28 = vld [vmem:[#allocation7 + $0xf48] sm:$0xff] }
 0x3be   :  { %7618 = vmatprep.subr.bf16.mxu1 %v9646_v9  ;;  %v4315_v9 = vld [vmem:[#allocation7 + $0xf68] sm:$0xff]  ;;  %v9700_v48 = vcombine.high %v4310_v62, %v4314_v27  ;;  %v9699_v61 = vcombine.low %v4310_v62, %v4314_v27  ;;  %v4358_v27 = vld [vmem:[#allocation7 + $0x10c0] sm:$0xff] }
 0x3c0   :  { %7414 = vmatpush1.bf16.msra.mxu0 %v9643_v0  ;;  %v9702_v0 = vcombine.high %v4311_v28, %v4315_v9 }
 0x3c1   :  { %7619 = vmatpush1.bf16.msra.mxu1 %v9645_v1  ;;  %7415 = vmatprep.subr.bf16.mxu0 %v9652_v11  ;;  %v4318_v1 = vld [vmem:[#allocation7 + $0xf80] sm:$0xff] }
 0x3c2   :  { %7620 = vmatprep.subr.bf16.mxu1 %v9654_v49  ;;  %v4322_v11 = vld [vmem:[#allocation7 + $0xfa0] sm:$0xff]  ;;  %v4319_v49 = vld [vmem:[#allocation7 + $0xf88] sm:$0xff] }
 0x3c3   :  { %v9707_v2 = vcombine.low %v4318_v1, %v4322_v11 }
 0x3c4   :  { %7416 = vmatpush1.bf16.msra.mxu0 %v9651_v3  ;;  %v9701_v3 = vcombine.low %v4311_v28, %v4315_v9  ;;  %v4362_v28 = vld [vmem:[#allocation7 + $0x10e0] sm:$0xff]  ;;  %v10999_v9 = vmov 0  }
 0x3c5   :  { %7621 = vmatpush1.bf16.msra.mxu1 %v9653_v23  ;;  %7417 = vmatprep.subr.bf16.mxu0 %v9660_v25  ;;  %v9708_v23 = vcombine.high %v4318_v1, %v4322_v11  ;;  %v9710_v25 = vcombine.high %v4319_v49, %v4323_v19  ;;  %v4366_v11 = vld [vmem:[#allocation7 + $0x1100] sm:$0xff]  ;;  %v9747_v47 = vcombine.low %v4358_v27, %v4362_v28 }
 0x3c6   :  { %7622 = vmatprep.subr.bf16.mxu1 %v9662_v30  ;;  %v4326_v30 = vld [vmem:[#allocation7 + $0xfc0] sm:$0xff] }
 0x3c8   :  { %7418 = vmatpush1.bf16.msra.mxu0 %v9659_v4  ;;  %v3801_v4 = vadd.f32 %v3777_v52, %v11455_v7  ;;  %v4342_v7 = vld [vmem:[#allocation7 + $0x1040] sm:$0xff] }
 0x3c9   :  { %7623 = vmatpush1.bf16.msra.mxu1 %v9661_v43  ;;  %7419 = vmatprep.subr.bf16.mxu0 %v9668_v38  ;;  %v9709_v43 = vcombine.low %v4319_v49, %v4323_v19  ;;  %v9716_v38 = vcombine.high %v4326_v30, %v4330_v31  ;;  %v4370_v49 = vld [vmem:[#allocation7 + $0x1120] sm:$0xff]  ;;  %v4367_v19 = vld [vmem:[#allocation7 + $0x1108] sm:$0xff] }
 0x3ca   :  { %7624 = vmatprep.subr.bf16.mxu1 %v9670_v45  ;;  %v9718_v45 = vcombine.high %v4327_v42, %v4331_v46 }
 0x3cc   :  { %7420 = vmatpush1.bf16.msra.mxu0 %v9667_v50  ;;  %v9715_v50 = vcombine.low %v4326_v30, %v4330_v31  ;;  %v4378_v30 = vld [vmem:[#allocation7 + $0x1160] sm:$0xff]  ;;  %v4375_v31 = vld [vmem:[#allocation7 + $0x1148] sm:$0xff] }
 0x3cd   :  { %7625 = vmatpush1.bf16.msra.mxu1 %v9669_v51  ;;  %7421 = vmatprep.subr.bf16.mxu0 %v9676_v56  ;;  %v3810_v51 = vmax.f32 %v3801_v4, 0.0  ;;  %v9717_v56 = vcombine.low %v4327_v42, %v4331_v46  ;;  %v4379_v42 = vld [vmem:[#allocation7 + $0x1168] sm:$0xff]  ;;  %v9755_v46 = vcombine.low %v4366_v11, %v4370_v49 }
 0x3ce   :  { %7626 = vmatprep.subr.bf16.mxu1 %v9678_v41  ;;  %v9724_v41 = vcombine.high %v4334_v33, %v4338_v34 }
 0x3d0   :  { %7422 = vmatpush1.bf16.msra.mxu0 %v9675_v60  ;;  %v9723_v60 = vcombine.low %v4334_v33, %v4338_v34  ;;  %v4383_v33 = vld [vmem:[#allocation7 + $0x1188] sm:$0xff] }
 0x3d1   :  { %7627 = vmatpush1.bf16.msra.mxu1 %v9677_v55  ;;  %7423 = vmatprep.subr.bf16.mxu0 %v9684_v20  ;;  %v11491_v55 = vpack.c.bf16 %v3810_v51, %v3810_v51  ;;  %v9725_v20 = vcombine.low %v4335_v35, %v4339_v39  ;;  %v4387_v34 = vld [vmem:[#allocation7 + $0x11a8] sm:$0xff]  ;;  %v9765_v39 = vcombine.low %v4375_v31, %v4379_v42  ;;  %v9210_v51 = vld [vmem:[#allocation5 + $0x8] ss:$0 sm:$0xff] }
 0x3d2   :  { %7628 = vmatprep.subr.bf16.mxu1 %v9686_v22  ;;  %v9732_v22 = vcombine.high %v4342_v7, %v4346_v58 }
 0x3d4   :  { %7424 = vmatpush1.bf16.msra.mxu0 %v9683_v24  ;;  %v4355_v24 = vld [vmem:[#allocation7 + $0x10a8] sm:$0xff] }
 0x3d5   :  { %7629 = vmatpush1.bf16.msra.mxu1 %v9685_v26  ;;  %7425 = vmatprep.subr.bf16.mxu0 %v9692_v8  ;;  %v9731_v26 = vcombine.low %v4342_v7, %v4346_v58  ;;  %v9733_v8 = vcombine.low %v4343_v59, %v4347_v6  ;;  %v9742_v62 = vcombine.high %v4351_v53, %v4355_v24  ;;  %v4391_v7 = vld [vmem:[#allocation7 + $0x11c8] sm:$0xff] }
 0x3d6   :  { %7630 = vmatprep.subr.bf16.mxu1 %v9694_v63  ;;  %v9740_v63 = vcombine.high %v4350_v17, %v4354_v18  ;;  %v4395_v58 = vld [vmem:[#allocation7 + $0x11e8] sm:$0xff]  ;;  %v3803_v6 = vadd.f32 %v9210_v51, %v11460_v54  ;;  %v3832_v54 = vld [vmem:[#allocation7 + $0x50] sm:$0xff] }
 0x3d7   :  { %v3864_v51 = vld [vmem:[#allocation7 + $0x150] sm:$0xff] }
 0x3d8   :  { %7426 = vmatpush1.bf16.msra.mxu0 %v9691_v36  ;;  %v4359_v36 = vld [vmem:[#allocation7 + $0x10c8] sm:$0xff] }
 0x3d9   :  { %7631 = vmatpush1.bf16.msra.mxu1 %v9693_v32  ;;  %7427 = vmatprep.subr.bf16.mxu0 %v9700_v48  ;;  %v9739_v32 = vcombine.low %v4350_v17, %v4354_v18  ;;  %v9741_v48 = vcombine.low %v4351_v53, %v4355_v24  ;;  %v9750_v1 = vcombine.high %v4359_v36, %v4363_v10  ;;  %v3828_v17 = vld [vmem:[#allocation7 + $0x30] sm:$0xff]  ;;  %v3825_v18 = vld [vmem:[#allocation7 + $0x18] sm:$0xff] }
 0x3da   :  { %7632 = vmatprep.subr.bf16.mxu1 %v9702_v0  ;;  %v9748_v0 = vcombine.high %v4358_v27, %v4362_v28  ;;  %v9749_v52 = vcombine.low %v4359_v36, %v4363_v10  ;;  %v3829_v53 = vld [vmem:[#allocation7 + $0x38] sm:$0xff]  ;;  %v3836_v27 = vld [vmem:[#allocation7 + $0x70] sm:$0xff] }
 0x3db   :  { %v3833_v36 = vld [vmem:[#allocation7 + $0x58] sm:$0xff] }
 0x3dc   :  { %7428 = vmatpush1.bf16.msra.mxu0 %v9699_v61  ;;  %v4371_v61 = vld [vmem:[#allocation7 + $0x1128] sm:$0xff]  ;;  %v3837_v10 = vld [vmem:[#allocation7 + $0x78] sm:$0xff] }
 0x3dd   :  { %7633 = vmatpush1.bf16.msra.mxu1 %v9701_v3  ;;  %7429 = vmatprep.subr.bf16.mxu0 %v9708_v23  ;;  %v9756_v3 = vcombine.high %v4366_v11, %v4370_v49  ;;  %v9758_v23 = vcombine.high %v4367_v19, %v4371_v61  ;;  %v3844_v11 = vld [vmem:[#allocation7 + $0xb0] sm:$0xff]  ;;  %v9226_v49 = vcombine.high %v3833_v36, %v3837_v10 }
 0x3de   :  { %7634 = vmatprep.subr.bf16.mxu1 %v9710_v25  ;;  %v4374_v25 = vld [vmem:[#allocation7 + $0x1140] sm:$0xff] }
 0x3df   :  { %v9764_v4 = vcombine.high %v4374_v25, %v4378_v30  ;;  %v9763_v35 = vcombine.low %v4374_v25, %v4378_v30  ;;  %v3848_v25 = vld [vmem:[#allocation7 + $0xd0] sm:$0xff] }
 0x3e0   :  { %7430 = vmatpush1.bf16.msra.mxu0 %v9707_v2  ;;  %v9757_v2 = vcombine.low %v4367_v19, %v4371_v61  ;;  %v3841_v19 = vld [vmem:[#allocation7 + $0x98] sm:$0xff]  ;;  %v3852_v30 = vld [vmem:[#allocation7 + $0xf0] sm:$0xff] }
 0x3e1   :  { %7635 = vmatpush1.bf16.msra.mxu1 %v9709_v43  ;;  %7431 = vmatprep.subr.bf16.mxu0 %v9716_v38  ;;  %v9766_v43 = vcombine.high %v4375_v31, %v4379_v42  ;;  %v4382_v38 = vld [vmem:[#allocation7 + $0x1180] sm:$0xff]  ;;  %v3845_v61 = vld [vmem:[#allocation7 + $0xb8] sm:$0xff] }
 0x3e2   :  { %7636 = vmatprep.subr.bf16.mxu1 %v9718_v45  ;;  %v4386_v45 = vld [vmem:[#allocation7 + $0x11a0] sm:$0xff]  ;;  %v3849_v31 = vld [vmem:[#allocation7 + $0xd8] sm:$0xff] }
 0x3e3   :  { %v9771_v59 = vcombine.low %v4382_v38, %v4386_v45  ;;  %v3853_v42 = vld [vmem:[#allocation7 + $0xf8] sm:$0xff] }
 0x3e4   :  { %7432 = vmatpush1.bf16.msra.mxu0 %v9715_v50  ;;  %v9772_v50 = vcombine.high %v4382_v38, %v4386_v45  ;;  %v3856_v38 = vld [vmem:[#allocation7 + $0x110] sm:$0xff] }
 0x3e5   :  { %7637 = vmatpush1.bf16.msra.mxu1 %v9717_v56  ;;  %7442 = vmatprep.subr.bf16.mxu0 %v9724_v41  ;;  %v9774_v56 = vcombine.high %v4383_v33, %v4387_v34  ;;  %v4390_v41 = vld [vmem:[#allocation7 + $0x11c0] sm:$0xff]  ;;  %v3860_v45 = vld [vmem:[#allocation7 + $0x130] sm:$0xff] }
 0x3e6   :  { %7647 = vmatprep.subr.bf16.mxu1 %v9726_v57  ;;  %v4394_v57 = vld [vmem:[#allocation7 + $0x11e0] sm:$0xff] }
 0x3e7   :  { %7434 = vmatmul.mubr.bf16.vlgmr.msra.gmra.mrb[36].mxu0 %v11491_v55  ;;  %v9779_v24 = vcombine.low %v4390_v41, %v4394_v57 }
 0x3e8   :  { %7639 = vmatmul.mubr.bf16.vlgmr.msra.gmra.mrb[36].mxu1 %v11491_v55  ;;  %7443 = vmatpush1.bf16.msra.mxu0 %v9723_v60  ;;  %v9773_v60 = vcombine.low %v4383_v33, %v4387_v34  ;;  %v3857_v33 = vld [vmem:[#allocation7 + $0x118] sm:$0xff] }
 0x3e9   :  { %7648 = vmatpush1.bf16.msra.mxu1 %v9725_v20  ;;  %7444 = vmatprep.subr.bf16.mxu0 %v9732_v22  ;;  %v9780_v20 = vcombine.high %v4390_v41, %v4394_v57  ;;  %v9782_v22 = vcombine.high %v4391_v7, %v4395_v58  ;;  %v3861_v34 = vld [vmem:[#allocation7 + $0x138] sm:$0xff] }
 0x3ea   :  { %7649 = vmatprep.subr.bf16.mxu1 %v9734_v12  ;;  %7474 = vmatprep.mubr.bf16.mxu0 %v10999_v9  ;;  %v3824_v12 = vld [vmem:[#allocation7 + $0x10] sm:$0xff]  ;;  %v3865_v41 = vld [vmem:[#allocation7 + $0x158] sm:$0xff] }
 0x3eb   :  { %7679 = vmatprep.mubr.bf16.mxu1 %v10999_v9  ;;  %v9215_v28 = vcombine.low %v3824_v12, %v3828_v17  ;;  %v3869_v57 = vld [vmem:[#allocation7 + $0x178] sm:$0xff] }
 0x3ec   :  { %7445 = vmatpush1.bf16.msra.mxu0 %v9731_v26  ;;  %v3812_v26 = vmax.f32 %v3803_v6, 0.0  ;;  %v9258_v6 = vcombine.high %v3865_v41, %v3869_v57 }
 0x3ed   :  { %7650 = vmatpush1.bf16.msra.mxu1 %v9733_v8  ;;  %7446 = vmatprep.subr.bf16.mxu0 %v9740_v63  ;;  %v9781_v8 = vcombine.low %v4391_v7, %v4395_v58  ;;  %v9216_v63 = vcombine.high %v3824_v12, %v3828_v17  ;;  %v9247_v7 = vcombine.low %v3856_v38, %v3860_v45  ;;  %v3877_v12 = vld [vmem:[#allocation7 + $0x1b8] sm:$0xff] }
 0x3ee   :  { %7651 = vmatprep.subr.bf16.mxu1 %v9742_v62  ;;  %v9218_v62 = vcombine.high %v3825_v18, %v3829_v53  ;;  %v9249_v58 = vcombine.low %v3857_v33, %v3861_v34 }
 0x3f0   :  { %7447 = vmatpush1.bf16.msra.mxu0 %v9739_v32  ;;  %v11498_v32 = vpack.c.bf16 %v3812_v26, %v3812_v26  ;;  %v3880_v26 = vld [vmem:[#allocation7 + $0x1d0] sm:$0xff] }
 0x3f1   :  { %7652 = vmatpush1.bf16.msra.mxu1 %v9741_v48  ;;  %7448 = vmatprep.subr.bf16.mxu0 %v9748_v0  ;;  %v9217_v48 = vcombine.low %v3825_v18, %v3829_v53  ;;  %v9224_v0 = vcombine.high %v3832_v54, %v3836_v27  ;;  %v9257_v18 = vcombine.low %v3865_v41, %v3869_v57 }
 0x3f2   :  { %7653 = vmatprep.subr.bf16.mxu1 %v9750_v1  ;;  %v3840_v1 = vld [vmem:[#allocation7 + $0x90] sm:$0xff] }
 0x3f4   :  { %7449 = vmatpush1.bf16.msra.mxu0 %v9747_v47  ;;  %v9223_v47 = vcombine.low %v3832_v54, %v3836_v27 }
 0x3f5   :  { %7654 = vmatpush1.bf16.msra.mxu1 %v9749_v52  ;;  %7450 = vmatprep.subr.bf16.mxu0 %v9756_v3  ;;  %v9225_v52 = vcombine.low %v3833_v36, %v3837_v10  ;;  %v9232_v3 = vcombine.high %v3840_v1, %v3844_v11  ;;  %v3888_v10 = vld [vmem:[#allocation7 + $0x210] sm:$0xff] }
 0x3f6   :  { %7655 = vmatprep.subr.bf16.mxu1 %v9758_v23  ;;  %v9234_v23 = vcombine.high %v3841_v19, %v3845_v61 }
 0x3f8   :  { %7451 = vmatpush1.bf16.msra.mxu0 %v9755_v46  ;;  %v9231_v46 = vcombine.low %v3840_v1, %v3844_v11  ;;  %v3893_v1 = vld [vmem:[#allocation7 + $0x238] sm:$0xff] }
 0x3f9   :  { %7656 = vmatpush1.bf16.msra.mxu1 %v9757_v2  ;;  %7452 = vmatprep.subr.bf16.mxu0 %v9764_v4  ;;  %v9233_v2 = vcombine.low %v3841_v19, %v3845_v61  ;;  %v9240_v4 = vcombine.high %v3848_v25, %v3852_v30 }
 0x3fa   :  { %7657 = vmatprep.subr.bf16.mxu1 %v9766_v43  ;;  %v9242_v43 = vcombine.high %v3849_v31, %v3853_v42 }
 0x3fc   :  { %7453 = vmatpush1.bf16.msra.mxu0 %v9763_v35  ;;  %v9241_v35 = vcombine.low %v3849_v31, %v3853_v42 }
 0x3fd   :  { %7658 = vmatpush1.bf16.msra.mxu1 %v9765_v39  ;;  %7454 = vmatprep.subr.bf16.mxu0 %v9772_v50  ;;  %v9248_v39 = vcombine.high %v3856_v38, %v3860_v45  ;;  %v9250_v50 = vcombine.high %v3857_v33, %v3861_v34 }
 0x3fe   :  { %7659 = vmatprep.subr.bf16.mxu1 %v9774_v56  ;;  %v3868_v56 = vld [vmem:[#allocation7 + $0x170] sm:$0xff] }
 0x3ff   :  { %v9255_v17 = vcombine.low %v3864_v51, %v3868_v56 }
 0x400   :  { %7455 = vmatpush1.bf16.msra.mxu0 %v9771_v59  ;;  %v9256_v59 = vcombine.high %v3864_v51, %v3868_v56 }
 0x401   :  { %7660 = vmatpush1.bf16.msra.mxu1 %v9773_v60  ;;  %7456 = vmatprep.subr.bf16.mxu0 %v9780_v20  ;;  %v3872_v60 = vld [vmem:[#allocation7 + $0x190] sm:$0xff] }
 0x402   :  { %7661 = vmatprep.subr.bf16.mxu1 %v9782_v22  ;;  %v3876_v20 = vld [vmem:[#allocation7 + $0x1b0] sm:$0xff]  ;;  %v3873_v22 = vld [vmem:[#allocation7 + $0x198] sm:$0xff] }
 0x403   :  { %v9264_v53 = vcombine.high %v3872_v60, %v3876_v20  ;;  %v9263_v54 = vcombine.low %v3872_v60, %v3876_v20  ;;  %v9265_v27 = vcombine.low %v3873_v22, %v3877_v12 }
 0x404   :  { %7457 = vmatpush1.bf16.msra.mxu0 %v9779_v24  ;;  %v9266_v24 = vcombine.high %v3873_v22, %v3877_v12 }
 0x405   :  { %7662 = vmatpush1.bf16.msra.mxu1 %v9781_v8  ;;  %7688 = vmatprep.subr.bf16.mxu0 %v9216_v63  ;;  %v3884_v8 = vld [vmem:[#allocation7 + $0x1f0] sm:$0xff]  ;;  %v3881_v63 = vld [vmem:[#allocation7 + $0x1d8] sm:$0xff] }
 0x406   :  { %7893 = vmatprep.subr.bf16.mxu1 %v9218_v62  ;;  %v3885_v62 = vld [vmem:[#allocation7 + $0x1f8] sm:$0xff]  ;;  %v9271_v11 = vcombine.low %v3880_v26, %v3884_v8 }
 0x407   :  { %7475 = vmatmul.mubr.bf16.vlgmr.msra.gmra.mrb[36].mxu0 %v11498_v32  ;;  %v9274_v36 = vcombine.high %v3881_v63, %v3885_v62 }
 0x408   :  { %7680 = vmatmul.mubr.bf16.vlgmr.msra.gmra.mrb[36].mxu1 %v11498_v32  ;;  %7689 = vmatpush1.bf16.msra.mxu0 %v9215_v28  ;;  %v9272_v28 = vcombine.high %v3880_v26, %v3884_v8 }
 0x409   :  { %7720 = vmatprep.mubr.bf16.mxu0 %v11422_v14  ;;  %7894 = vmatpush1.bf16.msra.mxu1 %v9217_v48  ;;  %v3892_v48 = vld [vmem:[#allocation7 + $0x230] sm:$0xff] }
 0x40a   :  { %7925 = vmatprep.mubr.bf16.mxu1 %v11422_v14  ;;  %7690 = vmatprep.subr.bf16.mxu0 %v9224_v0  ;;  %v9239_v14 = vcombine.low %v3848_v25, %v3852_v30  ;;  %v3889_v0 = vld [vmem:[#allocation7 + $0x218] sm:$0xff]  ;;  %v9280_v19 = vcombine.high %v3888_v10, %v3892_v48  ;;  %v9279_v25 = vcombine.low %v3888_v10, %v3892_v48 }
 0x40b   :  { %7895 = vmatprep.subr.bf16.mxu1 %v9226_v49  ;;  %v9273_v49 = vcombine.low %v3881_v63, %v3885_v62  ;;  %v9282_v61 = vcombine.high %v3889_v0, %v3893_v1  ;;  %v9281_v30 = vcombine.low %v3889_v0, %v3893_v1 }
 0x40c   :  { %7691 = vmatpush1.bf16.msra.mxu0 %v9223_v47  ;;  %v3896_v47 = vld [vmem:[#allocation7 + $0x250] sm:$0xff] }
 0x40d   :  { %7896 = vmatpush1.bf16.msra.mxu1 %v9225_v52  ;;  %7692 = vmatprep.subr.bf16.mxu0 %v9232_v3  ;;  %v3900_v52 = vld [vmem:[#allocation7 + $0x270] sm:$0xff]  ;;  %v3897_v3 = vld [vmem:[#allocation7 + $0x258] sm:$0xff] }
 0x40e   :  { %7897 = vmatprep.subr.bf16.mxu1 %v9234_v23  ;;  %v3901_v23 = vld [vmem:[#allocation7 + $0x278] sm:$0xff]  ;;  %v9288_v31 = vcombine.high %v3896_v47, %v3900_v52  ;;  %v9287_v38 = vcombine.low %v3896_v47, %v3900_v52 }
 0x40f   :  { %v9290_v42 = vcombine.high %v3897_v3, %v3901_v23  ;;  %v9289_v45 = vcombine.low %v3897_v3, %v3901_v23 }
 0x410   :  { %7693 = vmatpush1.bf16.msra.mxu0 %v9231_v46  ;;  %v3904_v46 = vld [vmem:[#allocation7 + $0x290] sm:$0xff] }
 0x411   :  { %7898 = vmatpush1.bf16.msra.mxu1 %v9233_v2  ;;  %7694 = vmatprep.subr.bf16.mxu0 %v9240_v4  ;;  %v3908_v2 = vld [vmem:[#allocation7 + $0x2b0] sm:$0xff]  ;;  %v3905_v4 = vld [vmem:[#allocation7 + $0x298] sm:$0xff] }
 0x412   :  { %7899 = vmatprep.subr.bf16.mxu1 %v9242_v43  ;;  %v3909_v43 = vld [vmem:[#allocation7 + $0x2b8] sm:$0xff]  ;;  %v9296_v33 = vcombine.high %v3904_v46, %v3908_v2  ;;  %v9295_v51 = vcombine.low %v3904_v46, %v3908_v2 }
 0x413   :  { %v9298_v34 = vcombine.high %v3905_v4, %v3909_v43  ;;  %v9297_v56 = vcombine.low %v3905_v4, %v3909_v43 }
 0x414   :  { %7695 = vmatpush1.bf16.msra.mxu0 %v9239_v14  ;;  %v3912_v14 = vld [vmem:[#allocation7 + $0x2d0] sm:$0xff] }
 0x415   :  { %7900 = vmatpush1.bf16.msra.mxu1 %v9241_v35  ;;  %7696 = vmatprep.subr.bf16.mxu0 %v9248_v39  ;;  %v3916_v35 = vld [vmem:[#allocation7 + $0x2f0] sm:$0xff]  ;;  %v3913_v39 = vld [vmem:[#allocation7 + $0x2d8] sm:$0xff] }
 0x416   :  { %7901 = vmatprep.subr.bf16.mxu1 %v9250_v50  ;;  %v3917_v50 = vld [vmem:[#allocation7 + $0x2f8] sm:$0xff]  ;;  %v9304_v41 = vcombine.high %v3912_v14, %v3916_v35  ;;  %v9303_v60 = vcombine.low %v3912_v14, %v3916_v35 }
 0x417   :  { %v9306_v57 = vcombine.high %v3913_v39, %v3917_v50  ;;  %v9305_v20 = vcombine.low %v3913_v39, %v3917_v50  ;;  %v3965_v14 = vld [vmem:[#allocation7 + $0x478] sm:$0xff]  ;;  %v3968_v50 = vld [vmem:[#allocation7 + $0x490] sm:$0xff] }
 0x418   :  { %7697 = vmatpush1.bf16.msra.mxu0 %v9247_v7  ;;  %v3920_v7 = vld [vmem:[#allocation7 + $0x310] sm:$0xff] }
 0x419   :  { %7902 = vmatpush1.bf16.msra.mxu1 %v9249_v58  ;;  %7698 = vmatprep.subr.bf16.mxu0 %v9256_v59  ;;  %v3924_v58 = vld [vmem:[#allocation7 + $0x330] sm:$0xff]  ;;  %v3921_v59 = vld [vmem:[#allocation7 + $0x318] sm:$0xff] }
 0x41a   :  { %7903 = vmatprep.subr.bf16.mxu1 %v9258_v6  ;;  %v3925_v6 = vld [vmem:[#allocation7 + $0x338] sm:$0xff]  ;;  %v9312_v22 = vcombine.high %v3920_v7, %v3924_v58  ;;  %v9311_v26 = vcombine.low %v3920_v7, %v3924_v58 }
 0x41b   :  { %v9314_v12 = vcombine.high %v3921_v59, %v3925_v6  ;;  %v9313_v8 = vcombine.low %v3921_v59, %v3925_v6 }
 0x41c   :  { %7699 = vmatpush1.bf16.msra.mxu0 %v9255_v17  ;;  %v3928_v17 = vld [vmem:[#allocation7 + $0x350] sm:$0xff] }
 0x41d   :  { %7904 = vmatpush1.bf16.msra.mxu1 %v9257_v18  ;;  %7700 = vmatprep.subr.bf16.mxu0 %v9264_v53  ;;  %v3932_v18 = vld [vmem:[#allocation7 + $0x370] sm:$0xff]  ;;  %v3929_v53 = vld [vmem:[#allocation7 + $0x358] sm:$0xff] }
 0x41e   :  { %7905 = vmatprep.subr.bf16.mxu1 %v9266_v24  ;;  %v3933_v24 = vld [vmem:[#allocation7 + $0x378] sm:$0xff]  ;;  %v9320_v63 = vcombine.high %v3928_v17, %v3932_v18  ;;  %v9319_v10 = vcombine.low %v3928_v17, %v3932_v18 }
 0x41f   :  { %v9322_v62 = vcombine.high %v3929_v53, %v3933_v24  ;;  %v9321_v48 = vcombine.low %v3929_v53, %v3933_v24  ;;  %v3984_v24 = vld [vmem:[#allocation7 + $0x510] sm:$0xff] }
 0x420   :  { %7701 = vmatpush1.bf16.msra.mxu0 %v9263_v54  ;;  %v3936_v54 = vld [vmem:[#allocation7 + $0x390] sm:$0xff] }
 0x421   :  { %7906 = vmatpush1.bf16.msra.mxu1 %v9265_v27  ;;  %7702 = vmatprep.subr.bf16.mxu0 %v9272_v28  ;;  %v3940_v27 = vld [vmem:[#allocation7 + $0x3b0] sm:$0xff]  ;;  %v3937_v28 = vld [vmem:[#allocation7 + $0x398] sm:$0xff] }
 0x422   :  { %7907 = vmatprep.subr.bf16.mxu1 %v9274_v36  ;;  %v3941_v36 = vld [vmem:[#allocation7 + $0x3b8] sm:$0xff]  ;;  %v9328_v0 = vcombine.high %v3936_v54, %v3940_v27  ;;  %v9327_v47 = vcombine.low %v3936_v54, %v3940_v27 }
 0x423   :  { %v9330_v1 = vcombine.high %v3937_v28, %v3941_v36  ;;  %v9329_v52 = vcombine.low %v3937_v28, %v3941_v36  ;;  %v3992_v28 = vld [vmem:[#allocation7 + $0x550] sm:$0xff] }
 0x424   :  { %7703 = vmatpush1.bf16.msra.mxu0 %v9271_v11  ;;  %v3944_v11 = vld [vmem:[#allocation7 + $0x3d0] sm:$0xff] }
 0x425   :  { %7908 = vmatpush1.bf16.msra.mxu1 %v9273_v49  ;;  %7704 = vmatprep.subr.bf16.mxu0 %v9280_v19  ;;  %v3948_v49 = vld [vmem:[#allocation7 + $0x3f0] sm:$0xff]  ;;  %v3945_v19 = vld [vmem:[#allocation7 + $0x3d8] sm:$0xff] }
 0x426   :  { %7909 = vmatprep.subr.bf16.mxu1 %v9282_v61  ;;  %v3949_v61 = vld [vmem:[#allocation7 + $0x3f8] sm:$0xff]  ;;  %v9336_v3 = vcombine.high %v3944_v11, %v3948_v49  ;;  %v9335_v46 = vcombine.low %v3944_v11, %v3948_v49  ;;  %v3996_v36 = vld [vmem:[#allocation7 + $0x570] sm:$0xff] }
 0x427   :  { %v9338_v23 = vcombine.high %v3945_v19, %v3949_v61  ;;  %v9337_v2 = vcombine.low %v3945_v19, %v3949_v61  ;;  %v9384_v11 = vcombine.high %v3992_v28, %v3996_v36  ;;  %v4000_v19 = vld [vmem:[#allocation7 + $0x590] sm:$0xff] }
 0x428   :  { %7705 = vmatpush1.bf16.msra.mxu0 %v9279_v25  ;;  %v3952_v25 = vld [vmem:[#allocation7 + $0x410] sm:$0xff] }
 0x429   :  { %7910 = vmatpush1.bf16.msra.mxu1 %v9281_v30  ;;  %7706 = vmatprep.subr.bf16.mxu0 %v9288_v31  ;;  %v3956_v30 = vld [vmem:[#allocation7 + $0x430] sm:$0xff]  ;;  %v3953_v31 = vld [vmem:[#allocation7 + $0x418] sm:$0xff] }
 0x42a   :  { %7911 = vmatprep.subr.bf16.mxu1 %v9290_v42  ;;  %v3957_v42 = vld [vmem:[#allocation7 + $0x438] sm:$0xff]  ;;  %v9344_v4 = vcombine.high %v3952_v25, %v3956_v30  ;;  %v4004_v61 = vld [vmem:[#allocation7 + $0x5b0] sm:$0xff] }
 0x42b   :  { %v9346_v43 = vcombine.high %v3953_v31, %v3957_v42  ;;  %v9345_v35 = vcombine.low %v3953_v31, %v3957_v42  ;;  %v4008_v31 = vld [vmem:[#allocation7 + $0x5d0] sm:$0xff] }
 0x42c   :  { %7707 = vmatpush1.bf16.msra.mxu0 %v9287_v38  ;;  %v3960_v38 = vld [vmem:[#allocation7 + $0x450] sm:$0xff] }
 0x42d   :  { %7912 = vmatpush1.bf16.msra.mxu1 %v9289_v45  ;;  %7708 = vmatprep.subr.bf16.mxu0 %v9296_v33  ;;  %v3964_v45 = vld [vmem:[#allocation7 + $0x470] sm:$0xff]  ;;  %v9343_v33 = vcombine.low %v3952_v25, %v3956_v30  ;;  %v9392_v25 = vcombine.high %v4000_v19, %v4004_v61 }
 0x42e   :  { %7913 = vmatprep.subr.bf16.mxu1 %v9298_v34  ;;  %v3961_v34 = vld [vmem:[#allocation7 + $0x458] sm:$0xff]  ;;  %v9352_v39 = vcombine.high %v3960_v38, %v3964_v45  ;;  %v9351_v7 = vcombine.low %v3960_v38, %v3964_v45  ;;  %v4012_v42 = vld [vmem:[#allocation7 + $0x5f0] sm:$0xff] }
 0x42f   :  { %v9353_v58 = vcombine.low %v3961_v34, %v3965_v14  ;;  %v9400_v38 = vcombine.high %v4008_v31, %v4012_v42 }
 0x430   :  { %7709 = vmatpush1.bf16.msra.mxu0 %v9295_v51  ;;  %v3972_v51 = vld [vmem:[#allocation7 + $0x4b0] sm:$0xff] }
 0x431   :  { %7914 = vmatpush1.bf16.msra.mxu1 %v9297_v56  ;;  %7710 = vmatprep.subr.bf16.mxu0 %v9304_v41  ;;  %v9354_v56 = vcombine.high %v3961_v34, %v3965_v14  ;;  %v3969_v41 = vld [vmem:[#allocation7 + $0x498] sm:$0xff]  ;;  %v9360_v59 = vcombine.high %v3968_v50, %v3972_v51  ;;  %v9359_v17 = vcombine.low %v3968_v50, %v3972_v51  ;;  %v4020_v34 = vld [vmem:[#allocation7 + $0x630] sm:$0xff] }
 0x432   :  { %7915 = vmatprep.subr.bf16.mxu1 %v9306_v57  ;;  %v3973_v57 = vld [vmem:[#allocation7 + $0x4b8] sm:$0xff] }
 0x433   :  { %v9362_v6 = vcombine.high %v3969_v41, %v3973_v57  ;;  %v4017_v14 = vld [vmem:[#allocation7 + $0x618] sm:$0xff] }
 0x434   :  { %7711 = vmatpush1.bf16.msra.mxu0 %v9303_v60  ;;  %v3976_v60 = vld [vmem:[#allocation7 + $0x4d0] sm:$0xff] }
 0x435   :  { %7916 = vmatpush1.bf16.msra.mxu1 %v9305_v20  ;;  %7712 = vmatprep.subr.bf16.mxu0 %v9312_v22  ;;  %v3980_v20 = vld [vmem:[#allocation7 + $0x4f0] sm:$0xff]  ;;  %v3977_v22 = vld [vmem:[#allocation7 + $0x4d8] sm:$0xff] }
 0x436   :  { %7917 = vmatprep.subr.bf16.mxu1 %v9314_v12  ;;  %v3981_v12 = vld [vmem:[#allocation7 + $0x4f8] sm:$0xff]  ;;  %v9368_v18 = vcombine.high %v3976_v60, %v3980_v20 }
 0x437   :  { %v9370_v53 = vcombine.high %v3977_v22, %v3981_v12 }
 0x438   :  { %7713 = vmatpush1.bf16.msra.mxu0 %v9311_v26  ;;  %v3988_v26 = vld [vmem:[#allocation7 + $0x530] sm:$0xff] }
 0x439   :  { %7918 = vmatpush1.bf16.msra.mxu1 %v9313_v8  ;;  %7714 = vmatprep.subr.bf16.mxu0 %v9320_v63  ;;  %v3985_v8 = vld [vmem:[#allocation7 + $0x518] sm:$0xff]  ;;  %v9376_v54 = vcombine.high %v3984_v24, %v3988_v26 }
 0x43a   :  { %7919 = vmatprep.subr.bf16.mxu1 %v9322_v62  ;;  %v3989_v63 = vld [vmem:[#allocation7 + $0x538] sm:$0xff]  ;;  %v9369_v62 = vcombine.low %v3977_v22, %v3981_v12  ;;  %v4032_v22 = vld [vmem:[#allocation7 + $0x690] sm:$0xff] }
 0x43b   :  { %v9378_v27 = vcombine.high %v3985_v8, %v3989_v63  ;;  %v4036_v12 = vld [vmem:[#allocation7 + $0x6b0] sm:$0xff] }
 0x43c   :  { %7715 = vmatpush1.bf16.msra.mxu0 %v9319_v10  ;;  %v3993_v10 = vld [vmem:[#allocation7 + $0x558] sm:$0xff] }
 0x43d   :  { %7920 = vmatpush1.bf16.msra.mxu1 %v9321_v48  ;;  %7716 = vmatprep.subr.bf16.mxu0 %v9328_v0  ;;  %v3997_v48 = vld [vmem:[#allocation7 + $0x578] sm:$0xff]  ;;  %v9375_v0 = vcombine.low %v3984_v24, %v3988_v26  ;;  %v9424_v24 = vcombine.high %v4032_v22, %v4036_v12 }
 0x43e   :  { %7921 = vmatprep.subr.bf16.mxu1 %v9330_v1  ;;  %v9377_v1 = vcombine.low %v3985_v8, %v3989_v63  ;;  %v9386_v49 = vcombine.high %v3993_v10, %v3997_v48  ;;  %v4040_v8 = vld [vmem:[#allocation7 + $0x6d0] sm:$0xff] }
 0x43f   :  { %v4044_v63 = vld [vmem:[#allocation7 + $0x6f0] sm:$0xff] }
 0x440   :  { %7717 = vmatpush1.bf16.msra.mxu0 %v9327_v47  ;;  %v4001_v47 = vld [vmem:[#allocation7 + $0x598] sm:$0xff] }
 0x441   :  { %7922 = vmatpush1.bf16.msra.mxu1 %v9329_v52  ;;  %7718 = vmatprep.subr.bf16.mxu0 %v9336_v3  ;;  %v4005_v52 = vld [vmem:[#allocation7 + $0x5b8] sm:$0xff]  ;;  %v9383_v3 = vcombine.low %v3992_v28, %v3996_v36  ;;  %v9432_v28 = vcombine.high %v4040_v8, %v4044_v63 }
 0x442   :  { %7923 = vmatprep.subr.bf16.mxu1 %v9338_v23  ;;  %v9385_v23 = vcombine.low %v3993_v10, %v3997_v48  ;;  %v9394_v30 = vcombine.high %v4001_v47, %v4005_v52  ;;  %v4048_v10 = vld [vmem:[#allocation7 + $0x710] sm:$0xff] }
 0x443   :  { %v4052_v48 = vld [vmem:[#allocation7 + $0x730] sm:$0xff] }
 0x444   :  { %7719 = vmatpush1.bf16.msra.mxu0 %v9335_v46  ;;  %v4009_v46 = vld [vmem:[#allocation7 + $0x5d8] sm:$0xff] }
 0x445   :  { %7924 = vmatpush1.bf16.msra.mxu1 %v9337_v2  ;;  %7729 = vmatprep.subr.bf16.mxu0 %v9344_v4  ;;  %v4013_v2 = vld [vmem:[#allocation7 + $0x5f8] sm:$0xff]  ;;  %v9391_v4 = vcombine.low %v4000_v19, %v4004_v61  ;;  %v9440_v19 = vcombine.high %v4048_v10, %v4052_v48 }
 0x446   :  { %7934 = vmatprep.subr.bf16.mxu1 %v9346_v43  ;;  %v9393_v43 = vcombine.low %v4001_v47, %v4005_v52  ;;  %v9402_v45 = vcombine.high %v4009_v46, %v4013_v2  ;;  %v9401_v50 = vcombine.low %v4009_v46, %v4013_v2  ;;  %v4056_v47 = vld [vmem:[#allocation7 + $0x750] sm:$0xff] }
 0x447   :  { %7721 = vmatmul.mubr.bf16.vlgmr.msra.gmra.mrb[40].mxu0 %v11424_v15  ;;  %v4060_v52 = vld [vmem:[#allocation7 + $0x770] sm:$0xff] }
 0x448   :  { %7926 = vmatmul.mubr.bf16.vlgmr.msra.gmra.mrb[40].mxu1 %v11424_v15  ;;  %7730 = vmatpush1.bf16.msra.mxu0 %v9343_v33  ;;  %v9361_v15 = vcombine.low %v3969_v41, %v3973_v57  ;;  %v4016_v33 = vld [vmem:[#allocation7 + $0x610] sm:$0xff] }
 0x449   :  { %7761 = vmatprep.mubr.bf16.mxu0 %v11428_v13  ;;  %7935 = vmatpush1.bf16.msra.mxu1 %v9345_v35  ;;  %v4021_v35 = vld [vmem:[#allocation7 + $0x638] sm:$0xff]  ;;  %v9408_v51 = vcombine.high %v4016_v33, %v4020_v34  ;;  %v4024_v41 = vld [vmem:[#allocation7 + $0x650] sm:$0xff] }
 0x44a   :  { %7966 = vmatprep.mubr.bf16.mxu1 %v11428_v13  ;;  %7731 = vmatprep.subr.bf16.mxu0 %v9352_v39  ;;  %v9367_v13 = vcombine.low %v3976_v60, %v3980_v20  ;;  %v9399_v39 = vcombine.low %v4008_v31, %v4012_v42  ;;  %v4028_v57 = vld [vmem:[#allocation7 + $0x670] sm:$0xff]  ;;  %v9448_v31 = vcombine.high %v4056_v47, %v4060_v52 }
 0x44b   :  { %7936 = vmatprep.subr.bf16.mxu1 %v9354_v56  ;;  %v9410_v56 = vcombine.high %v4017_v14, %v4021_v35  ;;  %v9416_v60 = vcombine.high %v4024_v41, %v4028_v57  ;;  %v4064_v46 = vld [vmem:[#allocation7 + $0x790] sm:$0xff] }
 0x44c   :  { %7732 = vmatpush1.bf16.msra.mxu0 %v9351_v7  ;;  %v4025_v7 = vld [vmem:[#allocation7 + $0x658] sm:$0xff]  ;;  %v4068_v2 = vld [vmem:[#allocation7 + $0x7b0] sm:$0xff] }
 0x44d   :  { %7937 = vmatpush1.bf16.msra.mxu1 %v9353_v58  ;;  %7733 = vmatprep.subr.bf16.mxu0 %v9360_v59  ;;  %v4029_v58 = vld [vmem:[#allocation7 + $0x678] sm:$0xff]  ;;  %v9407_v59 = vcombine.low %v4016_v33, %v4020_v34  ;;  %v9456_v33 = vcombine.high %v4064_v46, %v4068_v2 }
 0x44e   :  { %7938 = vmatprep.subr.bf16.mxu1 %v9362_v6  ;;  %v9409_v6 = vcombine.low %v4017_v14, %v4021_v35  ;;  %v9418_v20 = vcombine.high %v4025_v7, %v4029_v58  ;;  %v4072_v14 = vld [vmem:[#allocation7 + $0x7d0] sm:$0xff] }
 0x44f   :  { %v4076_v35 = vld [vmem:[#allocation7 + $0x7f0] sm:$0xff] }
 0x450   :  { %7734 = vmatpush1.bf16.msra.mxu0 %v9359_v17  ;;  %v4033_v17 = vld [vmem:[#allocation7 + $0x698] sm:$0xff] }
 0x451   :  { %7939 = vmatpush1.bf16.msra.mxu1 %v9361_v15  ;;  %7735 = vmatprep.subr.bf16.mxu0 %v9368_v18  ;;  %v4037_v15 = vld [vmem:[#allocation7 + $0x6b8] sm:$0xff]  ;;  %v9415_v18 = vcombine.low %v4024_v41, %v4028_v57  ;;  %v9464_v41 = vcombine.high %v4072_v14, %v4076_v35 }
 0x452   :  { %7940 = vmatprep.subr.bf16.mxu1 %v9370_v53  ;;  %v9417_v53 = vcombine.low %v4025_v7, %v4029_v58  ;;  %v9426_v26 = vcombine.high %v4033_v17, %v4037_v15  ;;  %v4080_v7 = vld [vmem:[#allocation7 + $0x810] sm:$0xff] }
 0x453   :  { %v4084_v58 = vld [vmem:[#allocation7 + $0x830] sm:$0xff] }
 0x454   :  { %7736 = vmatpush1.bf16.msra.mxu0 %v9367_v13  ;;  %v4041_v13 = vld [vmem:[#allocation7 + $0x6d8] sm:$0xff] }
 0x455   :  { %7941 = vmatpush1.bf16.msra.mxu1 %v9369_v62  ;;  %7737 = vmatprep.subr.bf16.mxu0 %v9376_v54  ;;  %v4045_v62 = vld [vmem:[#allocation7 + $0x6f8] sm:$0xff]  ;;  %v9423_v54 = vcombine.low %v4032_v22, %v4036_v12  ;;  %v9472_v22 = vcombine.high %v4080_v7, %v4084_v58 }
 0x456   :  { %7942 = vmatprep.subr.bf16.mxu1 %v9378_v27  ;;  %v9425_v27 = vcombine.low %v4033_v17, %v4037_v15  ;;  %v9434_v36 = vcombine.high %v4041_v13, %v4045_v62  ;;  %v4088_v17 = vld [vmem:[#allocation7 + $0x850] sm:$0xff] }
 0x457   :  { %v4092_v15 = vld [vmem:[#allocation7 + $0x870] sm:$0xff] }
 0x458   :  { %7738 = vmatpush1.bf16.msra.mxu0 %v9375_v0  ;;  %v4049_v0 = vld [vmem:[#allocation7 + $0x718] sm:$0xff] }
 0x459   :  { %7943 = vmatpush1.bf16.msra.mxu1 %v9377_v1  ;;  %7739 = vmatprep.subr.bf16.mxu0 %v9384_v11  ;;  %v4053_v1 = vld [vmem:[#allocation7 + $0x738] sm:$0xff]  ;;  %v9431_v11 = vcombine.low %v4040_v8, %v4044_v63  ;;  %v9480_v8 = vcombine.high %v4088_v17, %v4092_v15  ;;  %v4096_v63 = vld [vmem:[#allocation7 + $0x890] sm:$0xff] }
 0x45a   :  { %7944 = vmatprep.subr.bf16.mxu1 %v9386_v49  ;;  %v9433_v49 = vcombine.low %v4041_v13, %v4045_v62  ;;  %v9442_v61 = vcombine.high %v4049_v0, %v4053_v1  ;;  %v4100_v13 = vld [vmem:[#allocation7 + $0x8b0] sm:$0xff] }
 0x45c   :  { %7740 = vmatpush1.bf16.msra.mxu0 %v9383_v3  ;;  %v4057_v3 = vld [vmem:[#allocation7 + $0x758] sm:$0xff] }
 0x45d   :  { %7945 = vmatpush1.bf16.msra.mxu1 %v9385_v23  ;;  %7741 = vmatprep.subr.bf16.mxu0 %v9392_v25  ;;  %v4061_v23 = vld [vmem:[#allocation7 + $0x778] sm:$0xff]  ;;  %v9439_v25 = vcombine.low %v4048_v10, %v4052_v48  ;;  %v9488_v10 = vcombine.high %v4096_v63, %v4100_v13 }
 0x45e   :  { %7946 = vmatprep.subr.bf16.mxu1 %v9394_v30  ;;  %v9441_v30 = vcombine.low %v4049_v0, %v4053_v1  ;;  %v9450_v42 = vcombine.high %v4057_v3, %v4061_v23  ;;  %v4104_v0 = vld [vmem:[#allocation7 + $0x8d0] sm:$0xff] }
 0x45f   :  { %v4108_v1 = vld [vmem:[#allocation7 + $0x8f0] sm:$0xff] }
 0x460   :  { %7742 = vmatpush1.bf16.msra.mxu0 %v9391_v4  ;;  %v4065_v4 = vld [vmem:[#allocation7 + $0x798] sm:$0xff] }
 0x461   :  { %7947 = vmatpush1.bf16.msra.mxu1 %v9393_v43  ;;  %7743 = vmatprep.subr.bf16.mxu0 %v9400_v38  ;;  %v4069_v43 = vld [vmem:[#allocation7 + $0x7b8] sm:$0xff]  ;;  %v9447_v38 = vcombine.low %v4056_v47, %v4060_v52  ;;  %v4112_v52 = vld [vmem:[#allocation7 + $0x910] sm:$0xff] }
 0x462   :  { %7948 = vmatprep.subr.bf16.mxu1 %v9402_v45  ;;  %v9449_v45 = vcombine.low %v4057_v3, %v4061_v23  ;;  %v9458_v34 = vcombine.high %v4065_v4, %v4069_v43  ;;  %v4116_v3 = vld [vmem:[#allocation7 + $0x930] sm:$0xff]  ;;  %v4113_v23 = vld [vmem:[#allocation7 + $0x918] sm:$0xff] }
 0x464   :  { %7744 = vmatpush1.bf16.msra.mxu0 %v9399_v39  ;;  %v4073_v39 = vld [vmem:[#allocation7 + $0x7d8] sm:$0xff] }
 0x465   :  { %7949 = vmatpush1.bf16.msra.mxu1 %v9401_v50  ;;  %7745 = vmatprep.subr.bf16.mxu0 %v9408_v51  ;;  %v4077_v50 = vld [vmem:[#allocation7 + $0x7f8] sm:$0xff]  ;;  %v9455_v51 = vcombine.low %v4064_v46, %v4068_v2  ;;  %v4120_v46 = vld [vmem:[#allocation7 + $0x950] sm:$0xff] }
 0x466   :  { %7950 = vmatprep.subr.bf16.mxu1 %v9410_v56  ;;  %v9457_v56 = vcombine.low %v4065_v4, %v4069_v43  ;;  %v9466_v57 = vcombine.high %v4073_v39, %v4077_v50  ;;  %v4124_v2 = vld [vmem:[#allocation7 + $0x970] sm:$0xff]  ;;  %v4121_v4 = vld [vmem:[#allocation7 + $0x958] sm:$0xff] }
 0x467   :  { %v4125_v43 = vld [vmem:[#allocation7 + $0x978] sm:$0xff] }
 0x468   :  { %7746 = vmatpush1.bf16.msra.mxu0 %v9407_v59  ;;  %v4081_v59 = vld [vmem:[#allocation7 + $0x818] sm:$0xff] }
 0x469   :  { %7951 = vmatpush1.bf16.msra.mxu1 %v9409_v6  ;;  %7747 = vmatprep.subr.bf16.mxu0 %v9416_v60  ;;  %v4085_v6 = vld [vmem:[#allocation7 + $0x838] sm:$0xff]  ;;  %v9463_v60 = vcombine.low %v4072_v14, %v4076_v35  ;;  %v4128_v14 = vld [vmem:[#allocation7 + $0x990] sm:$0xff] }
 0x46a   :  { %7952 = vmatprep.subr.bf16.mxu1 %v9418_v20  ;;  %v9465_v20 = vcombine.low %v4073_v39, %v4077_v50  ;;  %v9474_v12 = vcombine.high %v4081_v59, %v4085_v6  ;;  %v4132_v35 = vld [vmem:[#allocation7 + $0x9b0] sm:$0xff]  ;;  %v4129_v39 = vld [vmem:[#allocation7 + $0x998] sm:$0xff] }
 0x46b   :  { %v4133_v50 = vld [vmem:[#allocation7 + $0x9b8] sm:$0xff] }
 0x46c   :  { %7748 = vmatpush1.bf16.msra.mxu0 %v9415_v18  ;;  %v9471_v18 = vcombine.low %v4080_v7, %v4084_v58  ;;  %v4136_v7 = vld [vmem:[#allocation7 + $0x9d0] sm:$0xff] }
 0x46d   :  { %7953 = vmatpush1.bf16.msra.mxu1 %v9417_v53  ;;  %7749 = vmatprep.subr.bf16.mxu0 %v9424_v24  ;;  %v4089_v53 = vld [vmem:[#allocation7 + $0x858] sm:$0xff]  ;;  %v4140_v58 = vld [vmem:[#allocation7 + $0x9f0] sm:$0xff] }
 0x46e   :  { %7954 = vmatprep.subr.bf16.mxu1 %v9426_v26  ;;  %v4093_v24 = vld [vmem:[#allocation7 + $0x878] sm:$0xff]  ;;  %v9473_v26 = vcombine.low %v4081_v59, %v4085_v6 }
 0x46f   :  { %v9482_v62 = vcombine.high %v4089_v53, %v4093_v24  ;;  %v4137_v59 = vld [vmem:[#allocation7 + $0x9d8] sm:$0xff] }
 0x470   :  { %7750 = vmatpush1.bf16.msra.mxu0 %v9423_v54  ;;  %v4097_v54 = vld [vmem:[#allocation7 + $0x898] sm:$0xff] }
 0x471   :  { %7955 = vmatpush1.bf16.msra.mxu1 %v9425_v27  ;;  %7751 = vmatprep.subr.bf16.mxu0 %v9432_v28  ;;  %v4101_v27 = vld [vmem:[#allocation7 + $0x8b8] sm:$0xff]  ;;  %v9479_v28 = vcombine.low %v4088_v17, %v4092_v15  ;;  %v4144_v17 = vld [vmem:[#allocation7 + $0xa10] sm:$0xff] }
 0x472   :  { %7956 = vmatprep.subr.bf16.mxu1 %v9434_v36  ;;  %v9481_v36 = vcombine.low %v4089_v53, %v4093_v24  ;;  %v9490_v48 = vcombine.high %v4097_v54, %v4101_v27  ;;  %v4141_v6 = vld [vmem:[#allocation7 + $0x9f8] sm:$0xff]  ;;  %v4148_v15 = vld [vmem:[#allocation7 + $0xa30] sm:$0xff]  ;;  %v9527_v24 = vcombine.low %v4136_v7, %v4140_v58 }
 0x473   :  { %v4149_v53 = vld [vmem:[#allocation7 + $0xa38] sm:$0xff] }
 0x474   :  { %7752 = vmatpush1.bf16.msra.mxu0 %v9431_v11  ;;  %v4105_v11 = vld [vmem:[#allocation7 + $0x8d8] sm:$0xff] }
 0x475   :  { %7957 = vmatpush1.bf16.msra.mxu1 %v9433_v49  ;;  %7753 = vmatprep.subr.bf16.mxu0 %v9440_v19  ;;  %v4109_v49 = vld [vmem:[#allocation7 + $0x8f8] sm:$0xff]  ;;  %v9487_v19 = vcombine.low %v4096_v63, %v4100_v13  ;;  %v4152_v13 = vld [vmem:[#allocation7 + $0xa50] sm:$0xff] }
 0x476   :  { %7958 = vmatprep.subr.bf16.mxu1 %v9442_v61  ;;  %v9496_v61 = vcombine.high %v4104_v0, %v4108_v1  ;;  %v9498_v47 = vcombine.high %v4105_v11, %v4109_v49 }
 0x478   :  { %7754 = vmatpush1.bf16.msra.mxu0 %v9439_v25  ;;  %v4117_v25 = vld [vmem:[#allocation7 + $0x938] sm:$0xff] }
 0x479   :  { %7959 = vmatpush1.bf16.msra.mxu1 %v9441_v30  ;;  %7755 = vmatprep.subr.bf16.mxu0 %v9448_v31  ;;  %v9497_v30 = vcombine.low %v4105_v11, %v4109_v49  ;;  %v9504_v31 = vcombine.high %v4112_v52, %v4116_v3  ;;  %v4161_v11 = vld [vmem:[#allocation7 + $0xa98] sm:$0xff] }
 0x47a   :  { %7960 = vmatprep.subr.bf16.mxu1 %v9450_v42  ;;  %v9506_v42 = vcombine.high %v4113_v23, %v4117_v25  ;;  %v4165_v49 = vld [vmem:[#allocation7 + $0xab8] sm:$0xff] }
 0x47c   :  { %7756 = vmatpush1.bf16.msra.mxu0 %v9447_v38  ;;  %v9503_v38 = vcombine.low %v4112_v52, %v4116_v3  ;;  %v4168_v52 = vld [vmem:[#allocation7 + $0xad0] sm:$0xff] }
 0x47d   :  { %7961 = vmatpush1.bf16.msra.mxu1 %v9449_v45  ;;  %7757 = vmatprep.subr.bf16.mxu0 %v9456_v33  ;;  %v9505_v45 = vcombine.low %v4113_v23, %v4117_v25  ;;  %v9512_v33 = vcombine.high %v4120_v46, %v4124_v2  ;;  %v4172_v3 = vld [vmem:[#allocation7 + $0xaf0] sm:$0xff]  ;;  %v4169_v23 = vld [vmem:[#allocation7 + $0xad8] sm:$0xff] }
 0x47e   :  { %7962 = vmatprep.subr.bf16.mxu1 %v9458_v34  ;;  %v9514_v34 = vcombine.high %v4121_v4, %v4125_v43  ;;  %v4173_v25 = vld [vmem:[#allocation7 + $0xaf8] sm:$0xff] }
 0x480   :  { %7758 = vmatpush1.bf16.msra.mxu0 %v9455_v51  ;;  %v9511_v51 = vcombine.low %v4120_v46, %v4124_v2  ;;  %v4176_v46 = vld [vmem:[#allocation7 + $0xb10] sm:$0xff] }
 0x481   :  { %7963 = vmatpush1.bf16.msra.mxu1 %v9457_v56  ;;  %7759 = vmatprep.subr.bf16.mxu0 %v9464_v41  ;;  %v9513_v56 = vcombine.low %v4121_v4, %v4125_v43  ;;  %v9520_v41 = vcombine.high %v4128_v14, %v4132_v35  ;;  %v4180_v2 = vld [vmem:[#allocation7 + $0xb30] sm:$0xff]  ;;  %v4177_v4 = vld [vmem:[#allocation7 + $0xb18] sm:$0xff] }
 0x482   :  { %7964 = vmatprep.subr.bf16.mxu1 %v9466_v57  ;;  %v9522_v57 = vcombine.high %v4129_v39, %v4133_v50  ;;  %v4181_v43 = vld [vmem:[#allocation7 + $0xb38] sm:$0xff] }
 0x484   :  { %7760 = vmatpush1.bf16.msra.mxu0 %v9463_v60  ;;  %v9519_v60 = vcombine.low %v4128_v14, %v4132_v35  ;;  %v4184_v14 = vld [vmem:[#allocation7 + $0xb50] sm:$0xff] }
 0x485   :  { %7965 = vmatpush1.bf16.msra.mxu1 %v9465_v20  ;;  %7770 = vmatprep.subr.bf16.mxu0 %v9472_v22  ;;  %v9521_v20 = vcombine.low %v4129_v39, %v4133_v50  ;;  %v9528_v22 = vcombine.high %v4136_v7, %v4140_v58  ;;  %v4188_v35 = vld [vmem:[#allocation7 + $0xb70] sm:$0xff]  ;;  %v4185_v39 = vld [vmem:[#allocation7 + $0xb58] sm:$0xff] }
 0x486   :  { %7975 = vmatprep.subr.bf16.mxu1 %v9474_v12  ;;  %v9530_v12 = vcombine.high %v4137_v59, %v4141_v6  ;;  %v4189_v50 = vld [vmem:[#allocation7 + $0xb78] sm:$0xff]  ;;  %v4192_v7 = vld [vmem:[#allocation7 + $0xb90] sm:$0xff] }
 0x487   :  { %7762 = vmatmul.mubr.bf16.vlgmr.msra.gmra.mrb[40].mxu0 %v11467_v37  ;;  %v4196_v58 = vld [vmem:[#allocation7 + $0xbb0] sm:$0xff] }
 0x488   :  { %7967 = vmatmul.mubr.bf16.vlgmr.msra.gmra.mrb[40].mxu1 %v11467_v37  ;;  %7771 = vmatpush1.bf16.msra.mxu0 %v9471_v18  ;;  %v9489_v37 = vcombine.low %v4097_v54, %v4101_v27  ;;  %v4145_v18 = vld [vmem:[#allocation7 + $0xa18] sm:$0xff] }
 0x489   :  { %7802 = vmatprep.mubr.bf16.mxu0 %v11469_v40  ;;  %7976 = vmatpush1.bf16.msra.mxu1 %v9473_v26  ;;  %v9529_v26 = vcombine.low %v4137_v59, %v4141_v6  ;;  %v9538_v63 = vcombine.high %v4145_v18, %v4149_v53  ;;  %v4153_v54 = vld [vmem:[#allocation7 + $0xa58] sm:$0xff] }
 0x48a   :  { %8007 = vmatprep.mubr.bf16.mxu1 %v11469_v40  ;;  %7772 = vmatprep.subr.bf16.mxu0 %v9480_v8  ;;  %v9495_v40 = vcombine.low %v4104_v0, %v4108_v1  ;;  %v9536_v8 = vcombine.high %v4144_v17, %v4148_v15  ;;  %v4157_v27 = vld [vmem:[#allocation7 + $0xa78] sm:$0xff]  ;;  %v4160_v0 = vld [vmem:[#allocation7 + $0xa90] sm:$0xff] }
 0x48b   :  { %7977 = vmatprep.subr.bf16.mxu1 %v9482_v62  ;;  %v4156_v62 = vld [vmem:[#allocation7 + $0xa70] sm:$0xff]  ;;  %v4193_v59 = vld [vmem:[#allocation7 + $0xb98] sm:$0xff] }
 0x48c   :  { %7773 = vmatpush1.bf16.msra.mxu0 %v9479_v28  ;;  %v9535_v28 = vcombine.low %v4144_v17, %v4148_v15  ;;  %v4164_v1 = vld [vmem:[#allocation7 + $0xab0] sm:$0xff]  ;;  %v4197_v6 = vld [vmem:[#allocation7 + $0xbb8] sm:$0xff] }
 0x48d   :  { %7978 = vmatpush1.bf16.msra.mxu1 %v9481_v36  ;;  %7774 = vmatprep.subr.bf16.mxu0 %v9488_v10  ;;  %v9537_v36 = vcombine.low %v4145_v18, %v4149_v53  ;;  %v9544_v10 = vcombine.high %v4152_v13, %v4156_v62  ;;  %v4200_v17 = vld [vmem:[#allocation7 + $0xbd0] sm:$0xff]  ;;  %v4201_v18 = vld [vmem:[#allocation7 + $0xbd8] sm:$0xff] }
 0x48e   :  { %7979 = vmatprep.subr.bf16.mxu1 %v9490_v48  ;;  %v9546_v48 = vcombine.high %v4153_v54, %v4157_v27  ;;  %v4204_v15 = vld [vmem:[#allocation7 + $0xbf0] sm:$0xff]  ;;  %v4205_v53 = vld [vmem:[#allocation7 + $0xbf8] sm:$0xff] }
 0x490   :  { %7775 = vmatpush1.bf16.msra.mxu0 %v9487_v19  ;;  %v9543_v19 = vcombine.low %v4152_v13, %v4156_v62  ;;  %v4208_v13 = vld [vmem:[#allocation7 + $0xc10] sm:$0xff] }
 0x491   :  { %7980 = vmatpush1.bf16.msra.mxu1 %v9489_v37  ;;  %7776 = vmatprep.subr.bf16.mxu0 %v9496_v61  ;;  %v9545_v37 = vcombine.low %v4153_v54, %v4157_v27  ;;  %v9552_v61 = vcombine.high %v4160_v0, %v4164_v1  ;;  %v4212_v62 = vld [vmem:[#allocation7 + $0xc30] sm:$0xff]  ;;  %v4209_v54 = vld [vmem:[#allocation7 + $0xc18] sm:$0xff] }
 0x492   :  { %7981 = vmatprep.subr.bf16.mxu1 %v9498_v47  ;;  %v9554_v47 = vcombine.high %v4161_v11, %v4165_v49  ;;  %v4213_v27 = vld [vmem:[#allocation7 + $0xc38] sm:$0xff] }
 0x494   :  { %7777 = vmatpush1.bf16.msra.mxu0 %v9495_v40  ;;  %v9551_v40 = vcombine.low %v4160_v0, %v4164_v1  ;;  %v4216_v0 = vld [vmem:[#allocation7 + $0xc50] sm:$0xff] }
 0x495   :  { %7982 = vmatpush1.bf16.msra.mxu1 %v9497_v30  ;;  %7778 = vmatprep.subr.bf16.mxu0 %v9504_v31  ;;  %v9553_v30 = vcombine.low %v4161_v11, %v4165_v49  ;;  %v9560_v31 = vcombine.high %v4168_v52, %v4172_v3  ;;  %v4220_v1 = vld [vmem:[#allocation7 + $0xc70] sm:$0xff]  ;;  %v9599_v11 = vcombine.low %v4208_v13, %v4212_v62  ;;  %v4217_v49 = vld [vmem:[#allocation7 + $0xc58] sm:$0xff] }
 0x496   :  { %7983 = vmatprep.subr.bf16.mxu1 %v9506_v42  ;;  %v9562_v42 = vcombine.high %v4169_v23, %v4173_v25 }
 0x498   :  { %7779 = vmatpush1.bf16.msra.mxu0 %v9503_v38  ;;  %v9559_v38 = vcombine.low %v4168_v52, %v4172_v3  ;;  %v4228_v52 = vld [vmem:[#allocation7 + $0xcb0] sm:$0xff] }
 0x499   :  { %7984 = vmatpush1.bf16.msra.mxu1 %v9505_v45  ;;  %7780 = vmatprep.subr.bf16.mxu0 %v9512_v33  ;;  %v9561_v45 = vcombine.low %v4169_v23, %v4173_v25  ;;  %v9568_v33 = vcombine.high %v4176_v46, %v4180_v2  ;;  %v4225_v23 = vld [vmem:[#allocation7 + $0xc98] sm:$0xff] }
 0x49a   :  { %7985 = vmatprep.subr.bf16.mxu1 %v9514_v34  ;;  %v9570_v34 = vcombine.high %v4177_v4, %v4181_v43  ;;  %v4229_v25 = vld [vmem:[#allocation7 + $0xcb8] sm:$0xff] }
 0x49c   :  { %7781 = vmatpush1.bf16.msra.mxu0 %v9511_v51  ;;  %v9567_v51 = vcombine.low %v4176_v46, %v4180_v2  ;;  %v4232_v46 = vld [vmem:[#allocation7 + $0xcd0] sm:$0xff] }
 0x49d   :  { %7986 = vmatpush1.bf16.msra.mxu1 %v9513_v56  ;;  %7782 = vmatprep.subr.bf16.mxu0 %v9520_v41  ;;  %v9569_v56 = vcombine.low %v4177_v4, %v4181_v43  ;;  %v9576_v41 = vcombine.high %v4184_v14, %v4188_v35  ;;  %v4236_v2 = vld [vmem:[#allocation7 + $0xcf0] sm:$0xff]  ;;  %v4233_v4 = vld [vmem:[#allocation7 + $0xcd8] sm:$0xff] }
 0x49e   :  { %7987 = vmatprep.subr.bf16.mxu1 %v9522_v57  ;;  %v9578_v57 = vcombine.high %v4185_v39, %v4189_v50  ;;  %v4237_v43 = vld [vmem:[#allocation7 + $0xcf8] sm:$0xff] }
 0x4a0   :  { %7783 = vmatpush1.bf16.msra.mxu0 %v9519_v60  ;;  %v9575_v60 = vcombine.low %v4184_v14, %v4188_v35  ;;  %v4244_v14 = vld [vmem:[#allocation7 + $0xd30] sm:$0xff]  ;;  %v4241_v35 = vld [vmem:[#allocation7 + $0xd18] sm:$0xff] }
 0x4a1   :  { %7988 = vmatpush1.bf16.msra.mxu1 %v9521_v20  ;;  %7784 = vmatprep.subr.bf16.mxu0 %v9528_v22  ;;  %v9577_v20 = vcombine.low %v4185_v39, %v4189_v50  ;;  %v9584_v22 = vcombine.high %v4192_v7, %v4196_v58  ;;  %v4245_v39 = vld [vmem:[#allocation7 + $0xd38] sm:$0xff]  ;;  %v9625_v50 = vcombine.low %v4233_v4, %v4237_v43 }
 0x4a2   :  { %7989 = vmatprep.subr.bf16.mxu1 %v9530_v12  ;;  %v9586_v12 = vcombine.high %v4193_v59, %v4197_v6 }
 0x4a4   :  { %7785 = vmatpush1.bf16.msra.mxu0 %v9527_v24  ;;  %v9583_v24 = vcombine.low %v4192_v7, %v4196_v58  ;;  %v4249_v7 = vld [vmem:[#allocation7 + $0xd58] sm:$0xff] }
 0x4a5   :  { %7990 = vmatpush1.bf16.msra.mxu1 %v9529_v26  ;;  %7786 = vmatprep.subr.bf16.mxu0 %v9536_v8  ;;  %v9585_v26 = vcombine.low %v4193_v59, %v4197_v6  ;;  %v9592_v8 = vcombine.high %v4200_v17, %v4204_v15  ;;  %v4253_v58 = vld [vmem:[#allocation7 + $0xd78] sm:$0xff]  ;;  %v9633_v6 = vcombine.low %v4241_v35, %v4245_v39 }
 0x4a6   :  { %7991 = vmatprep.subr.bf16.mxu1 %v9538_v63  ;;  %v9594_v63 = vcombine.high %v4201_v18, %v4205_v53 }
 0x4a8   :  { %7787 = vmatpush1.bf16.msra.mxu0 %v9535_v28  ;;  %v9591_v28 = vcombine.low %v4200_v17, %v4204_v15  ;;  %v4257_v17 = vld [vmem:[#allocation7 + $0xd98] sm:$0xff] }
 0x4a9   :  { %7992 = vmatpush1.bf16.msra.mxu1 %v9537_v36  ;;  %7788 = vmatprep.subr.bf16.mxu0 %v9544_v10  ;;  %v9593_v36 = vcombine.low %v4201_v18, %v4205_v53  ;;  %v9600_v10 = vcombine.high %v4208_v13, %v4212_v62  ;;  %v4261_v15 = vld [vmem:[#allocation7 + $0xdb8] sm:$0xff]  ;;  %v9641_v53 = vcombine.low %v4249_v7, %v4253_v58  ;;  %v4268_v13 = vld [vmem:[#allocation7 + $0xdf0] sm:$0xff] }
 0x4aa   :  { %7993 = vmatprep.subr.bf16.mxu1 %v9546_v48  ;;  %v9602_v48 = vcombine.high %v4209_v54, %v4213_v27 }
 0x4ac   :  { %7789 = vmatpush1.bf16.msra.mxu0 %v9543_v19  ;;  %v4221_v19 = vld [vmem:[#allocation7 + $0xc78] sm:$0xff] }
 0x4ad   :  { %7994 = vmatpush1.bf16.msra.mxu1 %v9545_v37  ;;  %7790 = vmatprep.subr.bf16.mxu0 %v9552_v61  ;;  %v9601_v37 = vcombine.low %v4209_v54, %v4213_v27  ;;  %v9608_v61 = vcombine.high %v4216_v0, %v4220_v1  ;;  %v9610_v3 = vcombine.high %v4217_v49, %v4221_v19  ;;  %v4265_v27 = vld [vmem:[#allocation7 + $0xdd8] sm:$0xff] }
 0x4ae   :  { %7995 = vmatprep.subr.bf16.mxu1 %v9554_v47  ;;  %v4224_v47 = vld [vmem:[#allocation7 + $0xc90] sm:$0xff] }
 0x4b0   :  { %7791 = vmatpush1.bf16.msra.mxu0 %v9551_v40  ;;  %v9607_v40 = vcombine.low %v4216_v0, %v4220_v1 }
 0x4b1   :  { %7996 = vmatpush1.bf16.msra.mxu1 %v9553_v30  ;;  %7792 = vmatprep.subr.bf16.mxu0 %v9560_v31  ;;  %v9609_v30 = vcombine.low %v4217_v49, %v4221_v19  ;;  %v9616_v31 = vcombine.high %v4224_v47, %v4228_v52  ;;  %v9649_v19 = vcombine.low %v4257_v17, %v4261_v15 }
 0x4b2   :  { %7997 = vmatprep.subr.bf16.mxu1 %v9562_v42  ;;  %v9618_v42 = vcombine.high %v4225_v23, %v4229_v25 }
 0x4b4   :  { %7793 = vmatpush1.bf16.msra.mxu0 %v9559_v38  ;;  %v9615_v38 = vcombine.low %v4224_v47, %v4228_v52  ;;  %v4272_v52 = vld [vmem:[#allocation7 + $0xe10] sm:$0xff] }
 0x4b5   :  { %7998 = vmatpush1.bf16.msra.mxu1 %v9561_v45  ;;  %7794 = vmatprep.subr.bf16.mxu0 %v9568_v33  ;;  %v9624_v45 = vcombine.high %v4232_v46, %v4236_v2  ;;  %v9626_v33 = vcombine.high %v4233_v4, %v4237_v43  ;;  %v4281_v4 = vld [vmem:[#allocation7 + $0xe58] sm:$0xff] }
 0x4b6   :  { %7999 = vmatprep.subr.bf16.mxu1 %v9570_v34  ;;  %v4240_v34 = vld [vmem:[#allocation7 + $0xd10] sm:$0xff]  ;;  %v4285_v43 = vld [vmem:[#allocation7 + $0xe78] sm:$0xff] }
 0x4b7   :  { %v9631_v59 = vcombine.low %v4240_v34, %v4244_v14 }
 0x4b8   :  { %7795 = vmatpush1.bf16.msra.mxu0 %v9567_v51  ;;  %v9632_v51 = vcombine.high %v4240_v34, %v4244_v14  ;;  %v4288_v34 = vld [vmem:[#allocation7 + $0xe90] sm:$0xff] }
 0x4b9   :  { %8000 = vmatpush1.bf16.msra.mxu1 %v9569_v56  ;;  %7796 = vmatprep.subr.bf16.mxu0 %v9576_v41  ;;  %v9634_v56 = vcombine.high %v4241_v35, %v4245_v39  ;;  %v4248_v41 = vld [vmem:[#allocation7 + $0xd50] sm:$0xff]  ;;  %v4289_v35 = vld [vmem:[#allocation7 + $0xe98] sm:$0xff] }
 0x4ba   :  { %8001 = vmatprep.subr.bf16.mxu1 %v9578_v57  ;;  %v4252_v57 = vld [vmem:[#allocation7 + $0xd70] sm:$0xff]  ;;  %v4293_v39 = vld [vmem:[#allocation7 + $0xeb8] sm:$0xff] }
 0x4bb   :  { %v9639_v18 = vcombine.low %v4248_v41, %v4252_v57  ;;  %v4292_v14 = vld [vmem:[#allocation7 + $0xeb0] sm:$0xff] }
 0x4bc   :  { %7797 = vmatpush1.bf16.msra.mxu0 %v9575_v60  ;;  %v9640_v60 = vcombine.high %v4248_v41, %v4252_v57  ;;  %v4296_v41 = vld [vmem:[#allocation7 + $0xed0] sm:$0xff] }
 0x4bd   :  { %8002 = vmatpush1.bf16.msra.mxu1 %v9577_v20  ;;  %7798 = vmatprep.subr.bf16.mxu0 %v9584_v22  ;;  %v9642_v20 = vcombine.high %v4249_v7, %v4253_v58  ;;  %v4256_v22 = vld [vmem:[#allocation7 + $0xd90] sm:$0xff]  ;;  %v4297_v7 = vld [vmem:[#allocation7 + $0xed8] sm:$0xff] }
 0x4be   :  { %8003 = vmatprep.subr.bf16.mxu1 %v9586_v12  ;;  %v4260_v12 = vld [vmem:[#allocation7 + $0xdb0] sm:$0xff]  ;;  %v4301_v58 = vld [vmem:[#allocation7 + $0xef8] sm:$0xff] }
 0x4bf   :  { %v9647_v0 = vcombine.low %v4256_v22, %v4260_v12  ;;  %v4300_v57 = vld [vmem:[#allocation7 + $0xef0] sm:$0xff] }
 0x4c0   :  { %7799 = vmatpush1.bf16.msra.mxu0 %v9583_v24  ;;  %v9648_v24 = vcombine.high %v4256_v22, %v4260_v12  ;;  %v4304_v22 = vld [vmem:[#allocation7 + $0xf10] sm:$0xff] }
 0x4c1   :  { %8004 = vmatpush1.bf16.msra.mxu1 %v9585_v26  ;;  %7800 = vmatprep.subr.bf16.mxu0 %v9592_v8  ;;  %v9650_v8 = vcombine.high %v4257_v17, %v4261_v15  ;;  %v4308_v12 = vld [vmem:[#allocation7 + $0xf30] sm:$0xff]  ;;  %v4305_v17 = vld [vmem:[#allocation7 + $0xf18] sm:$0xff] }
 0x4c2   :  { %8005 = vmatprep.subr.bf16.mxu1 %v9594_v63  ;;  %v4264_v63 = vld [vmem:[#allocation7 + $0xdd0] sm:$0xff]  ;;  %v4309_v15 = vld [vmem:[#allocation7 + $0xf38] sm:$0xff] }
 0x4c4   :  { %7801 = vmatpush1.bf16.msra.mxu0 %v9591_v28  ;;  %v4269_v28 = vld [vmem:[#allocation7 + $0xdf8] sm:$0xff] }
 0x4c5   :  { %8006 = vmatpush1.bf16.msra.mxu1 %v9593_v36  ;;  %7811 = vmatprep.subr.bf16.mxu0 %v9600_v10  ;;  %v9658_v47 = vcombine.high %v4265_v27, %v4269_v28 }
 0x4c6   :  { %8016 = vmatprep.subr.bf16.mxu1 %v9602_v48 }
 0x4c7   :  { %7803 = vmatmul.mubr.bf16.vlgmr.msra.gmra.mrb[40].mxu0 %v11481_v21 }
 0x4c8   :  { %8008 = vmatmul.mubr.bf16.vlgmr.msra.gmra.mrb[40].mxu1 %v11481_v21  ;;  %7812 = vmatpush1.bf16.msra.mxu0 %v9599_v11  ;;  %v9617_v21 = vcombine.low %v4225_v23, %v4229_v25  ;;  %v4273_v23 = vld [vmem:[#allocation7 + $0xe18] sm:$0xff] }
 0x4c9   :  { %7843 = vmatprep.mubr.bf16.mxu0 %v11483_v5  ;;  %8017 = vmatpush1.bf16.msra.mxu1 %v9601_v37  ;;  %v9656_v37 = vcombine.high %v4264_v63, %v4268_v13  ;;  %v4277_v25 = vld [vmem:[#allocation7 + $0xe38] sm:$0xff] }
 0x4ca   :  { %8048 = vmatprep.mubr.bf16.mxu1 %v11483_v5  ;;  %7813 = vmatprep.subr.bf16.mxu0 %v9608_v61  ;;  %v9623_v5 = vcombine.low %v4232_v46, %v4236_v2  ;;  %v4280_v46 = vld [vmem:[#allocation7 + $0xe50] sm:$0xff] }
 0x4cb   :  { %8018 = vmatprep.subr.bf16.mxu1 %v9610_v3  ;;  %v4276_v3 = vld [vmem:[#allocation7 + $0xe30] sm:$0xff] }
 0x4cc   :  { %7814 = vmatpush1.bf16.msra.mxu0 %v9607_v40  ;;  %v9655_v40 = vcombine.low %v4264_v63, %v4268_v13  ;;  %v4284_v2 = vld [vmem:[#allocation7 + $0xe70] sm:$0xff] }
 0x4cd   :  { %8019 = vmatpush1.bf16.msra.mxu1 %v9609_v30  ;;  %7815 = vmatprep.subr.bf16.mxu0 %v9616_v31  ;;  %v9657_v30 = vcombine.low %v4265_v27, %v4269_v28  ;;  %v9664_v31 = vcombine.high %v4272_v52, %v4276_v3  ;;  %v4312_v63 = vld [vmem:[#allocation7 + $0xf50] sm:$0xff]  ;;  %v4313_v27 = vld [vmem:[#allocation7 + $0xf58] sm:$0xff] }
 0x4ce   :  { %8020 = vmatprep.subr.bf16.mxu1 %v9618_v42  ;;  %v9666_v42 = vcombine.high %v4273_v23, %v4277_v25  ;;  %v4316_v13 = vld [vmem:[#allocation7 + $0xf70] sm:$0xff]  ;;  %v4317_v28 = vld [vmem:[#allocation7 + $0xf78] sm:$0xff] }
 0x4d0   :  { %7816 = vmatpush1.bf16.msra.mxu0 %v9615_v38  ;;  %v9663_v38 = vcombine.low %v4272_v52, %v4276_v3  ;;  %v9703_v52 = vcombine.low %v4312_v63, %v4316_v13  ;;  %v9705_v3 = vcombine.low %v4313_v27, %v4317_v28 }
 0x4d1   :  { %8021 = vmatpush1.bf16.msra.mxu1 %v9617_v21  ;;  %7817 = vmatprep.subr.bf16.mxu0 %v9624_v45  ;;  %v9665_v21 = vcombine.low %v4273_v23, %v4277_v25  ;;  %v9672_v45 = vcombine.high %v4280_v46, %v4284_v2 }
 0x4d2   :  { %8022 = vmatprep.subr.bf16.mxu1 %v9626_v33  ;;  %v9674_v33 = vcombine.high %v4281_v4, %v4285_v43 }
 0x4d4   :  { %7818 = vmatpush1.bf16.msra.mxu0 %v9623_v5  ;;  %v9671_v5 = vcombine.low %v4280_v46, %v4284_v2 }
 0x4d5   :  { %8023 = vmatpush1.bf16.msra.mxu1 %v9625_v50  ;;  %7819 = vmatprep.subr.bf16.mxu0 %v9632_v51  ;;  %v9673_v50 = vcombine.low %v4281_v4, %v4285_v43  ;;  %v9680_v51 = vcombine.high %v4288_v34, %v4292_v14 }
 0x4d6   :  { %8024 = vmatprep.subr.bf16.mxu1 %v9634_v56  ;;  %v9682_v56 = vcombine.high %v4289_v35, %v4293_v39 }
 0x4d8   :  { %7820 = vmatpush1.bf16.msra.mxu0 %v9631_v59  ;;  %v9679_v59 = vcombine.low %v4288_v34, %v4292_v14 }
 0x4d9   :  { %8025 = vmatpush1.bf16.msra.mxu1 %v9633_v6  ;;  %7821 = vmatprep.subr.bf16.mxu0 %v9640_v60  ;;  %v9681_v6 = vcombine.low %v4289_v35, %v4293_v39  ;;  %v9688_v60 = vcombine.high %v4296_v41, %v4300_v57 }
 0x4da   :  { %v11516_v26 = vpop.f32.mrb[36].mxu0  ;;  %8026 = vmatprep.subr.bf16.mxu1 %v9642_v20  ;;  %v9690_v20 = vcombine.high %v4297_v7, %v4301_v58 }
 0x4db   :  { %v11518_v62 = vpop.f32.mrb[36].mxu1  ;;  %v11520_v54 = vpop.f32.mrb[37].mxu0 }
 0x4dc   :  { %v8098_v36 = vmax.f32 %v11516_v26, %v11518_v62  ;;  %v11524_v10 = vpop.f32.mrb[37].mxu1  ;;  %v7480_v48 = vpop.f32.mrb[38].mxu0  ;;  %7822 = vmatpush1.bf16.msra.mxu0 %v9639_v18  ;;  %v9687_v18 = vcombine.low %v4296_v41, %v4300_v57  ;;  %v8309_v26 = vld [vmem:[%s11725_s7 + $0x58] sm:$0xff] }
 0x4dd   :  { %v8099_v1 = vmax.f32 %v11520_v54, %v11524_v10  ;;  %v7685_v11 = vpop.f32.mrb[38].mxu1  ;;  %8027 = vmatpush1.bf16.msra.mxu1 %v9641_v53  ;;  %v7481_v49 = vpop.f32.mrb[39].mxu0  ;;  %7823 = vmatprep.subr.bf16.mxu0 %v9648_v24  ;;  %v9689_v53 = vcombine.low %v4297_v7, %v4301_v58  ;;  %v9696_v24 = vcombine.high %v4304_v22, %v4308_v12  ;;  %v8310_v54 = vld [vmem:[%s11725_s7 + $0x60] sm:$0xf] }
 0x4de   :  { %v7686_v61 = vpop.f32.mrb[39].mxu1  ;;  %8028 = vmatprep.subr.bf16.mxu1 %v9650_v8  ;;  %v9698_v8 = vcombine.high %v4305_v17, %v4309_v15  ;;  %v9695_v48 = vcombine.low %v4304_v22, %v4308_v12  ;;  %v9704_v11 = vcombine.high %v4312_v63, %v4316_v13  ;;  %v9706_v49 = vcombine.high %v4313_v27, %v4317_v28  ;;  %v4368_v28 = vld [vmem:[#allocation7 + $0x1110] sm:$0xff] }
 0x4df   :  { %v4321_v61 = vld [vmem:[#allocation7 + $0xf98] sm:$0xff] }
 0x4e0   :  { %7824 = vmatpush1.bf16.msra.mxu0 %v9647_v0  ;;  %v9697_v0 = vcombine.low %v4305_v17, %v4309_v15 }
 0x4e1   :  { %8029 = vmatpush1.bf16.msra.mxu1 %v9649_v19  ;;  %7825 = vmatprep.subr.bf16.mxu0 %v9656_v37  ;;  %v4320_v19 = vld [vmem:[#allocation7 + $0xf90] sm:$0xff] }
 0x4e2   :  { %8030 = vmatprep.subr.bf16.mxu1 %v9658_v47  ;;  %v4324_v37 = vld [vmem:[#allocation7 + $0xfb0] sm:$0xff]  ;;  %v4325_v47 = vld [vmem:[#allocation7 + $0xfb8] sm:$0xff] }
 0x4e3   :  { %v9712_v23 = vcombine.high %v4320_v19, %v4324_v37  ;;  %v9714_v25 = vcombine.high %v4321_v61, %v4325_v47  ;;  %v9711_v46 = vcombine.low %v4320_v19, %v4324_v37  ;;  %v9713_v2 = vcombine.low %v4321_v61, %v4325_v47  ;;  %v4376_v61 = vld [vmem:[#allocation7 + $0x1150] sm:$0xff] }
 0x4e4   :  { %7826 = vmatpush1.bf16.msra.mxu0 %v9655_v40  ;;  %v4328_v40 = vld [vmem:[#allocation7 + $0xfd0] sm:$0xff] }
 0x4e5   :  { %8031 = vmatpush1.bf16.msra.mxu1 %v9657_v30  ;;  %7827 = vmatprep.subr.bf16.mxu0 %v9664_v31  ;;  %v4332_v30 = vld [vmem:[#allocation7 + $0xff0] sm:$0xff]  ;;  %v4329_v31 = vld [vmem:[#allocation7 + $0xfd8] sm:$0xff] }
 0x4e6   :  { %8032 = vmatprep.subr.bf16.mxu1 %v9666_v42  ;;  %v4333_v42 = vld [vmem:[#allocation7 + $0xff8] sm:$0xff]  ;;  %v9720_v4 = vcombine.high %v4328_v40, %v4332_v30  ;;  %v9719_v34 = vcombine.low %v4328_v40, %v4332_v30  ;;  %v4380_v47 = vld [vmem:[#allocation7 + $0x1170] sm:$0xff] }
 0x4e7   :  { %v9722_v43 = vcombine.high %v4329_v31, %v4333_v42  ;;  %v9721_v14 = vcombine.low %v4329_v31, %v4333_v42  ;;  %v9768_v40 = vcombine.high %v4376_v61, %v4380_v47  ;;  %v4384_v31 = vld [vmem:[#allocation7 + $0x1190] sm:$0xff] }
 0x4e8   :  { %7828 = vmatpush1.bf16.msra.mxu0 %v9663_v38  ;;  %v4336_v38 = vld [vmem:[#allocation7 + $0x1010] sm:$0xff] }
 0x4e9   :  { %8033 = vmatpush1.bf16.msra.mxu1 %v9665_v21  ;;  %7829 = vmatprep.subr.bf16.mxu0 %v9672_v45  ;;  %v4340_v21 = vld [vmem:[#allocation7 + $0x1030] sm:$0xff]  ;;  %v4337_v45 = vld [vmem:[#allocation7 + $0x1018] sm:$0xff] }
 0x4ea   :  { %8034 = vmatprep.subr.bf16.mxu1 %v9674_v33  ;;  %v4341_v33 = vld [vmem:[#allocation7 + $0x1038] sm:$0xff]  ;;  %v9728_v35 = vcombine.high %v4336_v38, %v4340_v21  ;;  %v9727_v41 = vcombine.low %v4336_v38, %v4340_v21  ;;  %v4388_v42 = vld [vmem:[#allocation7 + $0x11b0] sm:$0xff] }
 0x4eb   :  { %v9730_v39 = vcombine.high %v4337_v45, %v4341_v33  ;;  %v9729_v57 = vcombine.low %v4337_v45, %v4341_v33  ;;  %v9776_v38 = vcombine.high %v4384_v31, %v4388_v42  ;;  %v4392_v45 = vld [vmem:[#allocation7 + $0x11d0] sm:$0xff] }
 0x4ec   :  { %7830 = vmatpush1.bf16.msra.mxu0 %v9671_v5  ;;  %v4344_v5 = vld [vmem:[#allocation7 + $0x1050] sm:$0xff] }
 0x4ed   :  { %8035 = vmatpush1.bf16.msra.mxu1 %v9673_v50  ;;  %7831 = vmatprep.subr.bf16.mxu0 %v9680_v51  ;;  %v4348_v50 = vld [vmem:[#allocation7 + $0x1070] sm:$0xff]  ;;  %v4345_v51 = vld [vmem:[#allocation7 + $0x1058] sm:$0xff] }
 0x4ee   :  { %8036 = vmatprep.subr.bf16.mxu1 %v9682_v56  ;;  %v4349_v56 = vld [vmem:[#allocation7 + $0x1078] sm:$0xff]  ;;  %v9736_v7 = vcombine.high %v4344_v5, %v4348_v50  ;;  %v9735_v22 = vcombine.low %v4344_v5, %v4348_v50  ;;  %v4396_v33 = vld [vmem:[#allocation7 + $0x11f0] sm:$0xff] }
 0x4ef   :  { %v9738_v58 = vcombine.high %v4345_v51, %v4349_v56  ;;  %v9737_v12 = vcombine.low %v4345_v51, %v4349_v56  ;;  %v9784_v5 = vcombine.high %v4392_v45, %v4396_v33  ;;  %v9783_v51 = vcombine.low %v4392_v45, %v4396_v33 }
 0x4f0   :  { %7832 = vmatpush1.bf16.msra.mxu0 %v9679_v59  ;;  %v4352_v59 = vld [vmem:[#allocation7 + $0x1090] sm:$0xff] }
 0x4f1   :  { %8037 = vmatpush1.bf16.msra.mxu1 %v9681_v6  ;;  %7833 = vmatprep.subr.bf16.mxu0 %v9688_v60  ;;  %v4356_v6 = vld [vmem:[#allocation7 + $0x10b0] sm:$0xff]  ;;  %v4353_v60 = vld [vmem:[#allocation7 + $0x1098] sm:$0xff] }
 0x4f2   :  { %8038 = vmatprep.subr.bf16.mxu1 %v9690_v20  ;;  %v4357_v20 = vld [vmem:[#allocation7 + $0x10b8] sm:$0xff]  ;;  %v9744_v17 = vcombine.high %v4352_v59, %v4356_v6  ;;  %v9743_v63 = vcombine.low %v4352_v59, %v4356_v6 }
 0x4f3   :  { %v9746_v15 = vcombine.high %v4353_v60, %v4357_v20  ;;  %v10763_v59 = vld [vmem:[%s11723_s5 + $0x50] sm:$0xff]  }
 0x4f4   :  { %7834 = vmatpush1.bf16.msra.mxu0 %v9687_v18  ;;  %v4360_v18 = vld [vmem:[#allocation7 + $0x10d0] sm:$0xff] }
 0x4f5   :  { %8039 = vmatpush1.bf16.msra.mxu1 %v9689_v53  ;;  %7835 = vmatprep.subr.bf16.mxu0 %v9696_v24  ;;  %v4364_v53 = vld [vmem:[#allocation7 + $0x10f0] sm:$0xff]  ;;  %v4361_v24 = vld [vmem:[#allocation7 + $0x10d8] sm:$0xff] }
 0x4f6   :  { %8040 = vmatprep.subr.bf16.mxu1 %v9698_v8  ;;  %v4365_v8 = vld [vmem:[#allocation7 + $0x10f8] sm:$0xff]  ;;  %v9752_v13 = vcombine.high %v4360_v18, %v4364_v53 }
 0x4f7   :  { %v9754_v27 = vcombine.high %v4361_v24, %v4365_v8  ;;  %v9753_v19 = vcombine.low %v4361_v24, %v4365_v8  ;;  %v10764_v6 = vld [vmem:[%s11723_s5 + $0x10] sm:$0xff]   ;;  %v10774_v24 = vld [vmem:[%s11723_s5 + $0x38] sm:$0xff]   ;;  %v8298_v8 = vld [vmem:[%s11725_s7] sm:$0xff] }
 0x4f8   :  { %7836 = vmatpush1.bf16.msra.mxu0 %v9695_v48  ;;  %v4372_v48 = vld [vmem:[#allocation7 + $0x1130] sm:$0xff] }
 0x4f9   :  { %8041 = vmatpush1.bf16.msra.mxu1 %v9697_v0  ;;  %7837 = vmatprep.subr.bf16.mxu0 %v9704_v11  ;;  %v4369_v0 = vld [vmem:[#allocation7 + $0x1118] sm:$0xff]  ;;  %v9760_v37 = vcombine.high %v4368_v28, %v4372_v48 }
 0x4fa   :  { %8042 = vmatprep.subr.bf16.mxu1 %v9706_v49  ;;  %v4373_v11 = vld [vmem:[#allocation7 + $0x1138] sm:$0xff]  ;;  %v9751_v49 = vcombine.low %v4360_v18, %v4364_v53 }
 0x4fb   :  { %v10772_v18 = vld [vmem:[%s11723_s5 + $0x30] sm:$0xff]   ;;  %v10773_v53 = vld [vmem:[%s11723_s5 + $0x78] sm:$0xff]  }
 0x4fc   :  { %7838 = vmatpush1.bf16.msra.mxu0 %v9703_v52  ;;  %v4377_v52 = vld [vmem:[#allocation7 + $0x1158] sm:$0xff] }
 0x4fd   :  { %8043 = vmatpush1.bf16.msra.mxu1 %v9705_v3  ;;  %7839 = vmatprep.subr.bf16.mxu0 %v9712_v23  ;;  %v4381_v3 = vld [vmem:[#allocation7 + $0x1178] sm:$0xff]  ;;  %v9759_v23 = vcombine.low %v4368_v28, %v4372_v48 }
 0x4fe   :  { %8044 = vmatprep.subr.bf16.mxu1 %v9714_v25  ;;  %v9761_v25 = vcombine.low %v4369_v0, %v4373_v11  ;;  %v9770_v30 = vcombine.high %v4377_v52, %v4381_v3  ;;  %v8301_v28 = vld [vmem:[%s11725_s7 + $0x18] sm:$0xff] }
 0x500   :  { %7840 = vmatpush1.bf16.msra.mxu0 %v9711_v46  ;;  %v4385_v46 = vld [vmem:[#allocation7 + $0x1198] sm:$0xff] }
 0x501   :  { %8045 = vmatpush1.bf16.msra.mxu1 %v9713_v2  ;;  %7841 = vmatprep.subr.bf16.mxu0 %v9720_v4  ;;  %v4389_v2 = vld [vmem:[#allocation7 + $0x11b8] sm:$0xff]  ;;  %v9767_v4 = vcombine.low %v4376_v61, %v4380_v47  ;;  %v8306_v61 = vld [vmem:[%s11725_s7 + $0x40] sm:$0xff]  ;;  %v8307_v47 = vld [vmem:[%s11725_s7 + $0x48] sm:$0xff] }
 0x502   :  { %8046 = vmatprep.subr.bf16.mxu1 %v9722_v43  ;;  %v9769_v43 = vcombine.low %v4377_v52, %v4381_v3  ;;  %v9778_v21 = vcombine.high %v4385_v46, %v4389_v2  ;;  %v9956_v52 = vpack.c.bf16 %v8307_v47, %v8306_v61  ;;  %v8104_v3 = vld [vmem:[#allocation8] sm:$0x3]  ;;  %v8594_v47 = vld [vmem:[%s11730_s12 + $0x30] sm:$0xff] }
 0x504   :  { %7842 = vmatpush1.bf16.msra.mxu0 %v9719_v34  ;;  %v4393_v34 = vld [vmem:[#allocation7 + $0x11d8] sm:$0xff] }
 0x505   :  { %8047 = vmatpush1.bf16.msra.mxu1 %v9721_v14  ;;  %7852 = vmatprep.subr.bf16.mxu0 %v9728_v35  ;;  %v4397_v14 = vld [vmem:[#allocation7 + $0x11f8] sm:$0xff]  ;;  %v9775_v35 = vcombine.low %v4384_v31, %v4388_v42  ;;  %v8109_v31 = vrot.slane %v8104_v3, %v11392_v44 }
 0x506   :  { %8057 = vmatprep.subr.bf16.mxu1 %v9730_v39  ;;  %v9777_v39 = vcombine.low %v4385_v46, %v4389_v2  ;;  %v9786_v50 = vcombine.high %v4393_v34, %v4397_v14  ;;  %v9785_v56 = vcombine.low %v4393_v34, %v4397_v14 }
 0x507   :  { %7844 = vmatmul.mubr.bf16.vlgmr.msra.gmra.mrb[40].mxu0 %v11491_v55 }
 0x508   :  { %8049 = vmatmul.mubr.bf16.vlgmr.msra.gmra.mrb[40].mxu1 %v11491_v55  ;;  %7853 = vmatpush1.bf16.msra.mxu0 %v9727_v41  ;;  %v9745_v55 = vcombine.low %v4353_v60, %v4357_v20  ;;  %v10759_v41 = vld [vmem:[%s11723_s5 + $0x40] sm:$0xff]   ;;  %v10766_v60 = vld [vmem:[%s11723_s5 + $0x18] sm:$0xff]  }
 0x509   :  { %8058 = vmatpush1.bf16.msra.mxu1 %v9729_v57  ;;  %7854 = vmatprep.subr.bf16.mxu0 %v9736_v7  ;;  %v10760_v57 = vld [vmem:[%s11723_s5] sm:$0xff]   ;;  %v10761_v7 = vld [vmem:[%s11723_s5 + $0x48] sm:$0xff]  }
 0x50a   :  { %8059 = vmatprep.subr.bf16.mxu1 %v9738_v58  ;;  %7884 = vmatprep.mubr.bf16.mxu0 %v10999_v9  ;;  %v10762_v58 = vld [vmem:[%s11723_s5 + $0x8] sm:$0xff]   ;;  %v10767_v20 = vld [vmem:[%s11723_s5 + $0x60] sm:$0xff]  }
 0x50b   :  { %8089 = vmatprep.mubr.bf16.mxu1 %v10999_v9  ;;  %v9762_v9 = vcombine.high %v4369_v0, %v4373_v11  ;;  %v8302_v0 = vld [vmem:[%s11725_s7 + $0x20] sm:$0xff]  ;;  %v8303_v11 = vld [vmem:[%s11725_s7 + $0x28] sm:$0xff] }
 0x50c   :  { %7855 = vmatpush1.bf16.msra.mxu0 %v9735_v22  ;;  %v10768_v22 = vld [vmem:[%s11723_s5 + $0x20] sm:$0xff]  }
 0x50d   :  { %8060 = vmatpush1.bf16.msra.mxu1 %v9737_v12  ;;  %7856 = vmatprep.subr.bf16.mxu0 %v9744_v17  ;;  %v10769_v12 = vld [vmem:[%s11723_s5 + $0x68] sm:$0xff]  }
 0x50e   :  { %8061 = vmatprep.subr.bf16.mxu1 %v9746_v15  ;;  %v10770_v17 = vld [vmem:[%s11723_s5 + $0x28] sm:$0xff]   ;;  %v10771_v15 = vld [vmem:[%s11723_s5 + $0x70] sm:$0xff]  }
 0x510   :  { %7857 = vmatpush1.bf16.msra.mxu0 %v9743_v63  ;;  %v8299_v63 = vld [vmem:[%s11725_s7 + $0x8] sm:$0xff] }
 0x511   :  { %8062 = vmatpush1.bf16.msra.mxu1 %v9745_v55  ;;  %7858 = vmatprep.subr.bf16.mxu0 %v9752_v13  ;;  %v8300_v55 = vld [vmem:[%s11725_s7 + $0x10] sm:$0xff]  ;;  %v11000_v13 = vmov 0.0|0.0  }
 0x512   :  { %8063 = vmatprep.subr.bf16.mxu1 %v9754_v27  ;;  %v9944_v27 = vpack.c.bf16 %v8299_v63, %v8298_v8  ;;  %v9947_v48 = vpack.c.bf16 %v8301_v28, %v8300_v55  ;;  %v8591_v63 = vld [vmem:[%s11730_s12 + $0x18] sm:$0xff] }
 0x514   :  { %7859 = vmatpush1.bf16.msra.mxu0 %v9751_v49  ;;  %v9950_v49 = vpack.c.bf16 %v8303_v11, %v8302_v0  ;;  %v8592_v11 = vld [vmem:[%s11730_s12 + $0x20] sm:$0xff] }
 0x515   :  { %8064 = vmatpush1.bf16.msra.mxu1 %v9753_v19  ;;  %7860 = vmatprep.subr.bf16.mxu0 %v9760_v37  ;;  %v8304_v19 = vld [vmem:[%s11725_s7 + $0x30] sm:$0xff]  ;;  %v8305_v37 = vld [vmem:[%s11725_s7 + $0x38] sm:$0xff] }
 0x516   :  { %8065 = vmatprep.subr.bf16.mxu1 %v9762_v9  ;;  %v9953_v9 = vpack.c.bf16 %v8305_v37, %v8304_v19  ;;  %v8405_v37 = vld [vmem:[#allocation13] sm:$0xff] }
 0x518   :  { %7861 = vmatpush1.bf16.msra.mxu0 %v9759_v23 }
 0x519   :  { %8066 = vmatpush1.bf16.msra.mxu1 %v9761_v25  ;;  %7862 = vmatprep.subr.bf16.mxu0 %v9768_v40 }
 0x51a   :  { %8067 = vmatprep.subr.bf16.mxu1 %v9770_v30 }
 0x51c   :  { %7863 = vmatpush1.bf16.msra.mxu0 %v9767_v4  ;;  %v8113_v4 = vrot.slane %v8104_v3, %v11397_v29 }
 0x51d   :  { %8068 = vmatpush1.bf16.msra.mxu1 %v9769_v43  ;;  %7864 = vmatprep.subr.bf16.mxu0 %v9776_v38 }
 0x51e   :  { %8069 = vmatprep.subr.bf16.mxu1 %v9778_v21 }
 0x520   :  { %7865 = vmatpush1.bf16.msra.mxu0 %v9775_v35 }
 0x521   :  { %8070 = vmatpush1.bf16.msra.mxu1 %v9777_v39  ;;  %7866 = vmatprep.subr.bf16.mxu0 %v9784_v5 }
 0x522   :  { %8071 = vmatprep.subr.bf16.mxu1 %v9786_v50 }
 0x524   :  { %7867 = vmatpush1.bf16.msra.mxu0 %v9783_v51  ;;  %v8308_v51 = vld [vmem:[%s11725_s7 + $0x50] sm:$0xff] }
 0x525   :  { %8072 = vmatpush1.bf16.msra.mxu1 %v9785_v56  ;;  %9815 = vmatprep.subr.bf16.mxu0 %v10759_v41  ;;  %v9959_v62 = vpack.c.bf16 %v8309_v26, %v8308_v51 }
 0x526   :  { %9943 = vmatprep.subr.bf16.mxu1 %v11000_v13 }
 0x527   :  { %7885 = vmatmul.mubr.bf16.vlgmr.msra.gmra.mrb[40].mxu0 %v11498_v32 }
 0x528   :  { %8090 = vmatmul.mubr.bf16.vlgmr.msra.gmra.mrb[40].mxu1 %v11498_v32  ;;  %9816 = vmatpush3.bf16.msra.mxu0 %v10760_v57  ;;  %v10765_v32 = vld [vmem:[%s11723_s5 + $0x58] sm:$0xff]  }
 0x529   :  { %9817 = vmatprep.subr.bf16.mxu0 %v10761_v7  ;;  %9945 = vmatpush3.bf16.msra.mxu1 %v9944_v27 }
 0x52a   :  { %9946 = vmatprep.subr.bf16.mxu1 %v11000_v13 }
 0x52c   :  { %9818 = vmatpush3.bf16.msra.mxu0 %v10762_v58 }
 0x52d   :  { %9819 = vmatprep.subr.bf16.mxu0 %v10763_v59  ;;  %9948 = vmatpush3.bf16.msra.mxu1 %v9947_v48 }
 0x52e   :  { %9949 = vmatprep.subr.bf16.mxu1 %v11000_v13 }
 0x530   :  { %9820 = vmatpush3.bf16.msra.mxu0 %v10764_v6  ;;  %v8407_v6 = vld [vmem:[#allocation14] sm:$0xff] }
 0x531   :  { %9821 = vmatprep.subr.bf16.mxu0 %v10765_v32  ;;  %9951 = vmatpush3.bf16.msra.mxu1 %v9950_v49  ;;  %v8408_v32 = vld [vmem:[#allocation14 + $0x8] sm:$0x3]  ;;  %v8593_v49 = vld [vmem:[%s11730_s12 + $0x28] sm:$0xff] }
 0x532   :  { %9952 = vmatprep.subr.bf16.mxu1 %v11000_v13 }
 0x534   :  { %9822 = vmatpush3.bf16.msra.mxu0 %v10766_v60  ;;  %v9962_v60 = vpack.c.bf16 %v8408_v32, %v8407_v6 }
 0x535   :  { %9823 = vmatprep.subr.bf16.mxu0 %v10767_v20  ;;  %9954 = vmatpush3.bf16.msra.mxu1 %v9953_v9  ;;  %v8406_v9 = vld [vmem:[#allocation13 + $0x8] sm:$0x3] }
 0x536   :  { %9955 = vmatprep.subr.bf16.mxu1 %v11000_v13 }
 0x538   :  { %9824 = vmatpush3.bf16.msra.mxu0 %v10768_v22  ;;  %v11004_v22 = vmov 1983009808  }
 0x539   :  { %9825 = vmatprep.subr.bf16.mxu0 %v10769_v12  ;;  %9957 = vmatpush3.bf16.msra.mxu1 %v9956_v52  ;;  %v8398_v12 = vunpack.c.l.s4 %v11004_v22  ;;  %v8595_v52 = vld [vmem:[%s11730_s12 + $0x38] sm:$0xff] }
 0x53a   :  { %9958 = vmatprep.subr.bf16.mxu1 %v11000_v13 }
 0x53c   :  { %9826 = vmatpush3.bf16.msra.mxu0 %v10770_v17  ;;  %v8399_v17 = vunpack.c.0.s8 %v8398_v12 }
 0x53d   :  { %9827 = vmatprep.subr.bf16.mxu0 %v10771_v15  ;;  %9960 = vmatpush3.bf16.msra.mxu1 %v9959_v62  ;;  %v8588_v15 = vld [vmem:[%s11730_s12] sm:$0xff] }
 0x53e   :  { %v8402_v55 = vsub.s32 %v8399_v17, %v11389_v16  ;;  %v9976_v16 = vpack.c.bf16 %v8593_v49, %v8592_v11 }
 0x540   :  { %9828 = vmatpush3.bf16.msra.mxu0 %v10772_v18  ;;  %v8589_v18 = vld [vmem:[%s11730_s12 + $0x8] sm:$0xff] }
 0x541   :  { %9829 = vmatprep.subr.bf16.mxu0 %v10773_v53  ;;  %v8590_v53 = vld [vmem:[%s11730_s12 + $0x10] sm:$0xff]  ;;  %v9970_v8 = vpack.c.bf16 %v8589_v18, %v8588_v15 }
 0x542   :  { %v9973_v28 = vpack.c.bf16 %v8591_v63, %v8590_v53 }
 0x544   :  { %9830 = vmatpush3.bf16.msra.mxu0 %v10774_v24  ;;  %v9804_v24 = vld [vmem:[#allocation11] ss:$0 sm:$0xff] }
 0x545   :  { %9969 = vmatprep.subr.bf16.mxu0 %v11000_v13 }
 0x5fa   :  { %v7886_v23 = vpop.f32.mrb[40].mxu0 }
 0x5fb   :  { %v8091_v25 = vpop.f32.mrb[40].mxu1  ;;  %v7888_v40 = vpop.f32.mrb[41].mxu0 }
 0x5fc   :  { %v8100_v30 = vmax.f32 %v7886_v23, %v8091_v25  ;;  %v8093_v42 = vpop.f32.mrb[41].mxu1  ;;  %v7890_v46 = vpop.f32.mrb[42].mxu0  ;;  %v9966_v25 = vpack.c.bf16 %v8406_v9, %v8405_v37 }
 0x5fd   :  { %v8101_v2 = vmax.f32 %v7888_v40, %v8093_v42  ;;  %v8095_v43 = vpop.f32.mrb[42].mxu1  ;;  %v7891_v38 = vpop.f32.mrb[43].mxu0  ;;  %v9979_v40 = vpack.c.bf16 %v8595_v52, %v8594_v47  ;;  %v8596_v46 = vld [vmem:[%s11730_s12 + $0x40] sm:$0xff] }
 0x5fe   :  { %v8102_v21 = vmax.f32 %v8098_v36, %v8100_v30  ;;  %v8096_v45 = vpop.f32.mrb[43].mxu1  ;;  %v11001_v36 = vmov 0.0   ;;  %v8599_v43 = vld [vmem:[%s11730_s12 + $0x58] sm:$0xff] }
 0x5ff   :  { %v8103_v33 = vmax.f32 %v8099_v1, %v8101_v2  ;;  %9895 = vmatprep.subr.mxu1 %v11001_v36  ;;  %9897 = vmatprep.mubr.msk.f32.mxu1 %vm11002_vm3, %v11001_v36  ;;  %v9787_v1 = vld [vmem:[#allocation10] ss:$0 sm:$0xff] }
 0x600   :  { %v8116_v34 = vadd.f32 %v8109_v31, %v8102_v21  ;;  %9896 = vmatpush3.msk.msra.mxu1 %vm8322_vm2, %v8310_v54  ;;  %v8600_v21 = vld [vmem:[%s11730_s12 + $0x60] sm:$0xf] }
 0x601   :  { %v8117_v14 = vadd.f32 %v8113_v4, %v8103_v33  ;;  %9961 = vmatprep.subr.bf16.mxu1 %v11000_v13  ;;  %v8598_v4 = vld [vmem:[%s11730_s12 + $0x50] sm:$0xff] }
 0x602   :  { %v8118_v35 = vmax.f32 %v8116_v34, 0.0  ;;  %v9985_v38 = vpack.c.bf16 %v8599_v43, %v8598_v4  ;;  %v9811_v34 = vld [vmem:[#allocation16] ss:$0 sm:$0xff] }
 0x603   :  { %v8119_v39 = vmax.f32 %v8117_v14, 0.0 }
 0x604   :  { %v8120_v50 = vpack.c.bf16 %v8118_v35, %v8118_v35 }
 0x605   :  { %v8121_v5 = vpack.c.bf16 %v8119_v39, %v8119_v39 }
 0x607   :  { %8289 = vmatprep.mubr.bf16.mxu0 %v8121_v5 }
 0x608   :  { %8290 = vmatmul.mubr.bf16.vlgmr.msra.gmra.mrb[44].mxu0 %v8120_v50  ;;  %v9812_v50 = vld [vmem:[#allocation2] ss:$0 sm:$0xff] }
 0x609   :  { %9940 = vmatprep.mubr.msk.f32.mxu0 %vm11002_vm3, %v11001_v36  ;;  %9971 = vmatpush3.bf16.msra.mxu0 %v9970_v8 }
 0x60a   :  { %9972 = vmatprep.subr.bf16.mxu0 %v11000_v13 }
 0x60d   :  { %9974 = vmatpush3.bf16.msra.mxu0 %v9973_v28 }
 0x60e   :  { %9975 = vmatprep.subr.bf16.mxu0 %v11000_v13 }
 0x611   :  { %9977 = vmatpush3.bf16.msra.mxu0 %v9976_v16 }
 0x612   :  { %9978 = vmatprep.subr.bf16.mxu0 %v11000_v13 }
 0x615   :  { %9980 = vmatpush3.bf16.msra.mxu0 %v9979_v40 }
 0x616   :  { %9981 = vmatprep.subr.bf16.mxu0 %v11000_v13 }
 0x6db   :  { %v9831_v10 = vpop.f32.mrb[44].mxu0 }
 0x6dc   :  { %v9832_v56 = vpop.f32.mrb[45].mxu0 }
 0x6dd   :  { %v9833_v41 = vadd.f32 %v9832_v56, %v9831_v10  ;;  %v9834_v57 = vpop.f32.mrb[46].mxu0 }
 0x6de   :  { %v9835_v7 = vpop.f32.mrb[47].mxu0 }
 0x6df   :  { %v8292_v58 = vadd.f32 %v9833_v41, %v9787_v1 }
 0x6e1   :  { %v8297_v59 = vmax.f32 %v8292_v58, 0.0 }
 0x6e3   :  { %9898 = vmatmul.mubr.msk.f32.vlgmr.msra.gmra.mrb[44].mxu1 %vm8318_vm4, %v8297_v59 }
 0x6e4   :  { %9904 = vmatprep.mubr.msk.f32.mxu1 %vm11002_vm3, %v11001_v36  ;;  %9964 = vmatpush3.bf16.msk.msra.mxu1 %vm11647_vm6, %v9962_v60 }
 0x6e5   :  { %9965 = vmatprep.subr.bf16.mxu1 %v11000_v13 }
 0x7b6   :  { %v8392_v27 = vpop.f32.mrb[44].mxu1 }
 0x7b7   :  { %v8393_v48 = vadd.f32 %v9804_v24, %v8392_v27  ;;  %v9899_v0 = vpop.f32.mrb[45].mxu1 }
 0x7b9   :  { %v8403_v19 = vrot.slane %v8393_v48, %v8402_v55 }
 0x7bb   :  { %v8404_v61 = vcombine.high %v8403_v19, %v8403_v19  ;;  %v8412_v3 = vrot.slane %v8403_v19, %v11397_v29  ;;  %v8498_v42 = vrot.slane %v8403_v19, %v11392_v44 }
 0x7bd   :  { %v8416_v23 = vrot.slane %v8404_v61, %v11397_v29  ;;  %v8502_v31 = vrot.slane %v8404_v61, %v11392_v44  ;;  %v8597_v44 = vld [vmem:[%s11730_s12 + $0x48] sm:$0xff] }
 0x7be   :  { %v9982_v2 = vpack.c.bf16 %v8597_v44, %v8596_v46 }
 0x7bf   :  { %v8418_v30 = vsel %vm8417_vm7, %v8416_v23, %v8412_v3  ;;  %v8503_v29 = vsel %vm8417_vm7, %v8502_v31, %v8498_v42 }
 0x7c0   :  { %8685 = vrot.lane.b32.xlu0 %v8418_v30, %s11005_s29  ;;  %9905 = vmatmul.mubr.msk.f32.vlgmr.msra.gmra.mrb[46].mxu1 %vm8419_vm8, %v8418_v30 }
 0x7c1   :  { %9968 = vmatpush3.bf16.msk.msra.mxu1 %vm11647_vm6, %v9966_v25  ;;  %9911 = vmatprep.mubr.msk.f32.mxu1 %vm11002_vm3, %v11001_v36 }
 0x7c2   :  { %9983 = vmatpush3.bf16.msra.mxu0 %v9982_v2 }
 0x7c3   :  { %9984 = vmatprep.subr.bf16.mxu0 %v11000_v13 }
 0x7c4   :  { %9912 = vmatmul.mubr.msk.f32.vlgmr.msra.gmra.mrb[48].mxu1 %vm8419_vm8, %v8503_v29 }
 0x7c6   :  { %9986 = vmatpush3.bf16.msra.mxu0 %v9985_v38 }
 0x7c7   :  { %9938 = vmatprep.subr.mxu0 %v11001_v36 }
 0x7ca   :  { %9939 = vmatpush3.msk.msra.mxu0 %vm8322_vm2, %v8600_v21 }
 0x832   :  { %v8686_v54 = vpop.permute.xlu0 %8685 }
 0x833   :  { %v8692_v36 = vsel %vm8419_vm8, %v8503_v29, %v8686_v54 }
 0x893   :  { %v8491_v45 = vpop.f32.mrb[46].mxu1 }
 0x894   :  { %v9906_v13 = vpop.f32.mrb[47].mxu1 }
 0x897   :  { %v8575_v33 = vpop.f32.mrb[48].mxu1 }
 0x898   :  { %v8576_v14 = vadd.f32 %v8575_v33, %v8491_v45  ;;  %v9913_v35 = vpop.f32.mrb[49].mxu1 }
 0x89a   :  { %v8586_v39 = vadd.f32 %v9811_v34, %v8576_v14 }
 0x89c   :  { %v8587_v5 = vmax.f32 %v8586_v39, 0.0 }
 0x89e   :  { %9941 = vmatmul.mubr.msk.f32.vlgmr.msra.gmra.mrb[48].mxu0 %vm8318_vm4, %v8587_v5 }
 0x971   :  { %v8680_v51 = vpop.f32.mrb[48].mxu0 }
 0x972   :  { %v8681_v26 = vadd.f32 %v9812_v50, %v8680_v51  ;;  %v9942_v62 = vpop.f32.mrb[49].mxu0 }
 0x974   :  { %8689 = vrot.lane.b32.xlu0 %v8681_v26, %s11006_s4 }
 0x9e6   :  { %v8690_v10 = vpop.permute.xlu0 %8689 }
 0x9e7   :  { %v8694_v1 = vsel %vm8693_vm9, %v8692_v36, %v8690_v10 }
 0x9e8   :  { %8696 = vst.msk [vmem:[%s11732_s14] sm:$0x3] %vm8695_vm10, %v8694_v1 }
 0x9e9   :  { %8701 = vsyncpa [#allocation4], 1 }
 0x9ea   :  { %8702 = vsyncpa [#allocation6], 1 }
 0x9eb   :  { %8703 = vsyncpa [#allocation9], 1 }
 0x9ec   :  { %8704 = vsyncpa [#allocation12], 1 }
 0x9ed   :  { %8705 = vsyncpa [#allocation15], 1 }

</bundles_post_ra>
